<compile_context>
chip_gen: v7x
topology: tpu7x:2x2x1
jax: 0.10.0
libtpu: 0.0.40
codegen_flags: <defaults>
</compile_context>

<pallas_src>
from functools import partial

import jax
import jax.numpy as jnp
from jax.experimental import pallas as pl
from jax.experimental.pallas import tpu as pltpu

_BN_EPS = 1e-5


def _round_up(x: int, m: int) -> int:
    return (x + m - 1) // m * m


# ----------------------------- Pallas kernel --------------------------------

def _fused_mlp_kernel(x_ref, *refs):
    """Fused (Linear -> GELU)^4 -> Linear over one batch tile.

    refs = (w1, b1, ..., wL, bL, out_ref).  x and all weights are bf16; biases
    f32; every matmul accumulates in f32 on the MXU (preferred_element_type).
    Eval-mode BatchNorm affines are folded into the next linear offline;
    Dropout is identity in eval mode.
    """
    o_ref = refs[-1]
    wb = refs[:-1]
    n_layers = len(wb) // 2

    h = x_ref[...]                                   # (tile_b, d_in) bf16
    for l in range(n_layers):
        w_ref = wb[2 * l]
        b_ref = wb[2 * l + 1]
        y = jnp.dot(h, w_ref[...],
                    preferred_element_type=jnp.float32) + b_ref[...]
        if l < n_layers - 1:
            # tanh-approx GELU in f32 (EUP tanh, few VALU ops); cast the result
            # straight to bf16 so the live activation footprint is halved and
            # the next matmul needs no extra cast.
            h = jax.nn.gelu(y, approximate=True).astype(jnp.bfloat16)
        else:
            h = y                                    # head: plain linear (f32)
    o_ref[...] = h


# ----------------------------- pallas_call wrapper ---------------------------

def _fused_mlp_pallas(x_pad, layers, tile_b):
    """x_pad: (B_pad, d_in_pad) bf16; layers: [(w bf16 (in,out), b f32 (1,out))].

    VMEM budget at the max tile (512 rows): input 512x1024 bf16 = 1 MiB x2
    buffers, output 512x128 f32 = 0.25 MiB x2, weights+biases ~3.5 MiB x2
    (default double-buffer, but constant index_maps mean they are never
    re-DMA'd), plus a few MiB of in-kernel f32 intermediates -> ~15 MiB,
    comfortably inside the explicit 32 MiB limit on v5e/v6e/v7x.
    """
    B_pad, d_in = x_pad.shape
    out_dim = layers[-1][0].shape[1]
    grid = (B_pad // tile_b,)

    in_specs = [pl.BlockSpec((tile_b, d_in), lambda i: (i, 0))]
    flat_args = [x_pad]
    for w, b in layers:
        # Whole-array blocks with constant index_map -> weights stay resident
        # in VMEM across batch tiles (no re-DMA per grid step).
        in_specs.append(pl.BlockSpec(w.shape, lambda i: (0, 0)))
        in_specs.append(pl.BlockSpec(b.shape, lambda i: (0, 0)))
        flat_args += [w, b]

    return pl.pallas_call(
        _fused_mlp_kernel,
        out_shape=jax.ShapeDtypeStruct((B_pad, out_dim), jnp.float32),
        grid_spec=pltpu.PrefetchScalarGridSpec(
            num_scalar_prefetch=0,
            grid=grid,
            in_specs=in_specs,
            out_specs=pl.BlockSpec((tile_b, out_dim), lambda i: (i, 0)),
        ),
        compiler_params=pltpu.CompilerParams(
            # Batch tiles are independent -> shard over v7x's 2 TensorCores.
            dimension_semantics=("parallel",),
            vmem_limit_bytes=32 * 1024 * 1024,
        ),
    )(*flat_args)


# ----------------------------- batch tiling ----------------------------------

def _choose_batch_tiling(B: int):
    """Pick (tile_b, B_pad).

    Large tiles amortize the ~0.35us per-grid-step overhead; at least 2 grid
    steps keep both v7x TensorCores busy (1 TC on v5e/v6e -> harmless there).
    Aim for ~4 tiles, capped at 512 rows; rows are a multiple of 16 so bf16
    tiles are sublane-packed.
    """
    tile_b = min(512, _round_up(max(1, -(-B // 4)), 16))
    B_pad = _round_up(B, tile_b)
    if B_pad // tile_b < 2:
        B_pad = 2 * tile_b            # guarantee grid >= 2 (v7x megacore)
    return tile_b, B_pad


# ----------------------------- parameter setup ------------------------------

def init_vanila_mlp_params(key, input_dim, num_classes=5):
    """Raw parameters mirroring the PyTorch module (per-block Linear + BN).

    Linear weights ~ trunc_normal_(std=0.2) with torch's absolute bounds
    [-2, 2]; biases 0.  BatchNorm1d eval-mode statistics/affine are drawn
    NON-trivially (as if trained) so the BN fold below is exercised in the
    general case (a fresh PyTorch module would have mean=0, var=1, gamma=1,
    beta=0, for which the fold is trivially exact as well).
    """
    cfg = [[1, 1000, 0.0], [1, 500, 0.2], [2, 200, 0.2]]
    std = 0.2

    blocks = []
    in_dim = input_dim
    for n, out_dim, _p in cfg:
        for _ in range(n):
            key, kw, kg, kb, km, kv = jax.random.split(key, 6)
            w = std * jax.random.truncated_normal(
                kw, -2.0 / std, 2.0 / std, (out_dim, in_dim), dtype=jnp.float32)
            blocks.append(dict(
                w=w,
                b=jnp.zeros((out_dim,), jnp.float32),
                gamma=1.0 + 0.2 * jax.random.normal(kg, (out_dim,), jnp.float32),
                beta=0.1 * jax.random.normal(kb, (out_dim,), jnp.float32),
                mean=0.5 * jax.random.normal(km, (out_dim,), jnp.float32),
                var=jax.random.uniform(kv, (out_dim,), jnp.float32,
                                       minval=0.5, maxval=1.5),
            ))
            in_dim = out_dim
    key, kh = jax.random.split(key)
    hw = std * jax.random.truncated_normal(
        kh, -2.0 / std, 2.0 / std, (num_classes, in_dim), dtype=jnp.float32)
    head = dict(w=hw, b=jnp.zeros((num_classes,), jnp.float32))
    return dict(blocks=blocks, head=head)


def build_kernel_layers(params):
    """Fold + pad + cast the raw params into the form the kernel consumes."""
    # 1) Linears in (in, out) layout.
    linears = [(blk["w"].T, blk["b"]) for blk in params["blocks"]]
    linears.append((params["head"]["w"].T, params["head"]["b"]))

    # 2) Fold each block's eval-mode BN (which sits AFTER the GELU:
    #    Linear -> GELU -> BN -> Dropout) into the NEXT linear.  Exact for any
    #    running stats: (scale*a + shift) @ Wn + bn
    #                 = a @ (scale[:,None]*Wn) + (shift @ Wn + bn).
    folded = [linears[0]]
    for i, blk in enumerate(params["blocks"]):
        scale = blk["gamma"] / jnp.sqrt(blk["var"] + _BN_EPS)
        shift = blk["beta"] - blk["mean"] * scale
        w_next, b_next = linears[i + 1]
        folded.append((scale[:, None] * w_next, b_next + shift @ w_next))

    # 3) Zero-pad every in/out width to a multiple of 128 (lane-dense stores,
    #    full MXU columns) and cast weights to bf16 (accumulation stays f32).
    #    Note: an int8 + per-channel-scale weight path would double MXU rate
    #    on v5e/v6e, but v7x's MXU has no integer path, so bf16 is the
    #    portable choice here.
    layers = []
    for w_t, b in folded:
        d_in, d_out = w_t.shape
        d_in_p, d_out_p = _round_up(d_in, 128), _round_up(d_out, 128)
        w_p = jnp.zeros((d_in_p, d_out_p), jnp.float32).at[:d_in, :d_out].set(w_t)
        b_p = jnp.zeros((1, d_out_p), jnp.float32).at[0, :d_out].set(b)
        layers.append((w_p.astype(jnp.bfloat16), b_p))
    return layers


# ----------------------------- full forward ---------------------------------

@partial(jax.jit, static_argnames=("num_classes",))
def vanila_mlp_forward(x_nchw, layers, num_classes=5):
    B = x_nchw.shape[0]
    x = x_nchw.reshape(B, -1)                      # x.view(B, -1)
    d_in = x.shape[1]
    d_in_p = layers[0][0].shape[0]

    tile_b, B_pad = _choose_batch_tiling(B)
    # Pad batch & features and materialize in bf16: halves input DMA and drops
    # the in-kernel f32->bf16 cast for layer 0.
    x_p = jnp.zeros((B_pad, d_in_p), jnp.bfloat16).at[:B, :d_in].set(
        x.astype(jnp.bfloat16))

    out_p = _fused_mlp_pallas(x_p, layers, tile_b)
    # TODO(synk): training-mode BatchNorm batch statistics and Dropout masking
    # are not implemented (eval-mode forward only).
    return out_p[:B, :num_classes]


# ----------------------------- references (pure JAX) -------------------------

def _kernel_math_replica(x_nchw, layers, num_classes):
    """Exact pure-JAX replica of the kernel's math (folded, padded, bf16)."""
    B = x_nchw.shape[0]
    x = x_nchw.reshape(B, -1)
    d_in_p = layers[0][0].shape[0]
    h = jnp.zeros((B, d_in_p), jnp.bfloat16).at[:, :x.shape[1]].set(
        x.astype(jnp.bfloat16))
    for l, (w, b) in enumerate(layers):
        y = jnp.dot(h, w, preferred_element_type=jnp.float32) + b
        if l < len(layers) - 1:
            h = jax.nn.gelu(y, approximate=True).astype(jnp.bfloat16)
        else:
            h = y
    return h[:, :num_classes]


def vanila_mlp_reference_f32(x_nchw, params):
    """Structure-faithful eval-mode forward in full f32 (no fold, no padding):
    per block Linear -> GELU(tanh) -> BatchNorm(running stats) -> Dropout(id),
    then head Linear.  Mirrors the PyTorch module graph 1:1."""
    B = x_nchw.shape[0]
    h = x_nchw.reshape(B, -1).astype(jnp.float32)
    for blk in params["blocks"]:
        y = h @ blk["w"].T + blk["b"]
        a = jax.nn.gelu(y, approximate=True)
        h = (a - blk["mean"]) / jnp.sqrt(blk["var"] + _BN_EPS) * blk["gamma"] \
            + blk["beta"]
        # Dropout: identity in eval mode.
    return h @ params["head"]["w"].T + params["head"]["b"]


# ----------------------------- main ------------------------------------------

if __name__ == "__main__":
    key = jax.random.PRNGKey(0)
    k_x, k_p = jax.random.split(key)

    # Small deterministic NCHW input batch.
    B, C, H, W = 2, 4, 16, 16
    x = jax.random.normal(k_x, (B, C, H, W), dtype=jnp.float32)

    input_dim = C * H * W                 # 1024
    num_classes = 5
    params = init_vanila_mlp_params(k_p, input_dim, num_classes)
    layers = build_kernel_layers(params)

    out = vanila_mlp_forward(x, layers, num_classes=num_classes)
    out = jax.block_until_ready(out)
    assert out.shape == (B, num_classes), out.shape
    assert bool(jnp.all(jnp.isfinite(out)))

    # Check 1: kernel matches a pure-JAX replica of its own (folded/padded/
    # bf16) math -> validates the Pallas tiling / BlockSpec plumbing.
    r1 = _kernel_math_replica(x, layers, num_classes)
    # Check 2: kernel matches the UNFUSED, structure-faithful f32 module
    # forward with non-trivial BN statistics -> validates the BN fold and the
    # overall semantics (residual gap = deliberate bf16 weights/activations).
    r2 = vanila_mlp_reference_f32(x, params)

    scale = float(jnp.max(jnp.abs(r2))) + 1e-6
    err1 = float(jnp.max(jnp.abs(out - r1))) / scale
    err2 = float(jnp.max(jnp.abs(out - r2))) / scale
    assert err1 < 5e-3, f"kernel vs replica rel-err {err1}"
    assert err2 < 3e-2, f"kernel vs unfused f32 reference rel-err {err2}"

    print("KERNEL_OK")
</pallas_src>

<mosaic_0001>
module attributes {stable_mosaic.version = 11 : i64} {
  func.func @_fused_mlp_kernel(%arg0: i32, %arg1: memref<16x1024xbf16, #tpu.memory_space<vmem>>, %arg2: memref<1024x1024xbf16, #tpu.memory_space<vmem>>, %arg3: memref<1x1024xf32, #tpu.memory_space<vmem>>, %arg4: memref<1024x512xbf16, #tpu.memory_space<vmem>>, %arg5: memref<1x512xf32, #tpu.memory_space<vmem>>, %arg6: memref<512x256xbf16, #tpu.memory_space<vmem>>, %arg7: memref<1x256xf32, #tpu.memory_space<vmem>>, %arg8: memref<256x256xbf16, #tpu.memory_space<vmem>>, %arg9: memref<1x256xf32, #tpu.memory_space<vmem>>, %arg10: memref<256x128xbf16, #tpu.memory_space<vmem>>, %arg11: memref<1x128xf32, #tpu.memory_space<vmem>>, %arg12: memref<16x128xf32, #tpu.memory_space<vmem>>) attributes {dimension_semantics = [#tpu.dimension_semantics<parallel>], iteration_bounds = array<i64: 2>, scalar_prefetch = 0 : i64, scratch_operands = 0 : i64, tpu.core_type = #tpu.core_type<tc>, window_params = [{transform_indices = @transform_0, window_bounds = array<i64: 16, 1024>}, {pipeline_mode = #tpu.pipeline_mode<synchronous>, transform_indices = @transform_1, window_bounds = array<i64: 1024, 1024>}, {pipeline_mode = #tpu.pipeline_mode<synchronous>, transform_indices = @transform_2, window_bounds = array<i64: 1, 1024>}, {pipeline_mode = #tpu.pipeline_mode<synchronous>, transform_indices = @transform_3, window_bounds = array<i64: 1024, 512>}, {pipeline_mode = #tpu.pipeline_mode<synchronous>, transform_indices = @transform_4, window_bounds = array<i64: 1, 512>}, {pipeline_mode = #tpu.pipeline_mode<synchronous>, transform_indices = @transform_5, window_bounds = array<i64: 512, 256>}, {pipeline_mode = #tpu.pipeline_mode<synchronous>, transform_indices = @transform_6, window_bounds = array<i64: 1, 256>}, {pipeline_mode = #tpu.pipeline_mode<synchronous>, transform_indices = @transform_7, window_bounds = array<i64: 256, 256>}, {pipeline_mode = #tpu.pipeline_mode<synchronous>, transform_indices = @transform_8, window_bounds = array<i64: 1, 256>}, {pipeline_mode = #tpu.pipeline_mode<synchronous>, transform_indices = @transform_9, window_bounds = array<i64: 256, 128>}, {pipeline_mode = #tpu.pipeline_mode<synchronous>, transform_indices = @transform_10, window_bounds = array<i64: 1, 128>}, {transform_indices = @transform_11, window_bounds = array<i64: 16, 128>}]} {
    %c0 = arith.constant 0 : index
    %c0_0 = arith.constant 0 : index
    %0 = vector.load %arg1[%c0, %c0_0] : memref<16x1024xbf16, #tpu.memory_space<vmem>>, vector<16x1024xbf16>
    %c0_1 = arith.constant 0 : index
    %c0_2 = arith.constant 0 : index
    %1 = vector.load %arg2[%c0_1, %c0_2] : memref<1024x1024xbf16, #tpu.memory_space<vmem>>, vector<1024x1024xbf16>
    %cst = arith.constant dense<0.000000e+00> : vector<16x1024xf32>
    %2 = tpu.matmul %0, %1, %cst {dimension_numbers = #tpu.dot_dimension_numbers<[1], [0], [0], [1], [0, 0, 1, 1], [], []>} : vector<16x1024xbf16>, vector<1024x1024xbf16>, vector<16x1024xf32> -> vector<16x1024xf32>
    %c0_3 = arith.constant 0 : index
    %c0_4 = arith.constant 0 : index
    %3 = vector.load %arg3[%c0_3, %c0_4] : memref<1x1024xf32, #tpu.memory_space<vmem>>, vector<1x1024xf32>
    %4 = vector.broadcast %3 : vector<1x1024xf32> to vector<16x1024xf32>
    %5 = arith.addf %2, %4 : vector<16x1024xf32>
    %6 = arith.mulf %5, %5 : vector<16x1024xf32>
    %7 = arith.mulf %5, %6 : vector<16x1024xf32>
    %cst_5 = arith.constant 4.471500e-02 : f32
    %8 = vector.broadcast %cst_5 : f32 to vector<16x1024xf32>
    %9 = arith.mulf %8, %7 : vector<16x1024xf32>
    %10 = arith.addf %5, %9 : vector<16x1024xf32>
    %cst_6 = arith.constant 0.797884583 : f32
    %11 = vector.broadcast %cst_6 : f32 to vector<16x1024xf32>
    %12 = arith.mulf %11, %10 : vector<16x1024xf32>
    %13 = math.tanh %12 : vector<16x1024xf32>
    %cst_7 = arith.constant 1.000000e+00 : f32
    %14 = vector.broadcast %cst_7 : f32 to vector<16x1024xf32>
    %15 = arith.addf %14, %13 : vector<16x1024xf32>
    %cst_8 = arith.constant 5.000000e-01 : f32
    %16 = vector.broadcast %cst_8 : f32 to vector<16x1024xf32>
    %17 = arith.mulf %16, %15 : vector<16x1024xf32>
    %18 = arith.mulf %5, %17 : vector<16x1024xf32>
    %19 = arith.truncf %18 : vector<16x1024xf32> to vector<16x1024xbf16>
    %c0_9 = arith.constant 0 : index
    %c0_10 = arith.constant 0 : index
    %20 = vector.load %arg4[%c0_9, %c0_10] : memref<1024x512xbf16, #tpu.memory_space<vmem>>, vector<1024x512xbf16>
    %cst_11 = arith.constant dense<0.000000e+00> : vector<16x512xf32>
    %21 = tpu.matmul %19, %20, %cst_11 {dimension_numbers = #tpu.dot_dimension_numbers<[1], [0], [0], [1], [0, 0, 1, 1], [], []>} : vector<16x1024xbf16>, vector<1024x512xbf16>, vector<16x512xf32> -> vector<16x512xf32>
    %c0_12 = arith.constant 0 : index
    %c0_13 = arith.constant 0 : index
    %22 = vector.load %arg5[%c0_12, %c0_13] : memref<1x512xf32, #tpu.memory_space<vmem>>, vector<1x512xf32>
    %23 = vector.broadcast %22 : vector<1x512xf32> to vector<16x512xf32>
    %24 = arith.addf %21, %23 : vector<16x512xf32>
    %25 = arith.mulf %24, %24 : vector<16x512xf32>
    %26 = arith.mulf %24, %25 : vector<16x512xf32>
    %cst_14 = arith.constant 4.471500e-02 : f32
    %27 = vector.broadcast %cst_14 : f32 to vector<16x512xf32>
    %28 = arith.mulf %27, %26 : vector<16x512xf32>
    %29 = arith.addf %24, %28 : vector<16x512xf32>
    %cst_15 = arith.constant 0.797884583 : f32
    %30 = vector.broadcast %cst_15 : f32 to vector<16x512xf32>
    %31 = arith.mulf %30, %29 : vector<16x512xf32>
    %32 = math.tanh %31 : vector<16x512xf32>
    %cst_16 = arith.constant 1.000000e+00 : f32
    %33 = vector.broadcast %cst_16 : f32 to vector<16x512xf32>
    %34 = arith.addf %33, %32 : vector<16x512xf32>
    %cst_17 = arith.constant 5.000000e-01 : f32
    %35 = vector.broadcast %cst_17 : f32 to vector<16x512xf32>
    %36 = arith.mulf %35, %34 : vector<16x512xf32>
    %37 = arith.mulf %24, %36 : vector<16x512xf32>
    %38 = arith.truncf %37 : vector<16x512xf32> to vector<16x512xbf16>
    %c0_18 = arith.constant 0 : index
    %c0_19 = arith.constant 0 : index
    %39 = vector.load %arg6[%c0_18, %c0_19] : memref<512x256xbf16, #tpu.memory_space<vmem>>, vector<512x256xbf16>
    %cst_20 = arith.constant dense<0.000000e+00> : vector<16x256xf32>
    %40 = tpu.matmul %38, %39, %cst_20 {dimension_numbers = #tpu.dot_dimension_numbers<[1], [0], [0], [1], [0, 0, 1, 1], [], []>} : vector<16x512xbf16>, vector<512x256xbf16>, vector<16x256xf32> -> vector<16x256xf32>
    %c0_21 = arith.constant 0 : index
    %c0_22 = arith.constant 0 : index
    %41 = vector.load %arg7[%c0_21, %c0_22] : memref<1x256xf32, #tpu.memory_space<vmem>>, vector<1x256xf32>
    %42 = vector.broadcast %41 : vector<1x256xf32> to vector<16x256xf32>
    %43 = arith.addf %40, %42 : vector<16x256xf32>
    %44 = arith.mulf %43, %43 : vector<16x256xf32>
    %45 = arith.mulf %43, %44 : vector<16x256xf32>
    %cst_23 = arith.constant 4.471500e-02 : f32
    %46 = vector.broadcast %cst_23 : f32 to vector<16x256xf32>
    %47 = arith.mulf %46, %45 : vector<16x256xf32>
    %48 = arith.addf %43, %47 : vector<16x256xf32>
    %cst_24 = arith.constant 0.797884583 : f32
    %49 = vector.broadcast %cst_24 : f32 to vector<16x256xf32>
    %50 = arith.mulf %49, %48 : vector<16x256xf32>
    %51 = math.tanh %50 : vector<16x256xf32>
    %cst_25 = arith.constant 1.000000e+00 : f32
    %52 = vector.broadcast %cst_25 : f32 to vector<16x256xf32>
    %53 = arith.addf %52, %51 : vector<16x256xf32>
    %cst_26 = arith.constant 5.000000e-01 : f32
    %54 = vector.broadcast %cst_26 : f32 to vector<16x256xf32>
    %55 = arith.mulf %54, %53 : vector<16x256xf32>
    %56 = arith.mulf %43, %55 : vector<16x256xf32>
    %57 = arith.truncf %56 : vector<16x256xf32> to vector<16x256xbf16>
    %c0_27 = arith.constant 0 : index
    %c0_28 = arith.constant 0 : index
    %58 = vector.load %arg8[%c0_27, %c0_28] : memref<256x256xbf16, #tpu.memory_space<vmem>>, vector<256x256xbf16>
    %cst_29 = arith.constant dense<0.000000e+00> : vector<16x256xf32>
    %59 = tpu.matmul %57, %58, %cst_29 {dimension_numbers = #tpu.dot_dimension_numbers<[1], [0], [0], [1], [0, 0, 1, 1], [], []>} : vector<16x256xbf16>, vector<256x256xbf16>, vector<16x256xf32> -> vector<16x256xf32>
    %c0_30 = arith.constant 0 : index
    %c0_31 = arith.constant 0 : index
    %60 = vector.load %arg9[%c0_30, %c0_31] : memref<1x256xf32, #tpu.memory_space<vmem>>, vector<1x256xf32>
    %61 = vector.broadcast %60 : vector<1x256xf32> to vector<16x256xf32>
    %62 = arith.addf %59, %61 : vector<16x256xf32>
    %63 = arith.mulf %62, %62 : vector<16x256xf32>
    %64 = arith.mulf %62, %63 : vector<16x256xf32>
    %cst_32 = arith.constant 4.471500e-02 : f32
    %65 = vector.broadcast %cst_32 : f32 to vector<16x256xf32>
    %66 = arith.mulf %65, %64 : vector<16x256xf32>
    %67 = arith.addf %62, %66 : vector<16x256xf32>
    %cst_33 = arith.constant 0.797884583 : f32
    %68 = vector.broadcast %cst_33 : f32 to vector<16x256xf32>
    %69 = arith.mulf %68, %67 : vector<16x256xf32>
    %70 = math.tanh %69 : vector<16x256xf32>
    %cst_34 = arith.constant 1.000000e+00 : f32
    %71 = vector.broadcast %cst_34 : f32 to vector<16x256xf32>
    %72 = arith.addf %71, %70 : vector<16x256xf32>
    %cst_35 = arith.constant 5.000000e-01 : f32
    %73 = vector.broadcast %cst_35 : f32 to vector<16x256xf32>
    %74 = arith.mulf %73, %72 : vector<16x256xf32>
    %75 = arith.mulf %62, %74 : vector<16x256xf32>
    %76 = arith.truncf %75 : vector<16x256xf32> to vector<16x256xbf16>
    %c0_36 = arith.constant 0 : index
    %c0_37 = arith.constant 0 : index
    %77 = vector.load %arg10[%c0_36, %c0_37] : memref<256x128xbf16, #tpu.memory_space<vmem>>, vector<256x128xbf16>
    %cst_38 = arith.constant dense<0.000000e+00> : vector<16x128xf32>
    %78 = tpu.matmul %76, %77, %cst_38 {dimension_numbers = #tpu.dot_dimension_numbers<[1], [0], [0], [1], [0, 0, 1, 1], [], []>} : vector<16x256xbf16>, vector<256x128xbf16>, vector<16x128xf32> -> vector<16x128xf32>
    %c0_39 = arith.constant 0 : index
    %c0_40 = arith.constant 0 : index
    %79 = vector.load %arg11[%c0_39, %c0_40] : memref<1x128xf32, #tpu.memory_space<vmem>>, vector<1x128xf32>
    %80 = vector.broadcast %79 : vector<1x128xf32> to vector<16x128xf32>
    %81 = arith.addf %78, %80 : vector<16x128xf32>
    %c0_41 = arith.constant 0 : index
    %c0_42 = arith.constant 0 : index
    %82 = vector.load %arg12[%c0_41, %c0_42] : memref<16x128xf32, #tpu.memory_space<vmem>>, vector<16x128xf32>
    tpu.vector_store %arg12[%c0_41, %c0_42], %81 {strides = array<i32>} : memref<16x128xf32, #tpu.memory_space<vmem>>, vector<16x128xf32>,
    return
  }
  func.func @transform_0(%arg0: i32) -> (i32, i32) {
    %c0_i32 = arith.constant 0 : i32
    %c0_i32_0 = arith.constant 0 : i32
    return %arg0, %c0_i32 : i32, i32
  }
  func.func @transform_1(%arg0: i32) -> (i32, i32) {
    %c0_i32 = arith.constant 0 : i32
    %c0_i32_0 = arith.constant 0 : i32
    %c0_i32_1 = arith.constant 0 : i32
    return %c0_i32, %c0_i32_0 : i32, i32
  }
  func.func @transform_2(%arg0: i32) -> (i32, i32) {
    %c0_i32 = arith.constant 0 : i32
    %c0_i32_0 = arith.constant 0 : i32
    %c0_i32_1 = arith.constant 0 : i32
    return %c0_i32, %c0_i32_0 : i32, i32
  }
  func.func @transform_3(%arg0: i32) -> (i32, i32) {
    %c0_i32 = arith.constant 0 : i32
    %c0_i32_0 = arith.constant 0 : i32
    %c0_i32_1 = arith.constant 0 : i32
    return %c0_i32, %c0_i32_0 : i32, i32
  }
  func.func @transform_4(%arg0: i32) -> (i32, i32) {
    %c0_i32 = arith.constant 0 : i32
    %c0_i32_0 = arith.constant 0 : i32
    %c0_i32_1 = arith.constant 0 : i32
    return %c0_i32, %c0_i32_0 : i32, i32
  }
  func.func @transform_5(%arg0: i32) -> (i32, i32) {
    %c0_i32 = arith.constant 0 : i32
    %c0_i32_0 = arith.constant 0 : i32
    %c0_i32_1 = arith.constant 0 : i32
    return %c0_i32, %c0_i32_0 : i32, i32
  }
  func.func @transform_6(%arg0: i32) -> (i32, i32) {
    %c0_i32 = arith.constant 0 : i32
    %c0_i32_0 = arith.constant 0 : i32
    %c0_i32_1 = arith.constant 0 : i32
    return %c0_i32, %c0_i32_0 : i32, i32
  }
  func.func @transform_7(%arg0: i32) -> (i32, i32) {
    %c0_i32 = arith.constant 0 : i32
    %c0_i32_0 = arith.constant 0 : i32
    %c0_i32_1 = arith.constant 0 : i32
    return %c0_i32, %c0_i32_0 : i32, i32
  }
  func.func @transform_8(%arg0: i32) -> (i32, i32) {
    %c0_i32 = arith.constant 0 : i32
    %c0_i32_0 = arith.constant 0 : i32
    %c0_i32_1 = arith.constant 0 : i32
    return %c0_i32, %c0_i32_0 : i32, i32
  }
  func.func @transform_9(%arg0: i32) -> (i32, i32) {
    %c0_i32 = arith.constant 0 : i32
    %c0_i32_0 = arith.constant 0 : i32
    %c0_i32_1 = arith.constant 0 : i32
    return %c0_i32, %c0_i32_0 : i32, i32
  }
  func.func @transform_10(%arg0: i32) -> (i32, i32) {
    %c0_i32 = arith.constant 0 : i32
    %c0_i32_0 = arith.constant 0 : i32
    %c0_i32_1 = arith.constant 0 : i32
    return %c0_i32, %c0_i32_0 : i32, i32
  }
  func.func @transform_11(%arg0: i32) -> (i32, i32) {
    %c0_i32 = arith.constant 0 : i32
    %c0_i32_0 = arith.constant 0 : i32
    return %arg0, %c0_i32 : i32, i32
  }
}

</mosaic_0001>

<bundles_post_ra>
// kernel: vanila_mlp_forward.1
= control target key start
LH: loop header
LB: loop body
LE: loop exit
PB: predicated region body
PF: predicated region fallthrough
CT: control target
= control target key end

     0   :  { %16 = vsyncpa [#allocation3], 0  ;;  %s10500_s0 = inlined_call_operand.vmem [shape: bf16[32,1024], index: 0, kind: input, shape index: {}]   ;;  %s10501_s1 = inlined_call_operand.hbm [shape: bf16[1024,1024], index: 1, kind: input, shape index: {}]   ;;  %s10502_s2 = inlined_call_operand.hbm [shape: f32[1,1024], index: 2, kind: input, shape index: {}]   ;;  %s10503_s3 = inlined_call_operand.hbm [shape: bf16[1024,512], index: 3, kind: input, shape index: {}]   ;;  %s10504_s4 = inlined_call_operand.hbm [shape: f32[1,512], index: 4, kind: input, shape index: {}]   ;;  %s10505_s5 = inlined_call_operand.hbm [shape: bf16[512,256], index: 5, kind: input, shape index: {}]   ;;  %s10506_s6 = inlined_call_operand.hbm [shape: f32[1,256], index: 6, kind: input, shape index: {}]   ;;  %s10507_s7 = inlined_call_operand.hbm [shape: bf16[256,256], index: 7, kind: input, shape index: {}]   ;;  %s10508_s8 = inlined_call_operand.hbm [shape: f32[1,256], index: 8, kind: input, shape index: {}]   ;;  %s10509_s9 = inlined_call_operand.hbm [shape: bf16[256,128], index: 9, kind: input, shape index: {}]   ;;  %s10510_s10 = inlined_call_operand.hbm [shape: f32[1,128], index: 10, kind: input, shape index: {}]   ;;  %s10511_s11 = inlined_call_operand.vmem [shape: f32[32,128], index: 11, kind: output, shape index: {}]  }
   0x1   :  { %17 = vsyncpa [#allocation5], 0 }
   0x2   :  { %18 = vsyncpa [#allocation8], 0 }
   0x3   :  { %19 = vsyncpa [#allocation11], 0 }
   0x4   :  { %20 = vsyncpa [#allocation14], 0 }
   0x5   :  { %21 = vsyncpa [#allocation17], 0  ;;  %s9811_s17 = smov 0  }
   0x6 LB: > { %s9733_s18 = smov [#allocation4]   ;;  %s10515_s20 = sadd.s32 4294967295, %s9731_s17   ;;  %s9731_s17 = sphi %s9811_s17, %s27_s17  }
   0x7   : > { %s320_s19 = sshll.u32 %s9733_s18, 4  ;;  %p7649_p0 = scmp.ge.s32.totalorder %s9731_s17, 1  ;;  %s9825_s19 = int_to_ptr.vmem [resolvable:$true] %s320_s19 }
   0x8   : > { %p294_p1 = scmp.lt.s32.totalorder %s9731_s17, 3  ;;  %p9821_p2 = scmp.eq.s32.totalorder %s10515_s20, 0 }
   0x9   : > { %s9734_s23 = smov [#allocation7]   ;;  %s9735_s25 = smov [#allocation10]  }
   0xa   : > { %s10516_s21 = scalar_select %p9821_p2, 1, 0 }
   0xb   : > { %p9827_p3 = pnand %p7649_p0, %p294_p1  ;;  %s344_s24 = sshll.u32 %s9734_s23, 4  ;;  %s9833_s24 = int_to_ptr.vmem [resolvable:$true] %s344_s24 }
   0xc   : > { %s368_s26 = sshll.u32 %s9735_s25, 4  ;;  %s9736_s28 = smov [#allocation13]   ;;  %s9841_s26 = int_to_ptr.vmem [resolvable:$true] %s368_s26 }
   0xd   : > { %s10517_s22 = scalar_select %p9827_p3, 1, 0 }
   0xe   : > { %p8735_p4 = pneg %p9827_p3  ;;  %s392_s29 = sshll.u32 %s9736_s28, 4  ;;  %s9843_s29 = int_to_ptr.vmem [resolvable:$true] %s392_s29 }
   0xf   : > { %s9421_s13 = scalar_lea.hbm %s10502_s2, 128 }
  0x10   : > { %p9837_p5 = pnand %p9821_p2, %p8735_p4  ;;  %p9422_p6 = scmp.ne.s32.totalorder %s10502_s2, %s9421_s13 }
  0x11   : > { %p9428_p10 = scmp.lt.u32.totalorder %s9421_s13, %s10502_s2 }
  0x12   : > { %p9853_p7 = pneg %p9837_p5 }
  0x14   : > { %p9424_p8 = pnand %p9853_p7, %p9422_p6 }
  0x16   : > { %p9425_p9 = pneg %p9424_p8 }
  0x18   : > { %p9430_p11 = pnand %p9428_p10, %p9425_p9 }
  0x1a   : > { %9433 = shalt.err (!%p9430_p11)
}
  0x1b   : > { %s9434_s25 = scalar_lea.vmem %s9825_s19, 128  ;;  %p9442_p1 = scmp.lt.s32.totalorder %s9825_s19, %s9825_s19 }
  0x1c   : > { %p9435_p12 = scmp.ne.s32.totalorder %s9825_s19, %s9434_s25  ;;  %p9443_p4 = scmp.lt.s32.totalorder %s9434_s25, %s9434_s25 }
  0x1e   : > { %p9437_p13 = pnand %p9435_p12, %p9853_p7  ;;  %p9444_p6 = por %p9443_p4, %p9442_p1 }
  0x20   : > { %p9438_p0 = pneg %p9437_p13 }
  0x22   : > { %p9445_p8 = pnand %p9444_p6, %p9438_p0 }
  0x24   : > { %9448 = shalt.err (!%p9445_p8)
}
  0x25   : > { %8741 = dma.hbm_to_vmem [thread:$0]  (!%p9837_p5), %s10502_s2, 128, %s9825_s19, [#allocation5]  }
  0x26   : > { %s9449_s14 = scalar_lea.hbm %s10504_s4, 64 }
  0x27   : > { %p9450_p9 = scmp.ne.s32.totalorder %s10504_s4, %s9449_s14  ;;  %p9456_p12 = scmp.lt.u32.totalorder %s9449_s14, %s10504_s4 }
  0x29   : > { %p9452_p10 = pnand %p9450_p9, %p9853_p7 }
  0x2b   : > { %p9453_p11 = pneg %p9452_p10 }
  0x2d   : > { %p9458_p13 = pnand %p9456_p12, %p9453_p11 }
  0x2f   : > { %9461 = shalt.err (!%p9458_p13)
}
  0x30   : > { %s9462_s19 = scalar_lea.vmem %s9833_s24, 64  ;;  %p9470_p6 = scmp.lt.s32.totalorder %s9833_s24, %s9833_s24 }
  0x31   : > { %p9463_p0 = scmp.ne.s32.totalorder %s9833_s24, %s9462_s19  ;;  %p9471_p8 = scmp.lt.s32.totalorder %s9462_s19, %s9462_s19 }
  0x33   : > { %p9465_p1 = pnand %p9463_p0, %p9853_p7  ;;  %p9472_p9 = por %p9471_p8, %p9470_p6 }
  0x35   : > { %p9466_p4 = pneg %p9465_p1 }
  0x37   : > { %p9473_p10 = pnand %p9472_p9, %p9466_p4 }
  0x39   : > { %9476 = shalt.err (!%p9473_p10)
}
  0x3a   : > { %8747 = dma.hbm_to_vmem [thread:$0]  (!%p9837_p5), %s10504_s4, 64, %s9833_s24, [#allocation8]  }
  0x3b   : > { %s9477_s14 = scalar_lea.hbm %s10506_s6, 32 }
  0x3c   : > { %p9478_p11 = scmp.ne.s32.totalorder %s10506_s6, %s9477_s14  ;;  %p9484_p0 = scmp.lt.u32.totalorder %s9477_s14, %s10506_s6 }
  0x3e   : > { %p9480_p12 = pnand %p9478_p11, %p9853_p7 }
  0x40   : > { %p9481_p13 = pneg %p9480_p12 }
  0x42   : > { %p9486_p1 = pnand %p9484_p0, %p9481_p13 }
  0x44   : > { %9489 = shalt.err (!%p9486_p1)
}
  0x45   : > { %s9490_s24 = scalar_lea.vmem %s9841_s26, 32  ;;  %p9498_p9 = scmp.lt.s32.totalorder %s9841_s26, %s9841_s26 }
  0x46   : > { %p9491_p4 = scmp.ne.s32.totalorder %s9841_s26, %s9490_s24  ;;  %p9499_p10 = scmp.lt.s32.totalorder %s9490_s24, %s9490_s24 }
  0x48   : > { %p9493_p6 = pnand %p9491_p4, %p9853_p7  ;;  %p9500_p11 = por %p9499_p10, %p9498_p9 }
  0x4a   : > { %p9494_p8 = pneg %p9493_p6 }
  0x4c   : > { %p9501_p12 = pnand %p9500_p11, %p9494_p8 }
  0x4e   : > { %9504 = shalt.err (!%p9501_p12)
}
  0x4f   : > { %8753 = dma.hbm_to_vmem [thread:$0]  (!%p9837_p5), %s10506_s6, 32, %s9841_s26, [#allocation11]  }
  0x50   : > { %s9505_s13 = scalar_lea.hbm %s10508_s8, 32 }
  0x51   : > { %p9506_p13 = scmp.ne.s32.totalorder %s10508_s8, %s9505_s13  ;;  %p9512_p4 = scmp.lt.u32.totalorder %s9505_s13, %s10508_s8 }
  0x53   : > { %p9508_p0 = pnand %p9506_p13, %p9853_p7 }
  0x55   : > { %p9509_p1 = pneg %p9508_p0 }
  0x57   : > { %p9514_p6 = pnand %p9512_p4, %p9509_p1 }
  0x59   : > { %9517 = shalt.err (!%p9514_p6)
}
  0x5a   : > { %s9518_s26 = scalar_lea.vmem %s9843_s29, 32  ;;  %p9526_p11 = scmp.lt.s32.totalorder %s9843_s29, %s9843_s29 }
  0x5b   : > { %p9519_p8 = scmp.ne.s32.totalorder %s9843_s29, %s9518_s26  ;;  %p9527_p12 = scmp.lt.s32.totalorder %s9518_s26, %s9518_s26 }
  0x5d   : > { %p9521_p9 = pnand %p9519_p8, %p9853_p7  ;;  %p9528_p13 = por %p9527_p12, %p9526_p11 }
  0x5f   : > { %p9522_p10 = pneg %p9521_p9 }
  0x61   : > { %p9529_p0 = pnand %p9528_p13, %p9522_p10 }
  0x63   : > { %9532 = shalt.err (!%p9529_p0)
}
  0x64   : > { %8759 = dma.hbm_to_vmem [thread:$0]  (!%p9837_p5), %s10508_s8, 32, %s9843_s29, [#allocation14]  }
  0x65   : > { %s9737_s19 = smov [#allocation2]   ;;  %s9533_s13 = scalar_lea.hbm %s10501_s1, 65536 }
  0x66   : > { %s306_s28 = sshll.u32 %s9737_s19, 4  ;;  %p9534_p1 = scmp.ne.s32.totalorder %s10501_s1, %s9533_s13  ;;  %s307_s28 = int_to_ptr.vmem [resolvable:$true] %s306_s28 }
  0x67   : > { %p9540_p8 = scmp.lt.u32.totalorder %s9533_s13, %s10501_s1 }
  0x68   : > { %p9536_p4 = pnand %p9534_p1, %p9853_p7 }
  0x6a   : > { %p9537_p6 = pneg %p9536_p4 }
  0x6c   : > { %p9542_p9 = pnand %p9540_p8, %p9537_p6 }
  0x6e   : > { %9545 = shalt.err (!%p9542_p9)
}
  0x6f   : > { %s9546_s29 = scalar_lea.vmem %s307_s28, 65536  ;;  %p9554_p13 = scmp.lt.s32.totalorder %s307_s28, %s307_s28 }
  0x70   : > { %p9547_p10 = scmp.ne.s32.totalorder %s307_s28, %s9546_s29  ;;  %p9555_p0 = scmp.lt.s32.totalorder %s9546_s29, %s9546_s29 }
  0x72   : > { %p9549_p11 = pnand %p9547_p10, %p9853_p7  ;;  %p9556_p2 = por %p9555_p0, %p9554_p13 }
  0x74   : > { %p9550_p12 = pneg %p9549_p11 }
  0x76   : > { %p9557_p3 = pnand %p9556_p2, %p9550_p12 }
  0x78   : > { %9560 = shalt.err (!%p9557_p3)
}
  0x79   : > { %s9738_s26 = smov 512   ;;  %s9739_s25 = smov 32  }
  0x7a   : > { %8738 = dma.hbm_to_vmem [thread:$0]  (!%p9837_p5), %s10501_s1, 65536, %s307_s28, [#allocation3], %s9738_s26, %s9738_s26, %s9739_s25  }
  0x7b   : > { %s9740_s30 = smov [#allocation6]   ;;  %s9561_s15 = scalar_lea.hbm %s10503_s3, 32768 }
  0x7c   : > { %s330_s12 = sshll.u32 %s9740_s30, 4  ;;  %p9562_p2 = scmp.ne.s32.totalorder %s10503_s3, %s9561_s15  ;;  %s331_s12 = int_to_ptr.vmem [resolvable:$true] %s330_s12 }
  0x7d   : > { %p9568_p4 = scmp.lt.u32.totalorder %s9561_s15, %s10503_s3 }
  0x7e   : > { %p9564_p3 = pnand %p9562_p2, %p9853_p7 }
  0x80   : > { %p9565_p1 = pneg %p9564_p3 }
  0x82   : > { %p9570_p6 = pnand %p9568_p4, %p9565_p1 }
  0x84   : > { %9573 = shalt.err (!%p9570_p6)
}
  0x85   : > { %s9574_s28 = scalar_lea.vmem %s331_s12, 32768  ;;  %p9582_p11 = scmp.lt.s32.totalorder %s331_s12, %s331_s12 }
  0x86   : > { %p9575_p8 = scmp.ne.s32.totalorder %s331_s12, %s9574_s28  ;;  %p9583_p12 = scmp.lt.s32.totalorder %s9574_s28, %s9574_s28 }
  0x88   : > { %p9577_p9 = pnand %p9575_p8, %p9853_p7  ;;  %p9584_p13 = por %p9583_p12, %p9582_p11 }
  0x8a   : > { %p9578_p10 = pneg %p9577_p9 }
  0x8c   : > { %p9585_p0 = pnand %p9584_p13, %p9578_p10 }
  0x8e   : > { %9588 = shalt.err (!%p9585_p0)
}
  0x8f   : > { %s9741_s26 = smov 256   ;;  %s9742_s25 = smov 16  }
  0x90   : > { %8744 = dma.hbm_to_vmem [thread:$0]  (!%p9837_p5), %s10503_s3, 32768, %s331_s12, [#allocation5], %s9741_s26, %s9741_s26, %s9742_s25  }
  0x91   : > { %s9743_s19 = smov [#allocation9]   ;;  %s9589_s15 = scalar_lea.hbm %s10505_s5, 8192 }
  0x92   : > { %s354_s30 = sshll.u32 %s9743_s19, 4  ;;  %p9590_p2 = scmp.ne.s32.totalorder %s10505_s5, %s9589_s15  ;;  %s355_s30 = int_to_ptr.vmem [resolvable:$true] %s354_s30 }
  0x93   : > { %p9596_p4 = scmp.lt.u32.totalorder %s9589_s15, %s10505_s5 }
  0x94   : > { %p9592_p3 = pnand %p9590_p2, %p9853_p7 }
  0x96   : > { %p9593_p1 = pneg %p9592_p3 }
  0x98   : > { %p9598_p6 = pnand %p9596_p4, %p9593_p1 }
  0x9a   : > { %9601 = shalt.err (!%p9598_p6)
}
  0x9b   : > { %s9602_s12 = scalar_lea.vmem %s355_s30, 8192  ;;  %p9610_p11 = scmp.lt.s32.totalorder %s355_s30, %s355_s30 }
  0x9c   : > { %p9603_p8 = scmp.ne.s32.totalorder %s355_s30, %s9602_s12  ;;  %p9611_p12 = scmp.lt.s32.totalorder %s9602_s12, %s9602_s12 }
  0x9e   : > { %p9605_p9 = pnand %p9603_p8, %p9853_p7  ;;  %p9612_p13 = por %p9611_p12, %p9610_p11 }
  0xa0   : > { %p9606_p10 = pneg %p9605_p9 }
  0xa2   : > { %p9613_p0 = pnand %p9612_p13, %p9606_p10 }
  0xa4   : > { %9616 = shalt.err (!%p9613_p0)
}
  0xa5   : > { %s9744_s26 = smov 128   ;;  %s9745_s25 = smov 8  }
  0xa6   : > { %8750 = dma.hbm_to_vmem [thread:$0]  (!%p9837_p5), %s10505_s5, 8192, %s355_s30, [#allocation8], %s9744_s26, %s9744_s26, %s9745_s25  }
  0xa7   : > { %s9746_s19 = smov [#allocation12]   ;;  %s9747_s14 = smov [#allocation15]  }
  0xa8   : > { %s378_s13 = sshll.u32 %s9746_s19, 4  ;;  %s402_s15 = sshll.u32 %s9747_s14, 4  ;;  %s379_s13 = int_to_ptr.vmem [resolvable:$true] %s378_s13  ;;  %s9997_s15 = int_to_ptr.vmem [resolvable:$true] %s402_s15 }
  0xa9   : > { %s9617_s29 = scalar_lea.hbm %s10507_s7, 4096 }
  0xaa   : > { %p9618_p2 = scmp.ne.s32.totalorder %s10507_s7, %s9617_s29  ;;  %p9624_p4 = scmp.lt.u32.totalorder %s9617_s29, %s10507_s7 }
  0xac   : > { %p9620_p3 = pnand %p9618_p2, %p9853_p7 }
  0xae   : > { %p9621_p1 = pneg %p9620_p3 }
  0xb0   : > { %p9626_p6 = pnand %p9624_p4, %p9621_p1 }
  0xb2   : > { %9629 = shalt.err (!%p9626_p6)
}
  0xb3   : > { %s9630_s24 = scalar_lea.vmem %s379_s13, 4096  ;;  %p9638_p11 = scmp.lt.s32.totalorder %s379_s13, %s379_s13 }
  0xb4   : > { %p9631_p8 = scmp.ne.s32.totalorder %s379_s13, %s9630_s24  ;;  %p9639_p12 = scmp.lt.s32.totalorder %s9630_s24, %s9630_s24 }
  0xb6   : > { %p9633_p9 = pnand %p9631_p8, %p9853_p7  ;;  %p9640_p13 = por %p9639_p12, %p9638_p11 }
  0xb8   : > { %p9634_p10 = pneg %p9633_p9 }
  0xba   : > { %p9641_p0 = pnand %p9640_p13, %p9634_p10 }
  0xbc   : > { %9644 = shalt.err (!%p9641_p0)
}
  0xbd   : > { %8756 = dma.hbm_to_vmem [thread:$0]  (!%p9837_p5), %s10507_s7, 4096, %s379_s13, [#allocation11], %s9744_s26, %s9744_s26, %s9745_s25  }
  0xbe   : > { %s9645_s29 = scalar_lea.hbm %s10509_s9, 2048 }
  0xbf   : > { %p9646_p2 = scmp.ne.s32.totalorder %s10509_s9, %s9645_s29  ;;  %p9652_p4 = scmp.lt.u32.totalorder %s9645_s29, %s10509_s9 }
  0xc1   : > { %p9648_p3 = pnand %p9646_p2, %p9853_p7 }
  0xc3   : > { %p9649_p1 = pneg %p9648_p3 }
  0xc5   : > { %p9654_p6 = pnand %p9652_p4, %p9649_p1 }
  0xc7   : > { %9657 = shalt.err (!%p9654_p6)
}
  0xc8   : > { %s9658_s26 = scalar_lea.vmem %s9997_s15, 2048  ;;  %p9666_p11 = scmp.lt.s32.totalorder %s9997_s15, %s9997_s15 }
  0xc9   : > { %p9659_p8 = scmp.ne.s32.totalorder %s9997_s15, %s9658_s26  ;;  %p9667_p12 = scmp.lt.s32.totalorder %s9658_s26, %s9658_s26 }
  0xcb   : > { %p9661_p9 = pnand %p9659_p8, %p9853_p7  ;;  %p9668_p13 = por %p9667_p12, %p9666_p11 }
  0xcd   : > { %p9662_p10 = pneg %p9661_p9 }
  0xcf   : > { %p9669_p0 = pnand %p9668_p13, %p9662_p10 }
  0xd1   : > { %9672 = shalt.err (!%p9669_p0)
}
  0xd2   : > { %s9748_s25 = smov 64   ;;  %s9749_s13 = smov 4  }
  0xd3   : > { %8762 = dma.hbm_to_vmem [thread:$0]  (!%p9837_p5), %s10509_s9, 2048, %s9997_s15, [#allocation14], %s9748_s25, %s9748_s25, %s9749_s13  }
  0xd4   : > { %s9750_s14 = smov [#allocation16]   ;;  %s9673_s28 = scalar_lea.hbm %s10510_s10, 16 }
  0xd5   : > { %s416_s18 = sshll.u32 %s9750_s14, 4  ;;  %p9674_p2 = scmp.ne.s32.totalorder %s10510_s10, %s9673_s28  ;;  %s417_s18 = int_to_ptr.vmem [resolvable:$true] %s416_s18 }
  0xd6   : > { %p9680_p4 = scmp.lt.u32.totalorder %s9673_s28, %s10510_s10 }
  0xd7   : > { %p9676_p3 = pnand %p9674_p2, %p9853_p7 }
  0xd9   : > { %p9677_p1 = pneg %p9676_p3 }
  0xdb   : > { %p9682_p6 = pnand %p9680_p4, %p9677_p1 }
  0xdd   : > { %9685 = shalt.err (!%p9682_p6)
}
  0xde   : > { %s9686_s15 = scalar_lea.vmem %s417_s18, 16  ;;  %s9693_s25 = scalar_lea.vmem %s417_s18, 32 }
  0xdf   : > { %p9687_p8 = scmp.ne.s32.totalorder %s417_s18, %s9686_s15  ;;  %p9694_p11 = scmp.lt.s32.totalorder %s417_s18, %s417_s18 }
  0xe0   : > { %p9695_p12 = scmp.lt.s32.totalorder %s9693_s25, %s9686_s15 }
  0xe1   : > { %p9689_p9 = pnand %p9687_p8, %p9853_p7 }
  0xe2   : > { %p9696_p13 = por %p9695_p12, %p9694_p11 }
  0xe3   : > { %p9690_p10 = pneg %p9689_p9 }
  0xe5   : > { %p9697_p0 = pnand %p9696_p13, %p9690_p10 }
  0xe7   : > { %9700 = shalt.err (!%p9697_p0)
}
  0xe8   : > { %8765 = dma.hbm_to_vmem [thread:$0]  (!%p9837_p5), %s10510_s10, 16, %s417_s18, [#allocation17]  }
  0xe9   : > { %p10520_p2 = scmp.ne.s32.totalorder %s10517_s22, 0 }
  0xea   : > { %p10521_p3 = scmp.ne.s32.totalorder (!%p10520_p2), %s10516_s21, 0 }
  0xeb   : > { %439 = sbr.rel (%p10520_p2) target bundleno = 2111 (0x83f), region = 64 }
  0xf2   : > { %9706 = dma.done.wait (%p10521_p3), [#allocation3], 65536  }
  0xf3   : > { %9708 = vsyncadd (%p10521_p3), [#allocation3], 4294901760 }
  0xf4   : > { %9710 = dma.done.wait (%p10521_p3), [#allocation5], 32896  }
  0xf5   : > { %9712 = vsyncadd (%p10521_p3), [#allocation5], 4294934400 }
  0xf6   : > { %9714 = dma.done.wait (%p10521_p3), [#allocation8], 8256  }
  0xf7   : > { %9716 = vsyncadd (%p10521_p3), [#allocation8], 4294959040 }
  0xf8   : > { %9718 = dma.done.wait (%p10521_p3), [#allocation11], 4128  }
  0xf9   : > { %9720 = vsyncadd (%p10521_p3), [#allocation11], 4294963168 }
  0xfa   : > { %9722 = dma.done.wait (%p10521_p3), [#allocation14], 2080  }
  0xfb   : > { %9724 = vsyncadd (%p10521_p3), [#allocation14], 4294965216 }
  0xfc   : > { %9726 = dma.done.wait (%p10521_p3), [#allocation17], 16  }
  0xfd   : > { %9728 = vsyncadd (%p10521_p3), [#allocation17], 4294967280  ;;  %v538_v0 = vld [vmem:[#allocation2] sm:$0xff]  ;;  %v539_v2 = vld [vmem:[#allocation2 + $0x8] sm:$0xff]  ;;  %s10522_s21 = sadd.s32 4294967295, %s9731_s17  }
  0xfe   : > { %v542_v1 = vld [vmem:[#allocation2 + $0x20] sm:$0xff]  ;;  %v543_v4 = vld [vmem:[#allocation2 + $0x28] sm:$0xff]  ;;  %s7672_s22 = sshll.u32 %s10522_s21, 1 }
  0xff   : > { %v7686_v3 = vcombine.high %v538_v0, %v542_v1  ;;  %v7685_v5 = vcombine.low %v538_v0, %v542_v1  ;;  %v546_v6 = vld [vmem:[#allocation2 + $0x40] sm:$0xff]  ;;  %v7688_v8 = vcombine.high %v539_v2, %v543_v4  ;;  %v7687_v9 = vcombine.low %v539_v2, %v543_v4  ;;  %v547_v11 = vld [vmem:[#allocation2 + $0x48] sm:$0xff]  ;;  %p517_p5 = scmp.lt.s32.totalorder %s7672_s22, 3 }
 0x100   : > { %v550_v7 = vld [vmem:[#allocation2 + $0x60] sm:$0xff]  ;;  %v551_v12 = vld [vmem:[#allocation2 + $0x68] sm:$0xff] }
 0x101   : > { %v7694_v10 = vcombine.high %v546_v6, %v550_v7  ;;  %v554_v13 = vld [vmem:[#allocation2 + $0x80] sm:$0xff]  ;;  %3692 = vmatprep.subr.bf16.mxu0 %v7686_v3  ;;  %v7696_v14 = vcombine.high %v547_v11, %v551_v12  ;;  %v555_v16 = vld [vmem:[#allocation2 + $0x88] sm:$0xff]  ;;  %3864 = vmatprep.subr.bf16.mxu1 %v7688_v8  ;;  %v7693_v18 = vcombine.low %v546_v6, %v550_v7  ;;  %s10524_s22 = smov (!%p517_p5, %s7672_s22), 3 }
 0x102   : > { %v558_v15 = vld [vmem:[#allocation2 + $0xa0] sm:$0xff]  ;;  %v559_v17 = vld [vmem:[#allocation2 + $0xa8] sm:$0xff]  ;;  %3693 = vmatpush1.bf16.msra.mxu0 %v7685_v5  ;;  %3865 = vmatpush1.bf16.msra.mxu1 %v7687_v9  ;;  %v7695_v19 = vcombine.low %v547_v11, %v551_v12  ;;  %s8568_s27 = sshll.u32 %s10524_s22, 5  ;;  %s7676_s18 = sshll.u32 %s10524_s22, 3 }
 0x103   : > { %3694 = vmatprep.subr.bf16.mxu0 %v7694_v10  ;;  %v7702_v20 = vcombine.high %v554_v13, %v558_v15  ;;  %3866 = vmatprep.subr.bf16.mxu1 %v7696_v14  ;;  %v7704_v21 = vcombine.high %v555_v16, %v559_v17  ;;  %v562_v22 = vld [vmem:[#allocation2 + $0xc0] sm:$0xff]  ;;  %v563_v24 = vld [vmem:[#allocation2 + $0xc8] sm:$0xff]  ;;  %v7701_v26 = vcombine.low %v554_v13, %v558_v15  ;;  %s10092_s14 = scalar_lea.vmem %s10500_s0, %s8568_s27  ;;  %s527_s28 = scalar_lea.vmem %s10511_s11, %s7676_s18 }
 0x104   : > { %v566_v23 = vld [vmem:[#allocation2 + $0xe0] sm:$0xff]  ;;  %v567_v25 = vld [vmem:[#allocation2 + $0xe8] sm:$0xff]  ;;  %v7703_v27 = vcombine.low %v555_v16, %v559_v17 }
 0x105   : > { %v7710_v28 = vcombine.high %v562_v22, %v566_v23  ;;  %v7712_v29 = vcombine.high %v563_v24, %v567_v25  ;;  %v570_v30 = vld [vmem:[#allocation2 + $0x100] sm:$0xff]  ;;  %v571_v32 = vld [vmem:[#allocation2 + $0x108] sm:$0xff]  ;;  %v7709_v34 = vcombine.low %v562_v22, %v566_v23  ;;  %v7711_v35 = vcombine.low %v563_v24, %v567_v25 }
 0x106   : > { %3695 = vmatpush1.bf16.msra.mxu0 %v7693_v18  ;;  %3867 = vmatpush1.bf16.msra.mxu1 %v7695_v19  ;;  %v574_v31 = vld [vmem:[#allocation2 + $0x120] sm:$0xff]  ;;  %v575_v33 = vld [vmem:[#allocation2 + $0x128] sm:$0xff] }
 0x107   : > { %3696 = vmatprep.subr.bf16.mxu0 %v7702_v20  ;;  %3868 = vmatprep.subr.bf16.mxu1 %v7704_v21  ;;  %v7718_v36 = vcombine.high %v570_v30, %v574_v31  ;;  %v7720_v37 = vcombine.high %v571_v32, %v575_v33  ;;  %v578_v38 = vld [vmem:[#allocation2 + $0x140] sm:$0xff]  ;;  %v579_v40 = vld [vmem:[#allocation2 + $0x148] sm:$0xff]  ;;  %v7717_v42 = vcombine.low %v570_v30, %v574_v31 }
 0x108   : > { %v582_v39 = vld [vmem:[#allocation2 + $0x160] sm:$0xff]  ;;  %v583_v41 = vld [vmem:[#allocation2 + $0x168] sm:$0xff]  ;;  %v7719_v43 = vcombine.low %v571_v32, %v575_v33 }
 0x109   : > { %v7726_v44 = vcombine.high %v578_v38, %v582_v39  ;;  %v7728_v45 = vcombine.high %v579_v40, %v583_v41  ;;  %v586_v46 = vld [vmem:[#allocation2 + $0x180] sm:$0xff]  ;;  %v587_v48 = vld [vmem:[#allocation2 + $0x188] sm:$0xff]  ;;  %v7725_v50 = vcombine.low %v578_v38, %v582_v39  ;;  %v7727_v51 = vcombine.low %v579_v40, %v583_v41 }
 0x10a   : > { %3697 = vmatpush1.bf16.msra.mxu0 %v7701_v26  ;;  %3869 = vmatpush1.bf16.msra.mxu1 %v7703_v27  ;;  %v590_v47 = vld [vmem:[#allocation2 + $0x1a0] sm:$0xff]  ;;  %v591_v49 = vld [vmem:[#allocation2 + $0x1a8] sm:$0xff] }
 0x10b   : > { %3698 = vmatprep.subr.bf16.mxu0 %v7710_v28  ;;  %3870 = vmatprep.subr.bf16.mxu1 %v7712_v29  ;;  %v7734_v52 = vcombine.high %v586_v46, %v590_v47  ;;  %v10095_v53 = vld [vmem:[%s10092_s14] sm:$0xff]  ;;  %v7736_v55 = vcombine.high %v587_v48, %v591_v49  ;;  %v595_v59 = vld [vmem:[#allocation2 + $0x1c8] sm:$0xff]  ;;  %v7733_v61 = vcombine.low %v586_v46, %v590_v47 }
 0x10c   : > { %v10098_v54 = vld [vmem:[%s10092_s14 + $0x20] sm:$0xff]  ;;  %v599_v60 = vld [vmem:[#allocation2 + $0x1e8] sm:$0xff]  ;;  %v7735_v62 = vcombine.low %v587_v48, %v591_v49 }
 0x10d   : > { %v594_v56 = vld [vmem:[#allocation2 + $0x1c0] sm:$0xff]  ;;  %v10102_v58 = vcombine.high %v10095_v53, %v10098_v54  ;;  %v7744_v0 = vcombine.high %v595_v59, %v599_v60  ;;  %v603_v3 = vld [vmem:[#allocation2 + $0x208] sm:$0xff]  ;;  %v7743_v6 = vcombine.low %v595_v59, %v599_v60 }
 0x10e   : > { %3699 = vmatpush1.bf16.msra.mxu0 %v7709_v34  ;;  %3871 = vmatpush1.bf16.msra.mxu1 %v7711_v35  ;;  %v598_v57 = vld [vmem:[#allocation2 + $0x1e0] sm:$0xff]  ;;  %v607_v4 = vld [vmem:[#allocation2 + $0x228] sm:$0xff] }
 0x10f   : > { %3700 = vmatprep.subr.bf16.mxu0 %v7718_v36  ;;  %3872 = vmatprep.subr.bf16.mxu1 %v7720_v37  ;;  %v7742_v63 = vcombine.high %v594_v56, %v598_v57  ;;  %v602_v1 = vld [vmem:[#allocation2 + $0x200] sm:$0xff]  ;;  %v7741_v5 = vcombine.low %v594_v56, %v598_v57  ;;  %v7752_v8 = vcombine.high %v603_v3, %v607_v4  ;;  %v611_v11 = vld [vmem:[#allocation2 + $0x248] sm:$0xff] }
 0x110   : > { %3724 = vmatprep.mubr.bf16.mxu0 %v10102_v58  ;;  %v606_v2 = vld [vmem:[#allocation2 + $0x220] sm:$0xff]  ;;  %3896 = vmatprep.mubr.bf16.mxu1 %v10102_v58  ;;  %v615_v12 = vld [vmem:[#allocation2 + $0x268] sm:$0xff]  ;;  %v7751_v14 = vcombine.low %v603_v3, %v607_v4 }
 0x111   : > { %v7750_v7 = vcombine.high %v602_v1, %v606_v2  ;;  %v610_v9 = vld [vmem:[#allocation2 + $0x240] sm:$0xff]  ;;  %v7749_v13 = vcombine.low %v602_v1, %v606_v2  ;;  %v7760_v16 = vcombine.high %v611_v11, %v615_v12  ;;  %v619_v19 = vld [vmem:[#allocation2 + $0x288] sm:$0xff]  ;;  %v7759_v22 = vcombine.low %v611_v11, %v615_v12 }
 0x112   : > { %3701 = vmatpush1.bf16.msra.mxu0 %v7717_v42  ;;  %3873 = vmatpush1.bf16.msra.mxu1 %v7719_v43  ;;  %v614_v10 = vld [vmem:[#allocation2 + $0x260] sm:$0xff]  ;;  %v623_v20 = vld [vmem:[#allocation2 + $0x2a8] sm:$0xff] }
 0x113   : > { %3702 = vmatprep.subr.bf16.mxu0 %v7726_v44  ;;  %3874 = vmatprep.subr.bf16.mxu1 %v7728_v45  ;;  %v7758_v15 = vcombine.high %v610_v9, %v614_v10  ;;  %v618_v17 = vld [vmem:[#allocation2 + $0x280] sm:$0xff]  ;;  %v7757_v21 = vcombine.low %v610_v9, %v614_v10  ;;  %v7768_v24 = vcombine.high %v619_v19, %v623_v20  ;;  %v627_v27 = vld [vmem:[#allocation2 + $0x2c8] sm:$0xff] }
 0x114   : > { %v622_v18 = vld [vmem:[#allocation2 + $0x2a0] sm:$0xff]  ;;  %v631_v28 = vld [vmem:[#allocation2 + $0x2e8] sm:$0xff]  ;;  %v7767_v30 = vcombine.low %v619_v19, %v623_v20 }
 0x115   : > { %v7766_v23 = vcombine.high %v618_v17, %v622_v18  ;;  %v626_v25 = vld [vmem:[#allocation2 + $0x2c0] sm:$0xff]  ;;  %v7765_v29 = vcombine.low %v618_v17, %v622_v18  ;;  %v7776_v32 = vcombine.high %v627_v27, %v631_v28  ;;  %v635_v35 = vld [vmem:[#allocation2 + $0x308] sm:$0xff]  ;;  %v7775_v38 = vcombine.low %v627_v27, %v631_v28 }
 0x116   : > { %3703 = vmatpush1.bf16.msra.mxu0 %v7725_v50  ;;  %3875 = vmatpush1.bf16.msra.mxu1 %v7727_v51  ;;  %v630_v26 = vld [vmem:[#allocation2 + $0x2e0] sm:$0xff]  ;;  %v639_v36 = vld [vmem:[#allocation2 + $0x328] sm:$0xff] }
 0x117   : > { %3704 = vmatprep.subr.bf16.mxu0 %v7734_v52  ;;  %3876 = vmatprep.subr.bf16.mxu1 %v7736_v55  ;;  %v7774_v31 = vcombine.high %v626_v25, %v630_v26  ;;  %v634_v33 = vld [vmem:[#allocation2 + $0x300] sm:$0xff]  ;;  %v7773_v37 = vcombine.low %v626_v25, %v630_v26  ;;  %v7784_v40 = vcombine.high %v635_v35, %v639_v36  ;;  %v643_v43 = vld [vmem:[#allocation2 + $0x348] sm:$0xff] }
 0x118   : > { %v638_v34 = vld [vmem:[#allocation2 + $0x320] sm:$0xff]  ;;  %v647_v44 = vld [vmem:[#allocation2 + $0x368] sm:$0xff]  ;;  %v7783_v46 = vcombine.low %v635_v35, %v639_v36 }
 0x119   : > { %v7782_v39 = vcombine.high %v634_v33, %v638_v34  ;;  %v642_v41 = vld [vmem:[#allocation2 + $0x340] sm:$0xff]  ;;  %v7781_v45 = vcombine.low %v634_v33, %v638_v34  ;;  %v7792_v48 = vcombine.high %v643_v43, %v647_v44  ;;  %v651_v51 = vld [vmem:[#allocation2 + $0x388] sm:$0xff]  ;;  %v7791_v56 = vcombine.low %v643_v43, %v647_v44 }
 0x11a   : > { %3705 = vmatpush1.bf16.msra.mxu0 %v7733_v61  ;;  %3877 = vmatpush1.bf16.msra.mxu1 %v7735_v62  ;;  %v646_v42 = vld [vmem:[#allocation2 + $0x360] sm:$0xff]  ;;  %v655_v52 = vld [vmem:[#allocation2 + $0x3a8] sm:$0xff] }
 0x11b   : > { %3706 = vmatprep.subr.bf16.mxu0 %v7742_v63  ;;  %3878 = vmatprep.subr.bf16.mxu1 %v7744_v0  ;;  %v7790_v47 = vcombine.high %v642_v41, %v646_v42  ;;  %v650_v49 = vld [vmem:[#allocation2 + $0x380] sm:$0xff]  ;;  %v7789_v55 = vcombine.low %v642_v41, %v646_v42  ;;  %v7800_v59 = vcombine.high %v651_v51, %v655_v52  ;;  %v659_v62 = vld [vmem:[#allocation2 + $0x3c8] sm:$0xff] }
 0x11c   : > { %v654_v50 = vld [vmem:[#allocation2 + $0x3a0] sm:$0xff]  ;;  %v663_v63 = vld [vmem:[#allocation2 + $0x3e8] sm:$0xff]  ;;  %v7799_v1 = vcombine.low %v651_v51, %v655_v52 }
 0x11d   : > { %v7798_v57 = vcombine.high %v650_v49, %v654_v50  ;;  %v658_v60 = vld [vmem:[#allocation2 + $0x3c0] sm:$0xff]  ;;  %v7797_v0 = vcombine.low %v650_v49, %v654_v50  ;;  %v7808_v3 = vcombine.high %v659_v62, %v663_v63  ;;  %v7807_v9 = vcombine.low %v659_v62, %v663_v63  ;;  %v10111_v17 = vld [vmem:[%s10092_s14 + $0x8] sm:$0xff] }
 0x11e   : > { %3707 = vmatpush1.bf16.msra.mxu0 %v7741_v5  ;;  %3879 = vmatpush1.bf16.msra.mxu1 %v7743_v6  ;;  %v662_v61 = vld [vmem:[#allocation2 + $0x3e0] sm:$0xff]  ;;  %v667_v6 = vld [vmem:[#allocation2 + $0x408] sm:$0xff] }
 0x11f   : > { %3708 = vmatprep.subr.bf16.mxu0 %v7750_v7  ;;  %3880 = vmatprep.subr.bf16.mxu1 %v7752_v8  ;;  %v7806_v2 = vcombine.high %v658_v60, %v662_v61  ;;  %v666_v4 = vld [vmem:[#allocation2 + $0x400] sm:$0xff]  ;;  %v671_v7 = vld [vmem:[#allocation2 + $0x428] sm:$0xff]  ;;  %v7805_v8 = vcombine.low %v658_v60, %v662_v61 }
 0x120   : > { %v670_v5 = vld [vmem:[#allocation2 + $0x420] sm:$0xff]  ;;  %v7816_v11 = vcombine.high %v667_v6, %v671_v7  ;;  %v10114_v18 = vld [vmem:[%s10092_s14 + $0x28] sm:$0xff]  ;;  %v7815_v20 = vcombine.low %v667_v6, %v671_v7 }
 0x121   : > { %v7814_v10 = vcombine.high %v666_v4, %v670_v5  ;;  %v674_v12 = vld [vmem:[#allocation2 + $0x440] sm:$0xff]  ;;  %v7813_v19 = vcombine.low %v666_v4, %v670_v5  ;;  %v683_v25 = vld [vmem:[#allocation2 + $0x488] sm:$0xff] }
 0x122   : > { %3709 = vmatpush1.bf16.msra.mxu0 %v7749_v13  ;;  %3881 = vmatpush1.bf16.msra.mxu1 %v7751_v14  ;;  %v678_v13 = vld [vmem:[#allocation2 + $0x460] sm:$0xff]  ;;  %v675_v14 = vld [vmem:[#allocation2 + $0x448] sm:$0xff] }
 0x123   : > { %3710 = vmatprep.subr.bf16.mxu0 %v7758_v15  ;;  %3882 = vmatprep.subr.bf16.mxu1 %v7760_v16  ;;  %v10108_v15 = vcombine.low %v10095_v53, %v10098_v54  ;;  %v679_v16 = vld [vmem:[#allocation2 + $0x468] sm:$0xff]  ;;  %v10118_v53 = vcombine.high %v10111_v17, %v10114_v18  ;;  %v7821_v26 = vcombine.low %v674_v12, %v678_v13 }
 0x124   : > { %v687_v54 = vld [vmem:[#allocation2 + $0x4a8] sm:$0xff]  ;;  %v7823_v27 = vcombine.low %v675_v14, %v679_v16 }
 0x125   : > { %v695_v33 = vld [vmem:[#allocation2 + $0x4e8] sm:$0xff]  ;;  %v7831_v35 = vcombine.low %v683_v25, %v687_v54 }
 0x126   : > { %3711 = vmatpush1.bf16.msra.mxu0 %v7757_v21  ;;  %3883 = vmatpush1.bf16.msra.mxu1 %v7759_v22  ;;  %v7822_v21 = vcombine.high %v674_v12, %v678_v13  ;;  %v7824_v22 = vcombine.high %v675_v14, %v679_v16  ;;  %v703_v41 = vld [vmem:[#allocation2 + $0x528] sm:$0xff] }
 0x127   : > { %3712 = vmatprep.subr.bf16.mxu0 %v7766_v23  ;;  %3884 = vmatprep.subr.bf16.mxu1 %v7768_v24  ;;  %v682_v23 = vld [vmem:[#allocation2 + $0x480] sm:$0xff]  ;;  %v711_v49 = vld [vmem:[#allocation2 + $0x568] sm:$0xff] }
 0x128   : > { %v686_v24 = vld [vmem:[#allocation2 + $0x4a0] sm:$0xff]  ;;  %v719_v60 = vld [vmem:[#allocation2 + $0x5a8] sm:$0xff] }
 0x129   : > { %v7830_v28 = vcombine.high %v682_v23, %v686_v24  ;;  %v7829_v34 = vcombine.low %v682_v23, %v686_v24  ;;  %v727_v4 = vld [vmem:[#allocation2 + $0x5e8] sm:$0xff] }
 0x12a   : > { %3713 = vmatpush1.bf16.msra.mxu0 %v7765_v29  ;;  %3885 = vmatpush1.bf16.msra.mxu1 %v7767_v30  ;;  %v690_v29 = vld [vmem:[#allocation2 + $0x4c0] sm:$0xff]  ;;  %v735_v12 = vld [vmem:[#allocation2 + $0x628] sm:$0xff] }
 0x12b   : > { %3714 = vmatprep.subr.bf16.mxu0 %v7774_v31  ;;  %3886 = vmatprep.subr.bf16.mxu1 %v7776_v32  ;;  %v694_v30 = vld [vmem:[#allocation2 + $0x4e0] sm:$0xff]  ;;  %v691_v31 = vld [vmem:[#allocation2 + $0x4c8] sm:$0xff]  ;;  %v7832_v32 = vcombine.high %v683_v25, %v687_v54 }
 0x12c   : > { %v7838_v36 = vcombine.high %v690_v29, %v694_v30  ;;  %v7837_v42 = vcombine.low %v690_v29, %v694_v30  ;;  %v7839_v43 = vcombine.low %v691_v31, %v695_v33  ;;  %v743_v23 = vld [vmem:[#allocation2 + $0x668] sm:$0xff] }
 0x12d   : > { %v751_v30 = vld [vmem:[#allocation2 + $0x6a8] sm:$0xff] }
 0x12e   : > { %3715 = vmatpush1.bf16.msra.mxu0 %v7773_v37  ;;  %3887 = vmatpush1.bf16.msra.mxu1 %v7775_v38  ;;  %v698_v37 = vld [vmem:[#allocation2 + $0x500] sm:$0xff] }
 0x12f   : > { %3716 = vmatprep.subr.bf16.mxu0 %v7782_v39  ;;  %3888 = vmatprep.subr.bf16.mxu1 %v7784_v40  ;;  %v702_v38 = vld [vmem:[#allocation2 + $0x520] sm:$0xff]  ;;  %v699_v39 = vld [vmem:[#allocation2 + $0x508] sm:$0xff]  ;;  %v7840_v40 = vcombine.high %v691_v31, %v695_v33 }
 0x130   : > { %v7846_v44 = vcombine.high %v698_v37, %v702_v38  ;;  %v7845_v50 = vcombine.low %v698_v37, %v702_v38  ;;  %v7847_v51 = vcombine.low %v699_v39, %v703_v41  ;;  %v759_v38 = vld [vmem:[#allocation2 + $0x6e8] sm:$0xff] }
 0x132   : > { %3717 = vmatpush1.bf16.msra.mxu0 %v7781_v45  ;;  %3889 = vmatpush1.bf16.msra.mxu1 %v7783_v46  ;;  %v706_v45 = vld [vmem:[#allocation2 + $0x540] sm:$0xff] }
 0x133   : > { %3718 = vmatprep.subr.bf16.mxu0 %v7790_v47  ;;  %3890 = vmatprep.subr.bf16.mxu1 %v7792_v48  ;;  %v710_v46 = vld [vmem:[#allocation2 + $0x560] sm:$0xff]  ;;  %v707_v47 = vld [vmem:[#allocation2 + $0x548] sm:$0xff]  ;;  %v7848_v48 = vcombine.high %v699_v39, %v703_v41 }
 0x134   : > { %v7854_v52 = vcombine.high %v706_v45, %v710_v46  ;;  %v7853_v61 = vcombine.low %v706_v45, %v710_v46  ;;  %v7855_v62 = vcombine.low %v707_v47, %v711_v49  ;;  %v767_v46 = vld [vmem:[#allocation2 + $0x728] sm:$0xff] }
 0x136   : > { %3719 = vmatpush1.bf16.msra.mxu0 %v7789_v55  ;;  %3891 = vmatpush1.bf16.msra.mxu1 %v7791_v56  ;;  %v714_v55 = vld [vmem:[#allocation2 + $0x580] sm:$0xff] }
 0x137   : > { %3720 = vmatprep.subr.bf16.mxu0 %v7798_v57  ;;  %3892 = vmatprep.subr.bf16.mxu1 %v7800_v59  ;;  %v718_v56 = vld [vmem:[#allocation2 + $0x5a0] sm:$0xff]  ;;  %v715_v57 = vld [vmem:[#allocation2 + $0x588] sm:$0xff]  ;;  %v7856_v59 = vcombine.high %v707_v47, %v711_v49 }
 0x138   : > { %v7862_v63 = vcombine.high %v714_v55, %v718_v56  ;;  %v7861_v5 = vcombine.low %v714_v55, %v718_v56  ;;  %v7863_v6 = vcombine.low %v715_v57, %v719_v60  ;;  %v775_v56 = vld [vmem:[#allocation2 + $0x768] sm:$0xff] }
 0x13a   : > { %3721 = vmatpush1.bf16.msra.mxu0 %v7797_v0  ;;  %3893 = vmatpush1.bf16.msra.mxu1 %v7799_v1  ;;  %v722_v0 = vld [vmem:[#allocation2 + $0x5c0] sm:$0xff] }
 0x13b   : > { %3722 = vmatprep.subr.bf16.mxu0 %v7806_v2  ;;  %3894 = vmatprep.subr.bf16.mxu1 %v7808_v3  ;;  %v726_v1 = vld [vmem:[#allocation2 + $0x5e0] sm:$0xff]  ;;  %v723_v2 = vld [vmem:[#allocation2 + $0x5c8] sm:$0xff]  ;;  %v7864_v3 = vcombine.high %v715_v57, %v719_v60 }
 0x13c   : > { %v7870_v7 = vcombine.high %v722_v0, %v726_v1  ;;  %v7869_v13 = vcombine.low %v722_v0, %v726_v1  ;;  %v7871_v14 = vcombine.low %v723_v2, %v727_v4  ;;  %v783_v1 = vld [vmem:[#allocation2 + $0x7a8] sm:$0xff] }
 0x13e   : > { %3723 = vmatpush1.bf16.msra.mxu0 %v7805_v8  ;;  %3895 = vmatpush1.bf16.msra.mxu1 %v7807_v9  ;;  %v730_v8 = vld [vmem:[#allocation2 + $0x600] sm:$0xff] }
 0x13f   : > { %3735 = vmatprep.subr.bf16.mxu0 %v7814_v10  ;;  %3907 = vmatprep.subr.bf16.mxu1 %v7816_v11  ;;  %v734_v9 = vld [vmem:[#allocation2 + $0x620] sm:$0xff]  ;;  %v731_v10 = vld [vmem:[#allocation2 + $0x608] sm:$0xff]  ;;  %v7872_v11 = vcombine.high %v723_v2, %v727_v4 }
 0x140   : > { %v7878_v16 = vcombine.high %v730_v8, %v734_v9  ;;  %v7877_v24 = vcombine.low %v730_v8, %v734_v9  ;;  %v7879_v25 = vcombine.low %v731_v10, %v735_v12  ;;  %v791_v9 = vld [vmem:[#allocation2 + $0x7e8] sm:$0xff] }
 0x141   : > { %3725 = vmatmul.mubr.bf16.vlgmr.msra.gmra.mrb[0].mxu0 %v10108_v15  ;;  %3897 = vmatmul.mubr.bf16.vlgmr.msra.gmra.mrb[0].mxu1 %v10108_v15 }
 0x142   : > { %3736 = vmatpush1.bf16.msra.mxu0 %v7813_v19  ;;  %3908 = vmatpush1.bf16.msra.mxu1 %v7815_v20  ;;  %v738_v19 = vld [vmem:[#allocation2 + $0x640] sm:$0xff] }
 0x143   : > { %3737 = vmatprep.subr.bf16.mxu0 %v7822_v21  ;;  %3909 = vmatprep.subr.bf16.mxu1 %v7824_v22  ;;  %v742_v20 = vld [vmem:[#allocation2 + $0x660] sm:$0xff]  ;;  %v739_v21 = vld [vmem:[#allocation2 + $0x648] sm:$0xff]  ;;  %v7880_v22 = vcombine.high %v731_v10, %v735_v12 }
 0x144   : > { %3767 = vmatprep.mubr.bf16.mxu0 %v10118_v53  ;;  %3939 = vmatprep.mubr.bf16.mxu1 %v10118_v53  ;;  %v7886_v54 = vcombine.high %v738_v19, %v742_v20  ;;  %v7888_v29 = vcombine.high %v739_v21, %v743_v23  ;;  %v7885_v31 = vcombine.low %v738_v19, %v742_v20  ;;  %v799_v20 = vld [vmem:[#allocation2 + $0x828] sm:$0xff] }
 0x146   : > { %3738 = vmatpush1.bf16.msra.mxu0 %v7821_v26  ;;  %3910 = vmatpush1.bf16.msra.mxu1 %v7823_v27  ;;  %v746_v26 = vld [vmem:[#allocation2 + $0x680] sm:$0xff] }
 0x147   : > { %3739 = vmatprep.subr.bf16.mxu0 %v7830_v28  ;;  %3911 = vmatprep.subr.bf16.mxu1 %v7832_v32  ;;  %v750_v27 = vld [vmem:[#allocation2 + $0x6a0] sm:$0xff]  ;;  %v747_v28 = vld [vmem:[#allocation2 + $0x688] sm:$0xff]  ;;  %v7887_v32 = vcombine.low %v739_v21, %v743_v23 }
 0x148   : > { %v7894_v33 = vcombine.high %v746_v26, %v750_v27  ;;  %v7896_v37 = vcombine.high %v747_v28, %v751_v30  ;;  %v7893_v39 = vcombine.low %v746_v26, %v750_v27  ;;  %v806_v23 = vld [vmem:[#allocation2 + $0x860] sm:$0xff]  ;;  %v807_v26 = vld [vmem:[#allocation2 + $0x868] sm:$0xff]  ;;  %v10125_v27 = vld [vmem:[%s10092_s14 + $0x10] sm:$0xff] }
 0x14a   : > { %3740 = vmatpush1.bf16.msra.mxu0 %v7829_v34  ;;  %3912 = vmatpush1.bf16.msra.mxu1 %v7831_v35  ;;  %v754_v34 = vld [vmem:[#allocation2 + $0x6c0] sm:$0xff] }
 0x14b   : > { %3741 = vmatprep.subr.bf16.mxu0 %v7838_v36  ;;  %3913 = vmatprep.subr.bf16.mxu1 %v7840_v40  ;;  %v758_v35 = vld [vmem:[#allocation2 + $0x6e0] sm:$0xff]  ;;  %v755_v36 = vld [vmem:[#allocation2 + $0x6c8] sm:$0xff]  ;;  %v7895_v40 = vcombine.low %v747_v28, %v751_v30  ;;  %v10132_v30 = vcombine.low %v10111_v17, %v10114_v18 }
 0x14c   : > { %v7902_v41 = vcombine.high %v754_v34, %v758_v35  ;;  %v7904_v45 = vcombine.high %v755_v36, %v759_v38  ;;  %v7901_v47 = vcombine.low %v754_v34, %v758_v35  ;;  %v810_v34 = vld [vmem:[#allocation2 + $0x880] sm:$0xff] }
 0x14d   : > { %v814_v35 = vld [vmem:[#allocation2 + $0x8a0] sm:$0xff] }
 0x14e   : > { %3742 = vmatpush1.bf16.msra.mxu0 %v7837_v42  ;;  %3914 = vmatpush1.bf16.msra.mxu1 %v7839_v43  ;;  %v762_v42 = vld [vmem:[#allocation2 + $0x700] sm:$0xff] }
 0x14f   : > { %3743 = vmatprep.subr.bf16.mxu0 %v7846_v44  ;;  %3915 = vmatprep.subr.bf16.mxu1 %v7848_v48  ;;  %v766_v43 = vld [vmem:[#allocation2 + $0x720] sm:$0xff]  ;;  %v763_v44 = vld [vmem:[#allocation2 + $0x708] sm:$0xff]  ;;  %v7903_v48 = vcombine.low %v755_v36, %v759_v38 }
 0x150   : > { %v7910_v49 = vcombine.high %v762_v42, %v766_v43  ;;  %v7912_v55 = vcombine.high %v763_v44, %v767_v46  ;;  %v7909_v57 = vcombine.low %v762_v42, %v766_v43  ;;  %v811_v36 = vld [vmem:[#allocation2 + $0x888] sm:$0xff]  ;;  %v822_v42 = vld [vmem:[#allocation2 + $0x8e0] sm:$0xff] }
 0x151   : > { %v815_v38 = vld [vmem:[#allocation2 + $0x8a8] sm:$0xff] }
 0x152   : > { %3744 = vmatpush1.bf16.msra.mxu0 %v7845_v50  ;;  %3916 = vmatpush1.bf16.msra.mxu1 %v7847_v51  ;;  %v770_v50 = vld [vmem:[#allocation2 + $0x740] sm:$0xff]  ;;  %v819_v43 = vld [vmem:[#allocation2 + $0x8c8] sm:$0xff] }
 0x153   : > { %3745 = vmatprep.subr.bf16.mxu0 %v7854_v52  ;;  %3917 = vmatprep.subr.bf16.mxu1 %v7856_v59  ;;  %v774_v51 = vld [vmem:[#allocation2 + $0x760] sm:$0xff]  ;;  %v771_v52 = vld [vmem:[#allocation2 + $0x748] sm:$0xff]  ;;  %v7911_v59 = vcombine.low %v763_v44, %v767_v46  ;;  %v7960_v44 = vcombine.high %v811_v36, %v815_v38  ;;  %v7957_v46 = vcombine.low %v810_v34, %v814_v35 }
 0x154   : > { %v7918_v60 = vcombine.high %v770_v50, %v774_v51  ;;  %v7920_v0 = vcombine.high %v771_v52, %v775_v56  ;;  %v7917_v2 = vcombine.low %v770_v50, %v774_v51  ;;  %v830_v50 = vld [vmem:[#allocation2 + $0x920] sm:$0xff]  ;;  %v827_v51 = vld [vmem:[#allocation2 + $0x908] sm:$0xff] }
 0x156   : > { %3746 = vmatpush1.bf16.msra.mxu0 %v7853_v61  ;;  %3918 = vmatpush1.bf16.msra.mxu1 %v7855_v62  ;;  %v778_v61 = vld [vmem:[#allocation2 + $0x780] sm:$0xff] }
 0x157   : > { %3747 = vmatprep.subr.bf16.mxu0 %v7862_v63  ;;  %3919 = vmatprep.subr.bf16.mxu1 %v7864_v3  ;;  %v782_v62 = vld [vmem:[#allocation2 + $0x7a0] sm:$0xff]  ;;  %v779_v63 = vld [vmem:[#allocation2 + $0x788] sm:$0xff]  ;;  %v7919_v3 = vcombine.low %v771_v52, %v775_v56 }
 0x158   : > { %v7926_v4 = vcombine.high %v778_v61, %v782_v62  ;;  %v7928_v8 = vcombine.high %v779_v63, %v783_v1  ;;  %v7925_v10 = vcombine.low %v778_v61, %v782_v62  ;;  %v838_v61 = vld [vmem:[#allocation2 + $0x960] sm:$0xff]  ;;  %v835_v62 = vld [vmem:[#allocation2 + $0x948] sm:$0xff] }
 0x15a   : > { %3748 = vmatpush1.bf16.msra.mxu0 %v7861_v5  ;;  %3920 = vmatpush1.bf16.msra.mxu1 %v7863_v6  ;;  %v786_v5 = vld [vmem:[#allocation2 + $0x7c0] sm:$0xff] }
 0x15b   : > { %3749 = vmatprep.subr.bf16.mxu0 %v7870_v7  ;;  %3921 = vmatprep.subr.bf16.mxu1 %v7872_v11  ;;  %v790_v6 = vld [vmem:[#allocation2 + $0x7e0] sm:$0xff]  ;;  %v787_v7 = vld [vmem:[#allocation2 + $0x7c8] sm:$0xff]  ;;  %v7927_v11 = vcombine.low %v779_v63, %v783_v1 }
 0x15c   : > { %v7934_v12 = vcombine.high %v786_v5, %v790_v6  ;;  %v7936_v19 = vcombine.high %v787_v7, %v791_v9  ;;  %v7933_v21 = vcombine.low %v786_v5, %v790_v6  ;;  %v846_v5 = vld [vmem:[#allocation2 + $0x9a0] sm:$0xff]  ;;  %v843_v6 = vld [vmem:[#allocation2 + $0x988] sm:$0xff] }
 0x15e   : > { %3750 = vmatpush1.bf16.msra.mxu0 %v7869_v13  ;;  %3922 = vmatpush1.bf16.msra.mxu1 %v7871_v14  ;;  %v794_v13 = vld [vmem:[#allocation2 + $0x800] sm:$0xff] }
 0x15f   : > { %3751 = vmatprep.subr.bf16.mxu0 %v7878_v16  ;;  %3923 = vmatprep.subr.bf16.mxu1 %v7880_v22  ;;  %v798_v14 = vld [vmem:[#allocation2 + $0x820] sm:$0xff]  ;;  %v795_v16 = vld [vmem:[#allocation2 + $0x808] sm:$0xff] }
 0x160   : > { %v802_v22 = vld [vmem:[#allocation2 + $0x840] sm:$0xff]  ;;  %v7944_v28 = vcombine.high %v795_v16, %v799_v20 }
 0x161   : > { %v7949_v17 = vcombine.low %v802_v22, %v806_v23 }
 0x162   : > { %3752 = vmatpush1.bf16.msra.mxu0 %v7877_v24  ;;  %3924 = vmatpush1.bf16.msra.mxu1 %v7879_v25  ;;  %v7935_v24 = vcombine.low %v787_v7, %v791_v9  ;;  %v7942_v25 = vcombine.high %v794_v13, %v798_v14 }
 0x163   : > { %3753 = vmatprep.subr.bf16.mxu0 %v7886_v54  ;;  %3925 = vmatprep.subr.bf16.mxu1 %v7888_v29  ;;  %v803_v54 = vld [vmem:[#allocation2 + $0x848] sm:$0xff]  ;;  %v10128_v29 = vld [vmem:[%s10092_s14 + $0x30] sm:$0xff] }
 0x164   : > { %v7951_v18 = vcombine.low %v803_v54, %v807_v26 }
 0x166   : > { %3754 = vmatpush1.bf16.msra.mxu0 %v7885_v31  ;;  %3926 = vmatpush1.bf16.msra.mxu1 %v7887_v32  ;;  %v7941_v31 = vcombine.low %v794_v13, %v798_v14  ;;  %v7943_v32 = vcombine.low %v795_v16, %v799_v20  ;;  %v854_v13 = vld [vmem:[#allocation2 + $0x9e0] sm:$0xff]  ;;  %v851_v14 = vld [vmem:[#allocation2 + $0x9c8] sm:$0xff] }
 0x167   : > { %3755 = vmatprep.subr.bf16.mxu0 %v7894_v33  ;;  %3927 = vmatprep.subr.bf16.mxu1 %v7896_v37  ;;  %v7950_v33 = vcombine.high %v802_v22, %v806_v23  ;;  %v7952_v37 = vcombine.high %v803_v54, %v807_v26  ;;  %v858_v23 = vld [vmem:[#allocation2 + $0xa00] sm:$0xff]  ;;  %v863_v26 = vld [vmem:[#allocation2 + $0xa28] sm:$0xff] }
 0x16a   : > { %3756 = vmatpush1.bf16.msra.mxu0 %v7893_v39  ;;  %3928 = vmatpush1.bf16.msra.mxu1 %v7895_v40  ;;  %v10136_v39 = vcombine.high %v10125_v27, %v10128_v29  ;;  %v7958_v40 = vcombine.high %v810_v34, %v814_v35  ;;  %v870_v34 = vld [vmem:[#allocation2 + $0xa60] sm:$0xff]  ;;  %v867_v35 = vld [vmem:[#allocation2 + $0xa48] sm:$0xff] }
 0x16b   : > { %3757 = vmatprep.subr.bf16.mxu0 %v7902_v41  ;;  %3929 = vmatprep.subr.bf16.mxu1 %v7904_v45  ;;  %v818_v41 = vld [vmem:[#allocation2 + $0x8c0] sm:$0xff]  ;;  %v823_v45 = vld [vmem:[#allocation2 + $0x8e8] sm:$0xff] }
 0x16c   : > { %v7968_v52 = vcombine.high %v819_v43, %v823_v45  ;;  %v7965_v56 = vcombine.low %v818_v41, %v822_v42 }
 0x16e   : > { %3758 = vmatpush1.bf16.msra.mxu0 %v7901_v47  ;;  %3930 = vmatpush1.bf16.msra.mxu1 %v7903_v48  ;;  %v7959_v47 = vcombine.low %v811_v36, %v815_v38  ;;  %v7966_v48 = vcombine.high %v818_v41, %v822_v42  ;;  %v878_v41 = vld [vmem:[#allocation2 + $0xaa0] sm:$0xff]  ;;  %v875_v42 = vld [vmem:[#allocation2 + $0xa88] sm:$0xff] }
 0x16f   : > { %3759 = vmatprep.subr.bf16.mxu0 %v7910_v49  ;;  %3931 = vmatprep.subr.bf16.mxu1 %v7912_v55  ;;  %v826_v49 = vld [vmem:[#allocation2 + $0x900] sm:$0xff]  ;;  %v831_v55 = vld [vmem:[#allocation2 + $0x928] sm:$0xff] }
 0x170   : > { %v7976_v63 = vcombine.high %v827_v51, %v831_v55  ;;  %v7973_v1 = vcombine.low %v826_v49, %v830_v50 }
 0x172   : > { %3760 = vmatpush1.bf16.msra.mxu0 %v7909_v57  ;;  %3932 = vmatpush1.bf16.msra.mxu1 %v7911_v59  ;;  %v7967_v57 = vcombine.low %v819_v43, %v823_v45  ;;  %v7974_v59 = vcombine.high %v826_v49, %v830_v50  ;;  %v886_v49 = vld [vmem:[#allocation2 + $0xae0] sm:$0xff]  ;;  %v883_v50 = vld [vmem:[#allocation2 + $0xac8] sm:$0xff] }
 0x173   : > { %3761 = vmatprep.subr.bf16.mxu0 %v7918_v60  ;;  %3933 = vmatprep.subr.bf16.mxu1 %v7920_v0  ;;  %v834_v60 = vld [vmem:[#allocation2 + $0x940] sm:$0xff]  ;;  %v839_v0 = vld [vmem:[#allocation2 + $0x968] sm:$0xff] }
 0x174   : > { %v7984_v7 = vcombine.high %v835_v62, %v839_v0  ;;  %v7981_v9 = vcombine.low %v834_v60, %v838_v61 }
 0x176   : > { %3762 = vmatpush1.bf16.msra.mxu0 %v7917_v2  ;;  %3934 = vmatpush1.bf16.msra.mxu1 %v7919_v3  ;;  %v7975_v2 = vcombine.low %v827_v51, %v831_v55  ;;  %v7982_v3 = vcombine.high %v834_v60, %v838_v61  ;;  %v894_v60 = vld [vmem:[#allocation2 + $0xb20] sm:$0xff]  ;;  %v891_v61 = vld [vmem:[#allocation2 + $0xb08] sm:$0xff] }
 0x177   : > { %3763 = vmatprep.subr.bf16.mxu0 %v7926_v4  ;;  %3935 = vmatprep.subr.bf16.mxu1 %v7928_v8  ;;  %v842_v4 = vld [vmem:[#allocation2 + $0x980] sm:$0xff]  ;;  %v847_v8 = vld [vmem:[#allocation2 + $0x9a8] sm:$0xff] }
 0x178   : > { %v7992_v16 = vcombine.high %v843_v6, %v847_v8  ;;  %v7989_v20 = vcombine.low %v842_v4, %v846_v5 }
 0x17a   : > { %3764 = vmatpush1.bf16.msra.mxu0 %v7925_v10  ;;  %3936 = vmatpush1.bf16.msra.mxu1 %v7927_v11  ;;  %v7983_v10 = vcombine.low %v835_v62, %v839_v0  ;;  %v7990_v11 = vcombine.high %v842_v4, %v846_v5  ;;  %v902_v4 = vld [vmem:[#allocation2 + $0xb60] sm:$0xff]  ;;  %v899_v5 = vld [vmem:[#allocation2 + $0xb48] sm:$0xff] }
 0x17b   : > { %3765 = vmatprep.subr.bf16.mxu0 %v7934_v12  ;;  %3937 = vmatprep.subr.bf16.mxu1 %v7936_v19  ;;  %v850_v12 = vld [vmem:[#allocation2 + $0x9c0] sm:$0xff]  ;;  %v855_v19 = vld [vmem:[#allocation2 + $0x9e8] sm:$0xff] }
 0x17c   : > { %v7998_v22 = vcombine.high %v850_v12, %v854_v13  ;;  %v8000_v54 = vcombine.high %v851_v14, %v855_v19 }
 0x17e   : > { %3766 = vmatpush1.bf16.msra.mxu0 %v7933_v21  ;;  %3938 = vmatpush1.bf16.msra.mxu1 %v7935_v24  ;;  %v7991_v21 = vcombine.low %v843_v6, %v847_v8  ;;  %v862_v24 = vld [vmem:[#allocation2 + $0xa20] sm:$0xff] }
 0x17f   : > { %3778 = vmatprep.subr.bf16.mxu0 %v7942_v25  ;;  %3950 = vmatprep.subr.bf16.mxu1 %v7944_v28  ;;  %v859_v25 = vld [vmem:[#allocation2 + $0xa08] sm:$0xff]  ;;  %v7997_v28 = vcombine.low %v850_v12, %v854_v13  ;;  %v8005_v38 = vcombine.low %v858_v23, %v862_v24  ;;  %v910_v12 = vld [vmem:[#allocation2 + $0xba0] sm:$0xff] }
 0x180   : > { %v8008_v36 = vcombine.high %v859_v25, %v863_v26  ;;  %v907_v13 = vld [vmem:[#allocation2 + $0xb88] sm:$0xff] }
 0x181   : > { %3768 = vmatmul.mubr.bf16.vlgmr.msra.gmra.mrb[0].mxu0 %v10132_v30  ;;  %3940 = vmatmul.mubr.bf16.vlgmr.msra.gmra.mrb[0].mxu1 %v10132_v30 }
 0x182   : > { %3779 = vmatpush1.bf16.msra.mxu0 %v7941_v31  ;;  %3951 = vmatpush1.bf16.msra.mxu1 %v7943_v32  ;;  %v7999_v31 = vcombine.low %v851_v14, %v855_v19  ;;  %v8006_v32 = vcombine.high %v858_v23, %v862_v24  ;;  %v918_v23 = vld [vmem:[#allocation2 + $0xbe0] sm:$0xff]  ;;  %v915_v24 = vld [vmem:[#allocation2 + $0xbc8] sm:$0xff] }
 0x183   : > { %3780 = vmatprep.subr.bf16.mxu0 %v7950_v33  ;;  %3952 = vmatprep.subr.bf16.mxu1 %v7952_v37  ;;  %v866_v33 = vld [vmem:[#allocation2 + $0xa40] sm:$0xff]  ;;  %v871_v37 = vld [vmem:[#allocation2 + $0xa68] sm:$0xff] }
 0x184   : > { %3810 = vmatprep.mubr.bf16.mxu0 %v10136_v39  ;;  %3982 = vmatprep.mubr.bf16.mxu1 %v10136_v39  ;;  %v8016_v43 = vcombine.high %v867_v35, %v871_v37  ;;  %v8013_v45 = vcombine.low %v866_v33, %v870_v34 }
 0x186   : > { %3781 = vmatpush1.bf16.msra.mxu0 %v7949_v17  ;;  %3953 = vmatpush1.bf16.msra.mxu1 %v7951_v18  ;;  %v8007_v17 = vcombine.low %v859_v25, %v863_v26  ;;  %v8014_v18 = vcombine.high %v866_v33, %v870_v34  ;;  %v926_v33 = vld [vmem:[#allocation2 + $0xc20] sm:$0xff]  ;;  %v923_v34 = vld [vmem:[#allocation2 + $0xc08] sm:$0xff] }
 0x187   : > { %3782 = vmatprep.subr.bf16.mxu0 %v7958_v40  ;;  %3954 = vmatprep.subr.bf16.mxu1 %v7960_v44  ;;  %v874_v40 = vld [vmem:[#allocation2 + $0xa80] sm:$0xff]  ;;  %v879_v44 = vld [vmem:[#allocation2 + $0xaa8] sm:$0xff] }
 0x188   : > { %v8024_v51 = vcombine.high %v875_v42, %v879_v44  ;;  %v8021_v55 = vcombine.low %v874_v40, %v878_v41 }
 0x18a   : > { %3783 = vmatpush1.bf16.msra.mxu0 %v7957_v46  ;;  %3955 = vmatpush1.bf16.msra.mxu1 %v7959_v47  ;;  %v8015_v46 = vcombine.low %v867_v35, %v871_v37  ;;  %v8022_v47 = vcombine.high %v874_v40, %v878_v41  ;;  %v931_v41 = vld [vmem:[#allocation2 + $0xc48] sm:$0xff] }
 0x18b   : > { %3784 = vmatprep.subr.bf16.mxu0 %v7966_v48  ;;  %3956 = vmatprep.subr.bf16.mxu1 %v7968_v52  ;;  %v882_v48 = vld [vmem:[#allocation2 + $0xac0] sm:$0xff]  ;;  %v887_v52 = vld [vmem:[#allocation2 + $0xae8] sm:$0xff] }
 0x18c   : > { %v8032_v62 = vcombine.high %v883_v50, %v887_v52  ;;  %v8029_v0 = vcombine.low %v882_v48, %v886_v49 }
 0x18e   : > { %3785 = vmatpush1.bf16.msra.mxu0 %v7965_v56  ;;  %3957 = vmatpush1.bf16.msra.mxu1 %v7967_v57  ;;  %v8023_v56 = vcombine.low %v875_v42, %v879_v44  ;;  %v8030_v57 = vcombine.high %v882_v48, %v886_v49  ;;  %v935_v42 = vld [vmem:[#allocation2 + $0xc68] sm:$0xff] }
 0x18f   : > { %3786 = vmatprep.subr.bf16.mxu0 %v7974_v59  ;;  %3958 = vmatprep.subr.bf16.mxu1 %v7976_v63  ;;  %v890_v59 = vld [vmem:[#allocation2 + $0xb00] sm:$0xff]  ;;  %v895_v63 = vld [vmem:[#allocation2 + $0xb28] sm:$0xff] }
 0x190   : > { %v8040_v6 = vcombine.high %v891_v61, %v895_v63  ;;  %v8037_v8 = vcombine.low %v890_v59, %v894_v60 }
 0x192   : > { %3787 = vmatpush1.bf16.msra.mxu0 %v7973_v1  ;;  %3959 = vmatpush1.bf16.msra.mxu1 %v7975_v2  ;;  %v8031_v1 = vcombine.low %v883_v50, %v887_v52  ;;  %v8038_v2 = vcombine.high %v890_v59, %v894_v60  ;;  %v938_v50 = vld [vmem:[#allocation2 + $0xc80] sm:$0xff]  ;;  %v939_v52 = vld [vmem:[#allocation2 + $0xc88] sm:$0xff] }
 0x193   : > { %3788 = vmatprep.subr.bf16.mxu0 %v7982_v3  ;;  %3960 = vmatprep.subr.bf16.mxu1 %v7984_v7  ;;  %v898_v3 = vld [vmem:[#allocation2 + $0xb40] sm:$0xff]  ;;  %v903_v7 = vld [vmem:[#allocation2 + $0xb68] sm:$0xff] }
 0x194   : > { %v8048_v14 = vcombine.high %v899_v5, %v903_v7  ;;  %v8045_v19 = vcombine.low %v898_v3, %v902_v4  ;;  %v946_v60 = vld [vmem:[#allocation2 + $0xcc0] sm:$0xff] }
 0x196   : > { %3789 = vmatpush1.bf16.msra.mxu0 %v7981_v9  ;;  %3961 = vmatpush1.bf16.msra.mxu1 %v7983_v10  ;;  %v8039_v9 = vcombine.low %v891_v61, %v895_v63  ;;  %v8046_v10 = vcombine.high %v898_v3, %v902_v4  ;;  %v950_v61 = vld [vmem:[#allocation2 + $0xce0] sm:$0xff] }
 0x197   : > { %3790 = vmatprep.subr.bf16.mxu0 %v7990_v11  ;;  %3962 = vmatprep.subr.bf16.mxu1 %v7992_v16  ;;  %v906_v11 = vld [vmem:[#allocation2 + $0xb80] sm:$0xff]  ;;  %v911_v16 = vld [vmem:[#allocation2 + $0xba8] sm:$0xff]  ;;  %v8094_v3 = vcombine.high %v946_v60, %v950_v61 }
 0x198   : > { %v8056_v25 = vcombine.high %v907_v13, %v911_v16  ;;  %v8053_v26 = vcombine.low %v906_v11, %v910_v12  ;;  %v954_v4 = vld [vmem:[#allocation2 + $0xd00] sm:$0xff] }
 0x19a   : > { %3791 = vmatpush1.bf16.msra.mxu0 %v7989_v20  ;;  %3963 = vmatpush1.bf16.msra.mxu1 %v7991_v21  ;;  %v8047_v20 = vcombine.low %v899_v5, %v903_v7  ;;  %v8054_v21 = vcombine.high %v906_v11, %v910_v12  ;;  %v958_v5 = vld [vmem:[#allocation2 + $0xd20] sm:$0xff] }
 0x19b   : > { %3792 = vmatprep.subr.bf16.mxu0 %v7998_v22  ;;  %3964 = vmatprep.subr.bf16.mxu1 %v8000_v54  ;;  %v914_v22 = vld [vmem:[#allocation2 + $0xbc0] sm:$0xff]  ;;  %v919_v54 = vld [vmem:[#allocation2 + $0xbe8] sm:$0xff]  ;;  %v8102_v11 = vcombine.high %v954_v4, %v958_v5 }
 0x19c   : > { %v8064_v35 = vcombine.high %v915_v24, %v919_v54  ;;  %v8061_v37 = vcombine.low %v914_v22, %v918_v23  ;;  %v962_v12 = vld [vmem:[#allocation2 + $0xd40] sm:$0xff] }
 0x19e   : > { %3793 = vmatpush1.bf16.msra.mxu0 %v7997_v28  ;;  %3965 = vmatpush1.bf16.msra.mxu1 %v7999_v31  ;;  %v8055_v28 = vcombine.low %v907_v13, %v911_v16  ;;  %v8062_v31 = vcombine.high %v914_v22, %v918_v23  ;;  %v966_v13 = vld [vmem:[#allocation2 + $0xd60] sm:$0xff] }
 0x19f   : > { %3794 = vmatprep.subr.bf16.mxu0 %v8006_v32  ;;  %3966 = vmatprep.subr.bf16.mxu1 %v8008_v36  ;;  %v922_v32 = vld [vmem:[#allocation2 + $0xc00] sm:$0xff]  ;;  %v927_v36 = vld [vmem:[#allocation2 + $0xc28] sm:$0xff]  ;;  %v8110_v22 = vcombine.high %v962_v12, %v966_v13 }
 0x1a0   : > { %v8070_v40 = vcombine.high %v922_v32, %v926_v33  ;;  %v8072_v44 = vcombine.high %v923_v34, %v927_v36  ;;  %v8071_v48 = vcombine.low %v923_v34, %v927_v36  ;;  %v970_v23 = vld [vmem:[#allocation2 + $0xd80] sm:$0xff] }
 0x1a1   : > { %v982_v34 = vld [vmem:[#allocation2 + $0xde0] sm:$0xff] }
 0x1a2   : > { %3795 = vmatpush1.bf16.msra.mxu0 %v8005_v38  ;;  %3967 = vmatpush1.bf16.msra.mxu1 %v8007_v17  ;;  %v930_v38 = vld [vmem:[#allocation2 + $0xc40] sm:$0xff] }
 0x1a3   : > { %3796 = vmatprep.subr.bf16.mxu0 %v8014_v18  ;;  %3968 = vmatprep.subr.bf16.mxu1 %v8016_v43  ;;  %v934_v17 = vld [vmem:[#allocation2 + $0xc60] sm:$0xff]  ;;  %v8063_v18 = vcombine.low %v915_v24, %v919_v54  ;;  %v10143_v43 = vld [vmem:[%s10092_s14 + $0x18] sm:$0xff] }
 0x1a4   : > { %v8078_v49 = vcombine.high %v930_v38, %v934_v17  ;;  %v974_v24 = vld [vmem:[#allocation2 + $0xda0] sm:$0xff] }
 0x1a6   : > { %3797 = vmatpush1.bf16.msra.mxu0 %v8013_v45  ;;  %3969 = vmatpush1.bf16.msra.mxu1 %v8015_v46  ;;  %v10146_v45 = vld [vmem:[%s10092_s14 + $0x38] sm:$0xff]  ;;  %v10150_v46 = vcombine.low %v10125_v27, %v10128_v29  ;;  %v8077_v27 = vcombine.low %v930_v38, %v934_v17  ;;  %v8079_v29 = vcombine.low %v931_v41, %v935_v42 }
 0x1a7   : > { %3798 = vmatprep.subr.bf16.mxu0 %v8022_v47  ;;  %3970 = vmatprep.subr.bf16.mxu1 %v8024_v51  ;;  %v8069_v47 = vcombine.low %v922_v32, %v926_v33  ;;  %v942_v51 = vld [vmem:[#allocation2 + $0xca0] sm:$0xff]  ;;  %v8118_v32 = vcombine.high %v970_v23, %v974_v24  ;;  %v8117_v38 = vcombine.low %v970_v23, %v974_v24 }
 0x1a8   : > { %v8086_v59 = vcombine.high %v938_v50, %v942_v51  ;;  %v978_v33 = vld [vmem:[#allocation2 + $0xdc0] sm:$0xff] }
 0x1a9   : > { %v1026_v24 = vld [vmem:[#allocation2 + $0xf40] sm:$0xff] }
 0x1aa   : > { %3799 = vmatpush1.bf16.msra.mxu0 %v8021_v55  ;;  %3971 = vmatpush1.bf16.msra.mxu1 %v8023_v56  ;;  %v8080_v55 = vcombine.high %v931_v41, %v935_v42  ;;  %v943_v56 = vld [vmem:[#allocation2 + $0xca8] sm:$0xff]  ;;  %v990_v41 = vld [vmem:[#allocation2 + $0xe20] sm:$0xff] }
 0x1ab   : > { %3800 = vmatprep.subr.bf16.mxu0 %v8030_v57  ;;  %3972 = vmatprep.subr.bf16.mxu1 %v8032_v62  ;;  %v10154_v57 = vcombine.high %v10143_v43, %v10146_v45  ;;  %v947_v62 = vld [vmem:[#allocation2 + $0xcc8] sm:$0xff]  ;;  %v8088_v63 = vcombine.high %v939_v52, %v943_v56 }
 0x1ac   : > { %v987_v42 = vld [vmem:[#allocation2 + $0xe08] sm:$0xff] }
 0x1ae   : > { %3801 = vmatpush1.bf16.msra.mxu0 %v8029_v0  ;;  %3973 = vmatpush1.bf16.msra.mxu1 %v8031_v1  ;;  %v951_v0 = vld [vmem:[#allocation2 + $0xce8] sm:$0xff]  ;;  %v8085_v1 = vcombine.low %v938_v50, %v942_v51  ;;  %v994_v51 = vld [vmem:[#allocation2 + $0xe40] sm:$0xff] }
 0x1af   : > { %3802 = vmatprep.subr.bf16.mxu0 %v8038_v2  ;;  %3974 = vmatprep.subr.bf16.mxu1 %v8040_v6  ;;  %v8087_v2 = vcombine.low %v939_v52, %v943_v56  ;;  %v955_v6 = vld [vmem:[#allocation2 + $0xd08] sm:$0xff]  ;;  %v8096_v7 = vcombine.high %v947_v62, %v951_v0  ;;  %v998_v52 = vld [vmem:[#allocation2 + $0xe60] sm:$0xff] }
 0x1b2   : > { %3803 = vmatpush1.bf16.msra.mxu0 %v8037_v8  ;;  %3975 = vmatpush1.bf16.msra.mxu1 %v8039_v9  ;;  %v959_v8 = vld [vmem:[#allocation2 + $0xd28] sm:$0xff]  ;;  %v8093_v9 = vcombine.low %v946_v60, %v950_v61  ;;  %v8142_v60 = vcombine.high %v994_v51, %v998_v52  ;;  %v1002_v61 = vld [vmem:[#allocation2 + $0xe80] sm:$0xff] }
 0x1b3   : > { %3804 = vmatprep.subr.bf16.mxu0 %v8046_v10  ;;  %3976 = vmatprep.subr.bf16.mxu1 %v8048_v14  ;;  %v8095_v10 = vcombine.low %v947_v62, %v951_v0  ;;  %v963_v14 = vld [vmem:[#allocation2 + $0xd48] sm:$0xff]  ;;  %v8104_v16 = vcombine.high %v955_v6, %v959_v8  ;;  %v1006_v62 = vld [vmem:[#allocation2 + $0xea0] sm:$0xff] }
 0x1b6   : > { %3805 = vmatpush1.bf16.msra.mxu0 %v8045_v19  ;;  %3977 = vmatpush1.bf16.msra.mxu1 %v8047_v20  ;;  %v967_v19 = vld [vmem:[#allocation2 + $0xd68] sm:$0xff]  ;;  %v8101_v20 = vcombine.low %v954_v4, %v958_v5  ;;  %v8150_v4 = vcombine.high %v1002_v61, %v1006_v62  ;;  %v1010_v5 = vld [vmem:[#allocation2 + $0xec0] sm:$0xff] }
 0x1b7   : > { %3806 = vmatprep.subr.bf16.mxu0 %v8054_v21  ;;  %3978 = vmatprep.subr.bf16.mxu1 %v8056_v25  ;;  %v8103_v21 = vcombine.low %v955_v6, %v959_v8  ;;  %v971_v25 = vld [vmem:[#allocation2 + $0xd88] sm:$0xff]  ;;  %v8112_v54 = vcombine.high %v963_v14, %v967_v19  ;;  %v1014_v6 = vld [vmem:[#allocation2 + $0xee0] sm:$0xff] }
 0x1ba   : > { %3807 = vmatpush1.bf16.msra.mxu0 %v8053_v26  ;;  %3979 = vmatpush1.bf16.msra.mxu1 %v8055_v28  ;;  %v975_v26 = vld [vmem:[#allocation2 + $0xda8] sm:$0xff]  ;;  %v8109_v28 = vcombine.low %v962_v12, %v966_v13  ;;  %v8158_v12 = vcombine.high %v1010_v5, %v1014_v6  ;;  %v1018_v13 = vld [vmem:[#allocation2 + $0xf00] sm:$0xff] }
 0x1bb   : > { %3808 = vmatprep.subr.bf16.mxu0 %v8062_v31  ;;  %3980 = vmatprep.subr.bf16.mxu1 %v8064_v35  ;;  %v8111_v31 = vcombine.low %v963_v14, %v967_v19  ;;  %v979_v35 = vld [vmem:[#allocation2 + $0xdc8] sm:$0xff]  ;;  %v8120_v36 = vcombine.high %v971_v25, %v975_v26  ;;  %v8119_v17 = vcombine.low %v971_v25, %v975_v26  ;;  %v1022_v14 = vld [vmem:[#allocation2 + $0xf20] sm:$0xff] }
 0x1bc   : > { %v8166_v23 = vcombine.high %v1018_v13, %v1022_v14  ;;  %v1030_v25 = vld [vmem:[#allocation2 + $0xf60] sm:$0xff] }
 0x1be   : > { %3809 = vmatpush1.bf16.msra.mxu0 %v8061_v37  ;;  %3981 = vmatpush1.bf16.msra.mxu1 %v8063_v18  ;;  %v983_v37 = vld [vmem:[#allocation2 + $0xde8] sm:$0xff]  ;;  %v8126_v18 = vcombine.high %v978_v33, %v982_v34 }
 0x1bf   : > { %3821 = vmatprep.subr.bf16.mxu0 %v8070_v40  ;;  %3993 = vmatprep.subr.bf16.mxu1 %v8072_v44  ;;  %v986_v40 = vld [vmem:[#allocation2 + $0xe00] sm:$0xff]  ;;  %v8128_v44 = vcombine.high %v979_v35, %v983_v37 }
 0x1c0   : > { %v8134_v50 = vcombine.high %v986_v40, %v990_v41 }
 0x1c1   : > { %3811 = vmatmul.mubr.bf16.vlgmr.msra.gmra.mrb[0].mxu0 %v10150_v46  ;;  %3983 = vmatmul.mubr.bf16.vlgmr.msra.gmra.mrb[0].mxu1 %v10150_v46 }
 0x1c2   : > { %3822 = vmatpush1.bf16.msra.mxu0 %v8069_v47  ;;  %3994 = vmatpush1.bf16.msra.mxu1 %v8071_v48  ;;  %v991_v47 = vld [vmem:[#allocation2 + $0xe28] sm:$0xff]  ;;  %v8125_v48 = vcombine.low %v978_v33, %v982_v34  ;;  %v8174_v33 = vcombine.high %v1026_v24, %v1030_v25  ;;  %v1034_v34 = vld [vmem:[#allocation2 + $0xf80] sm:$0xff] }
 0x1c3   : > { %3823 = vmatprep.subr.bf16.mxu0 %v8078_v49  ;;  %3995 = vmatprep.subr.bf16.mxu1 %v8080_v55  ;;  %v8127_v49 = vcombine.low %v979_v35, %v983_v37  ;;  %v995_v55 = vld [vmem:[#allocation2 + $0xe48] sm:$0xff]  ;;  %v8136_v56 = vcombine.high %v987_v42, %v991_v47  ;;  %v1038_v35 = vld [vmem:[#allocation2 + $0xfa0] sm:$0xff] }
 0x1c4   : > { %3853 = vmatprep.mubr.bf16.mxu0 %v10154_v57  ;;  %4025 = vmatprep.mubr.bf16.mxu1 %v10154_v57 }
 0x1c6   : > { %3824 = vmatpush1.bf16.msra.mxu0 %v8077_v27  ;;  %3996 = vmatpush1.bf16.msra.mxu1 %v8079_v29  ;;  %v999_v27 = vld [vmem:[#allocation2 + $0xe68] sm:$0xff]  ;;  %v8133_v29 = vcombine.low %v986_v40, %v990_v41  ;;  %v8182_v40 = vcombine.high %v1034_v34, %v1038_v35  ;;  %v1042_v41 = vld [vmem:[#allocation2 + $0xfc0] sm:$0xff] }
 0x1c7   : > { %3825 = vmatprep.subr.bf16.mxu0 %v8086_v59  ;;  %3997 = vmatprep.subr.bf16.mxu1 %v8088_v63  ;;  %v8135_v59 = vcombine.low %v987_v42, %v991_v47  ;;  %v1003_v63 = vld [vmem:[#allocation2 + $0xe88] sm:$0xff]  ;;  %v8144_v0 = vcombine.high %v995_v55, %v999_v27  ;;  %v1046_v42 = vld [vmem:[#allocation2 + $0xfe0] sm:$0xff] }
 0x1ca   : > { %3826 = vmatpush1.bf16.msra.mxu0 %v8085_v1  ;;  %3998 = vmatpush1.bf16.msra.mxu1 %v8087_v2  ;;  %v1007_v1 = vld [vmem:[#allocation2 + $0xea8] sm:$0xff]  ;;  %v8141_v2 = vcombine.low %v994_v51, %v998_v52  ;;  %v8190_v51 = vcombine.high %v1042_v41, %v1046_v42  ;;  %v540_v52 = vld [vmem:[#allocation2 + $0x10] sm:$0xff] }
 0x1cb   : > { %3827 = vmatprep.subr.bf16.mxu0 %v8094_v3  ;;  %3999 = vmatprep.subr.bf16.mxu1 %v8096_v7  ;;  %v8143_v3 = vcombine.low %v995_v55, %v999_v27  ;;  %v1011_v7 = vld [vmem:[#allocation2 + $0xec8] sm:$0xff]  ;;  %v8152_v8 = vcombine.high %v1003_v63, %v1007_v1  ;;  %v544_v55 = vld [vmem:[#allocation2 + $0x30] sm:$0xff] }
 0x1ce   : > { %3828 = vmatpush1.bf16.msra.mxu0 %v8093_v9  ;;  %4000 = vmatpush1.bf16.msra.mxu1 %v8095_v10  ;;  %v1015_v9 = vld [vmem:[#allocation2 + $0xee8] sm:$0xff]  ;;  %v8149_v10 = vcombine.low %v1002_v61, %v1006_v62  ;;  %v7690_v61 = vcombine.high %v540_v52, %v544_v55  ;;  %v548_v62 = vld [vmem:[#allocation2 + $0x50] sm:$0xff] }
 0x1cf   : > { %3829 = vmatprep.subr.bf16.mxu0 %v8102_v11  ;;  %4001 = vmatprep.subr.bf16.mxu1 %v8104_v16  ;;  %v8151_v11 = vcombine.low %v1003_v63, %v1007_v1  ;;  %v1019_v16 = vld [vmem:[#allocation2 + $0xf08] sm:$0xff]  ;;  %v8160_v19 = vcombine.high %v1011_v7, %v1015_v9  ;;  %v552_v63 = vld [vmem:[#allocation2 + $0x70] sm:$0xff] }
 0x1d2   : > { %3830 = vmatpush1.bf16.msra.mxu0 %v8101_v20  ;;  %4002 = vmatpush1.bf16.msra.mxu1 %v8103_v21  ;;  %v1023_v20 = vld [vmem:[#allocation2 + $0xf28] sm:$0xff]  ;;  %v8157_v21 = vcombine.low %v1010_v5, %v1014_v6  ;;  %v7698_v6 = vcombine.high %v548_v62, %v552_v63 }
 0x1d3   : > { %3831 = vmatprep.subr.bf16.mxu0 %v8110_v22  ;;  %4003 = vmatprep.subr.bf16.mxu1 %v8112_v54  ;;  %v8159_v22 = vcombine.low %v1011_v7, %v1015_v9  ;;  %v1027_v54 = vld [vmem:[#allocation2 + $0xf48] sm:$0xff]  ;;  %v8168_v26 = vcombine.high %v1019_v16, %v1023_v20  ;;  %v556_v7 = vld [vmem:[#allocation2 + $0x90] sm:$0xff]  ;;  %v557_v9 = vld [vmem:[#allocation2 + $0x98] sm:$0xff] }
 0x1d6   : > { %3832 = vmatpush1.bf16.msra.mxu0 %v8109_v28  ;;  %4004 = vmatpush1.bf16.msra.mxu1 %v8111_v31  ;;  %v1031_v28 = vld [vmem:[#allocation2 + $0xf68] sm:$0xff]  ;;  %v8165_v31 = vcombine.low %v1018_v13, %v1022_v14  ;;  %v564_v14 = vld [vmem:[#allocation2 + $0xd0] sm:$0xff] }
 0x1d7   : > { %3833 = vmatprep.subr.bf16.mxu0 %v8118_v32  ;;  %4005 = vmatprep.subr.bf16.mxu1 %v8120_v36  ;;  %v8167_v32 = vcombine.low %v1019_v16, %v1023_v20  ;;  %v1035_v36 = vld [vmem:[#allocation2 + $0xf88] sm:$0xff]  ;;  %v8176_v37 = vcombine.high %v1027_v54, %v1031_v28  ;;  %v568_v16 = vld [vmem:[#allocation2 + $0xf0] sm:$0xff]  ;;  %v569_v20 = vld [vmem:[#allocation2 + $0xf8] sm:$0xff] }
 0x1da   : > { %3834 = vmatpush1.bf16.msra.mxu0 %v8117_v38  ;;  %4006 = vmatpush1.bf16.msra.mxu1 %v8119_v17  ;;  %v1039_v38 = vld [vmem:[#allocation2 + $0xfa8] sm:$0xff]  ;;  %v8173_v17 = vcombine.low %v1026_v24, %v1030_v25  ;;  %v572_v25 = vld [vmem:[#allocation2 + $0x110] sm:$0xff] }
 0x1db   : > { %3835 = vmatprep.subr.bf16.mxu0 %v8126_v18  ;;  %4007 = vmatprep.subr.bf16.mxu1 %v8128_v44  ;;  %v8175_v18 = vcombine.low %v1027_v54, %v1031_v28  ;;  %v1043_v44 = vld [vmem:[#allocation2 + $0xfc8] sm:$0xff]  ;;  %v8184_v47 = vcombine.high %v1035_v36, %v1039_v38  ;;  %v576_v54 = vld [vmem:[#allocation2 + $0x130] sm:$0xff]  ;;  %v577_v28 = vld [vmem:[#allocation2 + $0x138] sm:$0xff] }
 0x1de   : > { %3836 = vmatpush1.bf16.msra.mxu0 %v8125_v48  ;;  %4008 = vmatpush1.bf16.msra.mxu1 %v8127_v49  ;;  %v1047_v48 = vld [vmem:[#allocation2 + $0xfe8] sm:$0xff]  ;;  %v8181_v49 = vcombine.low %v1034_v34, %v1038_v35  ;;  %v580_v34 = vld [vmem:[#allocation2 + $0x150] sm:$0xff] }
 0x1df   : > { %3837 = vmatprep.subr.bf16.mxu0 %v8134_v50  ;;  %4009 = vmatprep.subr.bf16.mxu1 %v8136_v56  ;;  %v8183_v50 = vcombine.low %v1035_v36, %v1039_v38  ;;  %v541_v56 = vld [vmem:[#allocation2 + $0x18] sm:$0xff]  ;;  %v8192_v27 = vcombine.high %v1043_v44, %v1047_v48  ;;  %v584_v35 = vld [vmem:[#allocation2 + $0x170] sm:$0xff]  ;;  %v7721_v38 = vcombine.low %v572_v25, %v576_v54 }
 0x1e0   : > { %v581_v36 = vld [vmem:[#allocation2 + $0x158] sm:$0xff] }
 0x1e2   : > { %3838 = vmatpush1.bf16.msra.mxu0 %v8133_v29  ;;  %4010 = vmatpush1.bf16.msra.mxu1 %v8135_v59  ;;  %v545_v29 = vld [vmem:[#allocation2 + $0x38] sm:$0xff]  ;;  %v8189_v59 = vcombine.low %v1042_v41, %v1046_v42  ;;  %v588_v41 = vld [vmem:[#allocation2 + $0x190] sm:$0xff] }
 0x1e3   : > { %3839 = vmatprep.subr.bf16.mxu0 %v8142_v60  ;;  %4011 = vmatprep.subr.bf16.mxu1 %v8144_v0  ;;  %v8191_v60 = vcombine.low %v1043_v44, %v1047_v48  ;;  %v549_v0 = vld [vmem:[#allocation2 + $0x58] sm:$0xff]  ;;  %v7692_v1 = vcombine.high %v541_v56, %v545_v29  ;;  %v7691_v5 = vcombine.low %v541_v56, %v545_v29  ;;  %v592_v42 = vld [vmem:[#allocation2 + $0x1b0] sm:$0xff] }
 0x1e4   : > { %v589_v44 = vld [vmem:[#allocation2 + $0x198] sm:$0xff]  ;;  %v7729_v48 = vcombine.low %v580_v34, %v584_v35  ;;  %v7737_v29 = vcombine.low %v588_v41, %v592_v42 }
 0x1e5   : > { %v597_v56 = vld [vmem:[#allocation2 + $0x1d8] sm:$0xff] }
 0x1e6   : > { %3840 = vmatpush1.bf16.msra.mxu0 %v8141_v2  ;;  %4012 = vmatpush1.bf16.msra.mxu1 %v8143_v3  ;;  %v553_v2 = vld [vmem:[#allocation2 + $0x78] sm:$0xff]  ;;  %v10162_v3 = vcombine.low %v10143_v43, %v10146_v45 }
 0x1e7   : > { %3841 = vmatprep.subr.bf16.mxu0 %v8150_v4  ;;  %4013 = vmatprep.subr.bf16.mxu1 %v8152_v8  ;;  %v7689_v4 = vcombine.low %v540_v52, %v544_v55  ;;  %v560_v8 = vld [vmem:[#allocation2 + $0xb0] sm:$0xff]  ;;  %v7699_v43 = vcombine.low %v549_v0, %v553_v2 }
 0x1e8   : > { %v7706_v45 = vcombine.high %v556_v7, %v560_v8  ;;  %v596_v52 = vld [vmem:[#allocation2 + $0x1d0] sm:$0xff] }
 0x1e9   : > { %v600_v55 = vld [vmem:[#allocation2 + $0x1f0] sm:$0xff] }
 0x1ea   : > { %3842 = vmatpush1.bf16.msra.mxu0 %v8149_v10  ;;  %4014 = vmatpush1.bf16.msra.mxu1 %v8151_v11  ;;  %v7700_v10 = vcombine.high %v549_v0, %v553_v2  ;;  %v561_v11 = vld [vmem:[#allocation2 + $0xb8] sm:$0xff]  ;;  %v7745_v2 = vcombine.low %v596_v52, %v600_v55 }
 0x1eb   : > { %3843 = vmatprep.subr.bf16.mxu0 %v8158_v12  ;;  %4015 = vmatprep.subr.bf16.mxu1 %v8160_v19  ;;  %v7697_v12 = vcombine.low %v548_v62, %v552_v63  ;;  %v7708_v13 = vcombine.high %v557_v9, %v561_v11  ;;  %v565_v19 = vld [vmem:[#allocation2 + $0xd8] sm:$0xff]  ;;  %v604_v62 = vld [vmem:[#allocation2 + $0x210] sm:$0xff] }
 0x1ec   : > { %v7716_v24 = vcombine.high %v565_v19, %v569_v20  ;;  %v608_v63 = vld [vmem:[#allocation2 + $0x230] sm:$0xff]  ;;  %v605_v0 = vld [vmem:[#allocation2 + $0x218] sm:$0xff] }
 0x1ee   : > { %3844 = vmatpush1.bf16.msra.mxu0 %v8157_v21  ;;  %4016 = vmatpush1.bf16.msra.mxu1 %v8159_v22  ;;  %v7705_v21 = vcombine.low %v556_v7, %v560_v8  ;;  %v7707_v22 = vcombine.low %v557_v9, %v561_v11  ;;  %v612_v7 = vld [vmem:[#allocation2 + $0x250] sm:$0xff]  ;;  %v613_v9 = vld [vmem:[#allocation2 + $0x258] sm:$0xff]  ;;  %v7753_v11 = vcombine.low %v604_v62, %v608_v63 }
 0x1ef   : > { %3845 = vmatprep.subr.bf16.mxu0 %v8166_v23  ;;  %4017 = vmatprep.subr.bf16.mxu1 %v8168_v26  ;;  %v7714_v23 = vcombine.high %v564_v14, %v568_v16  ;;  %v573_v26 = vld [vmem:[#allocation2 + $0x118] sm:$0xff]  ;;  %v616_v8 = vld [vmem:[#allocation2 + $0x270] sm:$0xff] }
 0x1f2   : > { %3846 = vmatpush1.bf16.msra.mxu0 %v8165_v31  ;;  %4018 = vmatpush1.bf16.msra.mxu1 %v8167_v32  ;;  %v7713_v31 = vcombine.low %v564_v14, %v568_v16  ;;  %v7715_v32 = vcombine.low %v565_v19, %v569_v20  ;;  %v624_v14 = vld [vmem:[#allocation2 + $0x2b0] sm:$0xff]  ;;  %v621_v16 = vld [vmem:[#allocation2 + $0x298] sm:$0xff]  ;;  %v7761_v20 = vcombine.low %v612_v7, %v616_v8 }
 0x1f3   : > { %3847 = vmatprep.subr.bf16.mxu0 %v8174_v33  ;;  %4019 = vmatprep.subr.bf16.mxu1 %v8176_v37  ;;  %v7722_v33 = vcombine.high %v572_v25, %v576_v54  ;;  %v585_v37 = vld [vmem:[#allocation2 + $0x178] sm:$0xff]  ;;  %v632_v25 = vld [vmem:[#allocation2 + $0x2f0] sm:$0xff] }
 0x1f4   : > { %v625_v19 = vld [vmem:[#allocation2 + $0x2b8] sm:$0xff] }
 0x1f5   : > { %v629_v54 = vld [vmem:[#allocation2 + $0x2d8] sm:$0xff] }
 0x1f6   : > { %3848 = vmatpush1.bf16.msra.mxu0 %v8173_v17  ;;  %4020 = vmatpush1.bf16.msra.mxu1 %v8175_v18  ;;  %v7723_v17 = vcombine.low %v573_v26, %v577_v28  ;;  %v7730_v18 = vcombine.high %v580_v34, %v584_v35  ;;  %v640_v34 = vld [vmem:[#allocation2 + $0x330] sm:$0xff]  ;;  %v637_v35 = vld [vmem:[#allocation2 + $0x318] sm:$0xff] }
 0x1f7   : > { %3849 = vmatprep.subr.bf16.mxu0 %v8182_v40  ;;  %4021 = vmatprep.subr.bf16.mxu1 %v8184_v47  ;;  %v7732_v40 = vcombine.high %v581_v36, %v585_v37  ;;  %v593_v47 = vld [vmem:[#allocation2 + $0x1b8] sm:$0xff] }
 0x1fa   : > { %3850 = vmatpush1.bf16.msra.mxu0 %v8181_v49  ;;  %4022 = vmatpush1.bf16.msra.mxu1 %v8183_v50  ;;  %v7731_v49 = vcombine.low %v581_v36, %v585_v37  ;;  %v7738_v50 = vcombine.high %v588_v41, %v592_v42  ;;  %v641_v36 = vld [vmem:[#allocation2 + $0x338] sm:$0xff]  ;;  %v648_v41 = vld [vmem:[#allocation2 + $0x370] sm:$0xff] }
 0x1fb   : > { %3851 = vmatprep.subr.bf16.mxu0 %v8190_v51  ;;  %4023 = vmatprep.subr.bf16.mxu1 %v8192_v27  ;;  %v7740_v51 = vcombine.high %v589_v44, %v593_v47  ;;  %v601_v27 = vld [vmem:[#allocation2 + $0x1f8] sm:$0xff] }
 0x1fc   : > { %v645_v42 = vld [vmem:[#allocation2 + $0x358] sm:$0xff] }
 0x1fe   : > { %3852 = vmatpush1.bf16.msra.mxu0 %v8189_v59  ;;  %4024 = vmatpush1.bf16.msra.mxu1 %v8191_v60  ;;  %v7739_v59 = vcombine.low %v589_v44, %v593_v47  ;;  %v7746_v60 = vcombine.high %v596_v52, %v600_v55  ;;  %v649_v44 = vld [vmem:[#allocation2 + $0x378] sm:$0xff]  ;;  %v656_v52 = vld [vmem:[#allocation2 + $0x3b0] sm:$0xff] }
 0x1ff   : > { %4036 = vmatprep.subr.bf16.mxu0 %v7690_v61  ;;  %4208 = vmatprep.subr.bf16.mxu1 %v7692_v1  ;;  %v7748_v61 = vcombine.high %v597_v56, %v601_v27  ;;  %v609_v1 = vld [vmem:[#allocation2 + $0x238] sm:$0xff] }
 0x200   : > { %v653_v55 = vld [vmem:[#allocation2 + $0x398] sm:$0xff] }
 0x201   : > { %3854 = vmatmul.mubr.bf16.vlgmr.msra.gmra.mrb[0].mxu0 %v10162_v3  ;;  %4026 = vmatmul.mubr.bf16.vlgmr.msra.gmra.mrb[0].mxu1 %v10162_v3 }
 0x202   : > { %4037 = vmatpush1.bf16.msra.mxu0 %v7689_v4  ;;  %4209 = vmatpush1.bf16.msra.mxu1 %v7691_v5  ;;  %v7747_v4 = vcombine.low %v597_v56, %v601_v27  ;;  %v7754_v5 = vcombine.high %v604_v62, %v608_v63  ;;  %v657_v56 = vld [vmem:[#allocation2 + $0x3b8] sm:$0xff]  ;;  %v664_v62 = vld [vmem:[#allocation2 + $0x3f0] sm:$0xff] }
 0x203   : > { %4038 = vmatprep.subr.bf16.mxu0 %v7698_v6  ;;  %4210 = vmatprep.subr.bf16.mxu1 %v7700_v10  ;;  %v7756_v6 = vcombine.high %v605_v0, %v609_v1  ;;  %v617_v10 = vld [vmem:[#allocation2 + $0x278] sm:$0xff] }
 0x204   : > { %4068 = vmatprep.mubr.bf16.mxu0 %v10102_v58  ;;  %4240 = vmatprep.mubr.bf16.mxu1 %v10102_v58  ;;  %v7724_v58 = vcombine.high %v573_v26, %v577_v28  ;;  %v633_v26 = vld [vmem:[#allocation2 + $0x2f8] sm:$0xff] }
 0x205   : > { %v661_v63 = vld [vmem:[#allocation2 + $0x3d8] sm:$0xff] }
 0x206   : > { %4039 = vmatpush1.bf16.msra.mxu0 %v7697_v12  ;;  %4211 = vmatpush1.bf16.msra.mxu1 %v7699_v43  ;;  %v7755_v12 = vcombine.low %v605_v0, %v609_v1  ;;  %v7762_v43 = vcombine.high %v612_v7, %v616_v8  ;;  %v665_v0 = vld [vmem:[#allocation2 + $0x3f8] sm:$0xff]  ;;  %v672_v7 = vld [vmem:[#allocation2 + $0x430] sm:$0xff] }
 0x207   : > { %4040 = vmatprep.subr.bf16.mxu0 %v7706_v45  ;;  %4212 = vmatprep.subr.bf16.mxu1 %v7708_v13  ;;  %v7764_v45 = vcombine.high %v613_v9, %v617_v10  ;;  %v620_v13 = vld [vmem:[#allocation2 + $0x290] sm:$0xff]  ;;  %v669_v8 = vld [vmem:[#allocation2 + $0x418] sm:$0xff] }
 0x208   : > { %v7769_v28 = vcombine.low %v620_v13, %v624_v14 }
 0x20a   : > { %4041 = vmatpush1.bf16.msra.mxu0 %v7705_v21  ;;  %4213 = vmatpush1.bf16.msra.mxu1 %v7707_v22  ;;  %v7763_v21 = vcombine.low %v613_v9, %v617_v10  ;;  %v7770_v22 = vcombine.high %v620_v13, %v624_v14  ;;  %v673_v9 = vld [vmem:[#allocation2 + $0x438] sm:$0xff]  ;;  %v680_v13 = vld [vmem:[#allocation2 + $0x470] sm:$0xff] }
 0x20b   : > { %4042 = vmatprep.subr.bf16.mxu0 %v7714_v23  ;;  %4214 = vmatprep.subr.bf16.mxu1 %v7716_v24  ;;  %v7772_v23 = vcombine.high %v621_v16, %v625_v19  ;;  %v628_v24 = vld [vmem:[#allocation2 + $0x2d0] sm:$0xff]  ;;  %v677_v14 = vld [vmem:[#allocation2 + $0x458] sm:$0xff] }
 0x20c   : > { %v7777_v37 = vcombine.low %v628_v24, %v632_v25 }
 0x20e   : > { %4043 = vmatpush1.bf16.msra.mxu0 %v7713_v31  ;;  %4215 = vmatpush1.bf16.msra.mxu1 %v7715_v32  ;;  %v7771_v31 = vcombine.low %v621_v16, %v625_v19  ;;  %v7778_v32 = vcombine.high %v628_v24, %v632_v25  ;;  %v681_v16 = vld [vmem:[#allocation2 + $0x478] sm:$0xff]  ;;  %v688_v24 = vld [vmem:[#allocation2 + $0x4b0] sm:$0xff] }
 0x20f   : > { %4044 = vmatprep.subr.bf16.mxu0 %v7722_v33  ;;  %4216 = vmatprep.subr.bf16.mxu1 %v7724_v58  ;;  %v7780_v33 = vcombine.high %v629_v54, %v633_v26  ;;  %v636_v58 = vld [vmem:[#allocation2 + $0x310] sm:$0xff]  ;;  %v685_v25 = vld [vmem:[#allocation2 + $0x498] sm:$0xff] }
 0x210   : > { %v7785_v47 = vcombine.low %v636_v58, %v640_v34 }
 0x212   : > { %4045 = vmatpush1.bf16.msra.mxu0 %v7721_v38  ;;  %4217 = vmatpush1.bf16.msra.mxu1 %v7723_v17  ;;  %v7779_v38 = vcombine.low %v629_v54, %v633_v26  ;;  %v7786_v17 = vcombine.high %v636_v58, %v640_v34  ;;  %v689_v54 = vld [vmem:[#allocation2 + $0x4b8] sm:$0xff]  ;;  %v696_v58 = vld [vmem:[#allocation2 + $0x4f0] sm:$0xff] }
 0x213   : > { %4046 = vmatprep.subr.bf16.mxu0 %v7730_v18  ;;  %4218 = vmatprep.subr.bf16.mxu1 %v7732_v40  ;;  %v7788_v18 = vcombine.high %v637_v35, %v641_v36  ;;  %v644_v40 = vld [vmem:[#allocation2 + $0x350] sm:$0xff]  ;;  %v693_v34 = vld [vmem:[#allocation2 + $0x4d8] sm:$0xff] }
 0x214   : > { %v7793_v27 = vcombine.low %v644_v40, %v648_v41 }
 0x216   : > { %4047 = vmatpush1.bf16.msra.mxu0 %v7729_v48  ;;  %4219 = vmatpush1.bf16.msra.mxu1 %v7731_v49  ;;  %v7787_v48 = vcombine.low %v637_v35, %v641_v36  ;;  %v7794_v49 = vcombine.high %v644_v40, %v648_v41  ;;  %v697_v35 = vld [vmem:[#allocation2 + $0x4f8] sm:$0xff] }
 0x217   : > { %4048 = vmatprep.subr.bf16.mxu0 %v7738_v50  ;;  %4220 = vmatprep.subr.bf16.mxu1 %v7740_v51  ;;  %v7796_v50 = vcombine.high %v645_v42, %v649_v44  ;;  %v652_v51 = vld [vmem:[#allocation2 + $0x390] sm:$0xff]  ;;  %v701_v40 = vld [vmem:[#allocation2 + $0x518] sm:$0xff] }
 0x218   : > { %v7801_v1 = vcombine.low %v652_v51, %v656_v52  ;;  %v705_v41 = vld [vmem:[#allocation2 + $0x538] sm:$0xff] }
 0x21a   : > { %4049 = vmatpush1.bf16.msra.mxu0 %v7737_v29  ;;  %4221 = vmatpush1.bf16.msra.mxu1 %v7739_v59  ;;  %v7795_v29 = vcombine.low %v645_v42, %v649_v44  ;;  %v7802_v59 = vcombine.high %v652_v51, %v656_v52  ;;  %v7843_v44 = vcombine.low %v693_v34, %v697_v35  ;;  %v713_v51 = vld [vmem:[#allocation2 + $0x578] sm:$0xff] }
 0x21b   : > { %4050 = vmatprep.subr.bf16.mxu0 %v7746_v60  ;;  %4222 = vmatprep.subr.bf16.mxu1 %v7748_v61  ;;  %v7804_v60 = vcombine.high %v653_v55, %v657_v56  ;;  %v660_v61 = vld [vmem:[#allocation2 + $0x3d0] sm:$0xff] }
 0x21c   : > { %v7809_v10 = vcombine.low %v660_v61, %v664_v62 }
 0x21e   : > { %4051 = vmatpush1.bf16.msra.mxu0 %v7745_v2  ;;  %4223 = vmatpush1.bf16.msra.mxu1 %v7747_v4  ;;  %v7803_v2 = vcombine.low %v653_v55, %v657_v56  ;;  %v7810_v4 = vcombine.high %v660_v61, %v664_v62  ;;  %v7851_v55 = vcombine.low %v701_v40, %v705_v41  ;;  %v721_v61 = vld [vmem:[#allocation2 + $0x5b8] sm:$0xff] }
 0x21f   : > { %4052 = vmatprep.subr.bf16.mxu0 %v7754_v5  ;;  %4224 = vmatprep.subr.bf16.mxu1 %v7756_v6  ;;  %v7812_v5 = vcombine.high %v661_v63, %v665_v0  ;;  %v668_v6 = vld [vmem:[#allocation2 + $0x410] sm:$0xff] }
 0x220   : > { %v7817_v19 = vcombine.low %v668_v6, %v672_v7 }
 0x222   : > { %4053 = vmatpush1.bf16.msra.mxu0 %v7753_v11  ;;  %4225 = vmatpush1.bf16.msra.mxu1 %v7755_v12  ;;  %v7811_v11 = vcombine.low %v661_v63, %v665_v0  ;;  %v7818_v12 = vcombine.high %v668_v6, %v672_v7  ;;  %v729_v6 = vld [vmem:[#allocation2 + $0x5f8] sm:$0xff] }
 0x223   : > { %4054 = vmatprep.subr.bf16.mxu0 %v7762_v43  ;;  %4226 = vmatprep.subr.bf16.mxu1 %v7764_v45  ;;  %v7820_v43 = vcombine.high %v669_v8, %v673_v9  ;;  %v676_v45 = vld [vmem:[#allocation2 + $0x450] sm:$0xff] }
 0x224   : > { %v7825_v26 = vcombine.low %v676_v45, %v680_v13 }
 0x226   : > { %4055 = vmatpush1.bf16.msra.mxu0 %v7761_v20  ;;  %4227 = vmatpush1.bf16.msra.mxu1 %v7763_v21  ;;  %v7819_v20 = vcombine.low %v669_v8, %v673_v9  ;;  %v7826_v21 = vcombine.high %v676_v45, %v680_v13  ;;  %v737_v45 = vld [vmem:[#allocation2 + $0x638] sm:$0xff] }
 0x227   : > { %4056 = vmatprep.subr.bf16.mxu0 %v7770_v22  ;;  %4228 = vmatprep.subr.bf16.mxu1 %v7772_v23  ;;  %v7828_v22 = vcombine.high %v677_v14, %v681_v16  ;;  %v684_v23 = vld [vmem:[#allocation2 + $0x490] sm:$0xff] }
 0x228   : > { %v7833_v36 = vcombine.low %v684_v23, %v688_v24 }
 0x22a   : > { %4057 = vmatpush1.bf16.msra.mxu0 %v7769_v28  ;;  %4229 = vmatpush1.bf16.msra.mxu1 %v7771_v31  ;;  %v7827_v28 = vcombine.low %v677_v14, %v681_v16  ;;  %v7834_v31 = vcombine.high %v684_v23, %v688_v24  ;;  %v745_v23 = vld [vmem:[#allocation2 + $0x678] sm:$0xff] }
 0x22b   : > { %4058 = vmatprep.subr.bf16.mxu0 %v7778_v32  ;;  %4230 = vmatprep.subr.bf16.mxu1 %v7780_v33  ;;  %v7836_v32 = vcombine.high %v685_v25, %v689_v54  ;;  %v692_v33 = vld [vmem:[#allocation2 + $0x4d0] sm:$0xff] }
 0x22c   : > { %v7841_v42 = vcombine.low %v692_v33, %v696_v58 }
 0x22e   : > { %4059 = vmatpush1.bf16.msra.mxu0 %v7777_v37  ;;  %4231 = vmatpush1.bf16.msra.mxu1 %v7779_v38  ;;  %v7842_v37 = vcombine.high %v692_v33, %v696_v58  ;;  %v7844_v38 = vcombine.high %v693_v34, %v697_v35  ;;  %v753_v33 = vld [vmem:[#allocation2 + $0x6b8] sm:$0xff] }
 0x22f   : > { %4060 = vmatprep.subr.bf16.mxu0 %v7786_v17  ;;  %4232 = vmatprep.subr.bf16.mxu1 %v7788_v18  ;;  %v700_v17 = vld [vmem:[#allocation2 + $0x510] sm:$0xff] }
 0x230   : > { %v704_v18 = vld [vmem:[#allocation2 + $0x530] sm:$0xff] }
 0x231   : > { %v7849_v52 = vcombine.low %v700_v17, %v704_v18 }
 0x232   : > { %4061 = vmatpush1.bf16.msra.mxu0 %v7785_v47  ;;  %4233 = vmatpush1.bf16.msra.mxu1 %v7787_v48  ;;  %v7850_v47 = vcombine.high %v700_v17, %v704_v18  ;;  %v708_v48 = vld [vmem:[#allocation2 + $0x550] sm:$0xff]  ;;  %v761_v17 = vld [vmem:[#allocation2 + $0x6f8] sm:$0xff] }
 0x233   : > { %4062 = vmatprep.subr.bf16.mxu0 %v7794_v49  ;;  %4234 = vmatprep.subr.bf16.mxu1 %v7796_v50  ;;  %v712_v49 = vld [vmem:[#allocation2 + $0x570] sm:$0xff]  ;;  %v709_v50 = vld [vmem:[#allocation2 + $0x558] sm:$0xff] }
 0x234   : > { %v7858_v56 = vcombine.high %v708_v48, %v712_v49  ;;  %v7857_v62 = vcombine.low %v708_v48, %v712_v49  ;;  %v7859_v63 = vcombine.low %v709_v50, %v713_v51  ;;  %v769_v48 = vld [vmem:[#allocation2 + $0x738] sm:$0xff] }
 0x236   : > { %4063 = vmatpush1.bf16.msra.mxu0 %v7793_v27  ;;  %4235 = vmatpush1.bf16.msra.mxu1 %v7795_v29  ;;  %v7860_v27 = vcombine.high %v709_v50, %v713_v51  ;;  %v716_v29 = vld [vmem:[#allocation2 + $0x590] sm:$0xff] }
 0x237   : > { %4064 = vmatprep.subr.bf16.mxu0 %v7802_v59  ;;  %4236 = vmatprep.subr.bf16.mxu1 %v7804_v60  ;;  %v720_v59 = vld [vmem:[#allocation2 + $0x5b0] sm:$0xff]  ;;  %v717_v60 = vld [vmem:[#allocation2 + $0x598] sm:$0xff] }
 0x238   : > { %v7866_v0 = vcombine.high %v716_v29, %v720_v59  ;;  %v7865_v7 = vcombine.low %v716_v29, %v720_v59  ;;  %v7867_v8 = vcombine.low %v717_v60, %v721_v61  ;;  %v777_v29 = vld [vmem:[#allocation2 + $0x778] sm:$0xff] }
 0x23a   : > { %4065 = vmatpush1.bf16.msra.mxu0 %v7801_v1  ;;  %4237 = vmatpush1.bf16.msra.mxu1 %v7803_v2  ;;  %v7868_v1 = vcombine.high %v717_v60, %v721_v61  ;;  %v724_v2 = vld [vmem:[#allocation2 + $0x5d0] sm:$0xff] }
 0x23b   : > { %4066 = vmatprep.subr.bf16.mxu0 %v7810_v4  ;;  %4238 = vmatprep.subr.bf16.mxu1 %v7812_v5  ;;  %v728_v4 = vld [vmem:[#allocation2 + $0x5f0] sm:$0xff]  ;;  %v725_v5 = vld [vmem:[#allocation2 + $0x5d8] sm:$0xff] }
 0x23c   : > { %v7874_v9 = vcombine.high %v724_v2, %v728_v4  ;;  %v7873_v13 = vcombine.low %v724_v2, %v728_v4  ;;  %v7875_v14 = vcombine.low %v725_v5, %v729_v6  ;;  %v785_v2 = vld [vmem:[#allocation2 + $0x7b8] sm:$0xff] }
 0x23e   : > { %4067 = vmatpush1.bf16.msra.mxu0 %v7809_v10  ;;  %4239 = vmatpush1.bf16.msra.mxu1 %v7811_v11  ;;  %v7876_v10 = vcombine.high %v725_v5, %v729_v6  ;;  %v732_v11 = vld [vmem:[#allocation2 + $0x610] sm:$0xff] }
 0x23f   : > { %4079 = vmatprep.subr.bf16.mxu0 %v7818_v12  ;;  %4251 = vmatprep.subr.bf16.mxu1 %v7820_v43  ;;  %v736_v12 = vld [vmem:[#allocation2 + $0x630] sm:$0xff]  ;;  %v733_v43 = vld [vmem:[#allocation2 + $0x618] sm:$0xff] }
 0x240   : > { %v7882_v16 = vcombine.high %v732_v11, %v736_v12  ;;  %v7881_v24 = vcombine.low %v732_v11, %v736_v12  ;;  %v793_v11 = vld [vmem:[#allocation2 + $0x7f8] sm:$0xff] }
 0x241   : > { %4069 = vmatmul.mubr.bf16.vlgmr.msra.gmra.mrb[4].mxu0 %v10108_v15  ;;  %4241 = vmatmul.mubr.bf16.vlgmr.msra.gmra.mrb[4].mxu1 %v10108_v15  ;;  %v7835_v15 = vcombine.low %v685_v25, %v689_v54  ;;  %v7883_v25 = vcombine.low %v733_v43, %v737_v45 }
 0x242   : > { %4080 = vmatpush1.bf16.msra.mxu0 %v7817_v19  ;;  %4252 = vmatpush1.bf16.msra.mxu1 %v7819_v20  ;;  %v7884_v19 = vcombine.high %v733_v43, %v737_v45  ;;  %v740_v20 = vld [vmem:[#allocation2 + $0x650] sm:$0xff] }
 0x243   : > { %4081 = vmatprep.subr.bf16.mxu0 %v7826_v21  ;;  %4253 = vmatprep.subr.bf16.mxu1 %v7828_v22  ;;  %v744_v21 = vld [vmem:[#allocation2 + $0x670] sm:$0xff]  ;;  %v741_v22 = vld [vmem:[#allocation2 + $0x658] sm:$0xff] }
 0x244   : > { %4111 = vmatprep.mubr.bf16.mxu0 %v10118_v53  ;;  %4283 = vmatprep.mubr.bf16.mxu1 %v10118_v53  ;;  %v7852_v53 = vcombine.high %v701_v40, %v705_v41  ;;  %v7890_v54 = vcombine.high %v740_v20, %v744_v21  ;;  %v7889_v58 = vcombine.low %v740_v20, %v744_v21  ;;  %v801_v20 = vld [vmem:[#allocation2 + $0x838] sm:$0xff] }
 0x245   : > { %v7891_v34 = vcombine.low %v741_v22, %v745_v23 }
 0x246   : > { %4082 = vmatpush1.bf16.msra.mxu0 %v7825_v26  ;;  %4254 = vmatpush1.bf16.msra.mxu1 %v7827_v28  ;;  %v7892_v26 = vcombine.high %v741_v22, %v745_v23  ;;  %v748_v28 = vld [vmem:[#allocation2 + $0x690] sm:$0xff] }
 0x247   : > { %4083 = vmatprep.subr.bf16.mxu0 %v7834_v31  ;;  %4255 = vmatprep.subr.bf16.mxu1 %v7836_v32  ;;  %v752_v31 = vld [vmem:[#allocation2 + $0x6b0] sm:$0xff]  ;;  %v749_v32 = vld [vmem:[#allocation2 + $0x698] sm:$0xff] }
 0x248   : > { %v7898_v35 = vcombine.high %v748_v28, %v752_v31  ;;  %v7897_v18 = vcombine.low %v748_v28, %v752_v31  ;;  %v7899_v40 = vcombine.low %v749_v32, %v753_v33  ;;  %v809_v28 = vld [vmem:[#allocation2 + $0x878] sm:$0xff] }
 0x24a   : > { %4084 = vmatpush1.bf16.msra.mxu0 %v7833_v36  ;;  %4256 = vmatpush1.bf16.msra.mxu1 %v7835_v15  ;;  %v7900_v36 = vcombine.high %v749_v32, %v753_v33  ;;  %v756_v15 = vld [vmem:[#allocation2 + $0x6d0] sm:$0xff] }
 0x24b   : > { %4085 = vmatprep.subr.bf16.mxu0 %v7842_v37  ;;  %4257 = vmatprep.subr.bf16.mxu1 %v7844_v38  ;;  %v760_v37 = vld [vmem:[#allocation2 + $0x6f0] sm:$0xff]  ;;  %v757_v38 = vld [vmem:[#allocation2 + $0x6d8] sm:$0xff] }
 0x24c   : > { %v7906_v41 = vcombine.high %v756_v15, %v760_v37  ;;  %v7905_v49 = vcombine.low %v756_v15, %v760_v37  ;;  %v7907_v50 = vcombine.low %v757_v38, %v761_v17  ;;  %v817_v15 = vld [vmem:[#allocation2 + $0x8b8] sm:$0xff] }
 0x24e   : > { %4086 = vmatpush1.bf16.msra.mxu0 %v7841_v42  ;;  %4258 = vmatpush1.bf16.msra.mxu1 %v7843_v44  ;;  %v7908_v42 = vcombine.high %v757_v38, %v761_v17  ;;  %v764_v44 = vld [vmem:[#allocation2 + $0x710] sm:$0xff] }
 0x24f   : > { %4087 = vmatprep.subr.bf16.mxu0 %v7850_v47  ;;  %4259 = vmatprep.subr.bf16.mxu1 %v7852_v53  ;;  %v768_v47 = vld [vmem:[#allocation2 + $0x730] sm:$0xff]  ;;  %v765_v53 = vld [vmem:[#allocation2 + $0x718] sm:$0xff] }
 0x250   : > { %v7914_v51 = vcombine.high %v764_v44, %v768_v47  ;;  %v7913_v59 = vcombine.low %v764_v44, %v768_v47  ;;  %v7915_v60 = vcombine.low %v765_v53, %v769_v48  ;;  %v825_v44 = vld [vmem:[#allocation2 + $0x8f8] sm:$0xff] }
 0x252   : > { %4088 = vmatpush1.bf16.msra.mxu0 %v7849_v52  ;;  %4260 = vmatpush1.bf16.msra.mxu1 %v7851_v55  ;;  %v7916_v52 = vcombine.high %v765_v53, %v769_v48  ;;  %v772_v55 = vld [vmem:[#allocation2 + $0x750] sm:$0xff] }
 0x253   : > { %4089 = vmatprep.subr.bf16.mxu0 %v7858_v56  ;;  %4261 = vmatprep.subr.bf16.mxu1 %v7860_v27  ;;  %v776_v56 = vld [vmem:[#allocation2 + $0x770] sm:$0xff]  ;;  %v773_v27 = vld [vmem:[#allocation2 + $0x758] sm:$0xff] }
 0x254   : > { %v7922_v61 = vcombine.high %v772_v55, %v776_v56  ;;  %v7921_v4 = vcombine.low %v772_v55, %v776_v56  ;;  %v7923_v5 = vcombine.low %v773_v27, %v777_v29 }
 0x256   : > { %4090 = vmatpush1.bf16.msra.mxu0 %v7857_v62  ;;  %4262 = vmatpush1.bf16.msra.mxu1 %v7859_v63  ;;  %v7924_v62 = vcombine.high %v773_v27, %v777_v29  ;;  %v780_v63 = vld [vmem:[#allocation2 + $0x790] sm:$0xff] }
 0x257   : > { %4091 = vmatprep.subr.bf16.mxu0 %v7866_v0  ;;  %4263 = vmatprep.subr.bf16.mxu1 %v7868_v1  ;;  %v784_v0 = vld [vmem:[#allocation2 + $0x7b0] sm:$0xff]  ;;  %v781_v1 = vld [vmem:[#allocation2 + $0x798] sm:$0xff] }
 0x258   : > { %v7930_v6 = vcombine.high %v780_v63, %v784_v0  ;;  %v7929_v12 = vcombine.low %v780_v63, %v784_v0  ;;  %v7931_v43 = vcombine.low %v781_v1, %v785_v2  ;;  %v836_v29 = vld [vmem:[#allocation2 + $0x950] sm:$0xff] }
 0x25a   : > { %4092 = vmatpush1.bf16.msra.mxu0 %v7865_v7  ;;  %4264 = vmatpush1.bf16.msra.mxu1 %v7867_v8  ;;  %v7932_v7 = vcombine.high %v781_v1, %v785_v2  ;;  %v788_v8 = vld [vmem:[#allocation2 + $0x7d0] sm:$0xff] }
 0x25b   : > { %4093 = vmatprep.subr.bf16.mxu0 %v7874_v9  ;;  %4265 = vmatprep.subr.bf16.mxu1 %v7876_v10  ;;  %v792_v9 = vld [vmem:[#allocation2 + $0x7f0] sm:$0xff]  ;;  %v789_v10 = vld [vmem:[#allocation2 + $0x7d8] sm:$0xff] }
 0x25c   : > { %v7938_v45 = vcombine.high %v788_v8, %v792_v9  ;;  %v7937_v21 = vcombine.low %v788_v8, %v792_v9  ;;  %v7939_v22 = vcombine.low %v789_v10, %v793_v11  ;;  %v844_v2 = vld [vmem:[#allocation2 + $0x990] sm:$0xff] }
 0x25e   : > { %4094 = vmatpush1.bf16.msra.mxu0 %v7873_v13  ;;  %4266 = vmatpush1.bf16.msra.mxu1 %v7875_v14  ;;  %v7940_v13 = vcombine.high %v789_v10, %v793_v11  ;;  %v796_v14 = vld [vmem:[#allocation2 + $0x810] sm:$0xff] }
 0x25f   : > { %4095 = vmatprep.subr.bf16.mxu0 %v7882_v16  ;;  %4267 = vmatprep.subr.bf16.mxu1 %v7884_v19  ;;  %v800_v16 = vld [vmem:[#allocation2 + $0x830] sm:$0xff]  ;;  %v797_v19 = vld [vmem:[#allocation2 + $0x818] sm:$0xff] }
 0x260   : > { %v7946_v23 = vcombine.high %v796_v14, %v800_v16  ;;  %v7945_v31 = vcombine.low %v796_v14, %v800_v16  ;;  %v7947_v32 = vcombine.low %v797_v19, %v801_v20  ;;  %v852_v11 = vld [vmem:[#allocation2 + $0x9d0] sm:$0xff] }
 0x262   : > { %4096 = vmatpush1.bf16.msra.mxu0 %v7881_v24  ;;  %4268 = vmatpush1.bf16.msra.mxu1 %v7883_v25  ;;  %v7948_v24 = vcombine.high %v797_v19, %v801_v20  ;;  %v804_v25 = vld [vmem:[#allocation2 + $0x850] sm:$0xff] }
 0x263   : > { %4097 = vmatprep.subr.bf16.mxu0 %v7890_v54  ;;  %4269 = vmatprep.subr.bf16.mxu1 %v7892_v26  ;;  %v808_v54 = vld [vmem:[#allocation2 + $0x870] sm:$0xff]  ;;  %v805_v26 = vld [vmem:[#allocation2 + $0x858] sm:$0xff] }
 0x264   : > { %v7954_v33 = vcombine.high %v804_v25, %v808_v54  ;;  %v7953_v37 = vcombine.low %v804_v25, %v808_v54  ;;  %v7955_v38 = vcombine.low %v805_v26, %v809_v28  ;;  %v860_v20 = vld [vmem:[#allocation2 + $0xa10] sm:$0xff] }
 0x266   : > { %4098 = vmatpush1.bf16.msra.mxu0 %v7889_v58  ;;  %4270 = vmatpush1.bf16.msra.mxu1 %v7891_v34  ;;  %v7956_v58 = vcombine.high %v805_v26, %v809_v28  ;;  %v812_v34 = vld [vmem:[#allocation2 + $0x890] sm:$0xff] }
 0x267   : > { %4099 = vmatprep.subr.bf16.mxu0 %v7898_v35  ;;  %4271 = vmatprep.subr.bf16.mxu1 %v7900_v36  ;;  %v816_v35 = vld [vmem:[#allocation2 + $0x8b0] sm:$0xff]  ;;  %v813_v36 = vld [vmem:[#allocation2 + $0x898] sm:$0xff] }
 0x268   : > { %v7962_v17 = vcombine.high %v812_v34, %v816_v35  ;;  %v7961_v47 = vcombine.low %v812_v34, %v816_v35  ;;  %v868_v28 = vld [vmem:[#allocation2 + $0xa50] sm:$0xff] }
 0x26a   : > { %4100 = vmatpush1.bf16.msra.mxu0 %v7897_v18  ;;  %4272 = vmatpush1.bf16.msra.mxu1 %v7899_v40  ;;  %v7964_v18 = vcombine.high %v813_v36, %v817_v15  ;;  %v820_v40 = vld [vmem:[#allocation2 + $0x8d0] sm:$0xff] }
 0x26b   : > { %4101 = vmatprep.subr.bf16.mxu0 %v7906_v41  ;;  %4273 = vmatprep.subr.bf16.mxu1 %v7908_v42  ;;  %v824_v41 = vld [vmem:[#allocation2 + $0x8f0] sm:$0xff]  ;;  %v821_v42 = vld [vmem:[#allocation2 + $0x8d8] sm:$0xff] }
 0x26c   : > { %v7970_v53 = vcombine.high %v820_v40, %v824_v41  ;;  %v7972_v48 = vcombine.high %v821_v42, %v825_v44  ;;  %v7969_v55 = vcombine.low %v820_v40, %v824_v41  ;;  %v7971_v56 = vcombine.low %v821_v42, %v825_v44  ;;  %v884_v44 = vld [vmem:[#allocation2 + $0xad0] sm:$0xff] }
 0x26e   : > { %4102 = vmatpush1.bf16.msra.mxu0 %v7905_v49  ;;  %4274 = vmatpush1.bf16.msra.mxu1 %v7907_v50  ;;  %v828_v49 = vld [vmem:[#allocation2 + $0x910] sm:$0xff] }
 0x26f   : > { %4103 = vmatprep.subr.bf16.mxu0 %v7914_v51  ;;  %4275 = vmatprep.subr.bf16.mxu1 %v7916_v52  ;;  %v832_v50 = vld [vmem:[#allocation2 + $0x930] sm:$0xff]  ;;  %v829_v51 = vld [vmem:[#allocation2 + $0x918] sm:$0xff] }
 0x270   : > { %v833_v52 = vld [vmem:[#allocation2 + $0x938] sm:$0xff]  ;;  %v7978_v27 = vcombine.high %v828_v49, %v832_v50 }
 0x271   : > { %v7979_v63 = vcombine.low %v829_v51, %v833_v52 }
 0x272   : > { %4104 = vmatpush1.bf16.msra.mxu0 %v7913_v59  ;;  %4276 = vmatpush1.bf16.msra.mxu1 %v7915_v60  ;;  %v840_v59 = vld [vmem:[#allocation2 + $0x970] sm:$0xff]  ;;  %v837_v60 = vld [vmem:[#allocation2 + $0x958] sm:$0xff] }
 0x273   : > { %4105 = vmatprep.subr.bf16.mxu0 %v7922_v61  ;;  %4277 = vmatprep.subr.bf16.mxu1 %v7924_v62  ;;  %v841_v61 = vld [vmem:[#allocation2 + $0x978] sm:$0xff]  ;;  %v7977_v62 = vcombine.low %v828_v49, %v832_v50  ;;  %v7986_v0 = vcombine.high %v836_v29, %v840_v59 }
 0x274   : > { %v7988_v1 = vcombine.high %v837_v60, %v841_v61  ;;  %v7987_v8 = vcombine.low %v837_v60, %v841_v61  ;;  %v900_v61 = vld [vmem:[#allocation2 + $0xb50] sm:$0xff] }
 0x276   : > { %4106 = vmatpush1.bf16.msra.mxu0 %v7921_v4  ;;  %4278 = vmatpush1.bf16.msra.mxu1 %v7923_v5  ;;  %v848_v4 = vld [vmem:[#allocation2 + $0x9b0] sm:$0xff]  ;;  %v845_v5 = vld [vmem:[#allocation2 + $0x998] sm:$0xff] }
 0x277   : > { %4107 = vmatprep.subr.bf16.mxu0 %v7930_v6  ;;  %4279 = vmatprep.subr.bf16.mxu1 %v7932_v7  ;;  %v849_v6 = vld [vmem:[#allocation2 + $0x9b8] sm:$0xff]  ;;  %v7985_v7 = vcombine.low %v836_v29, %v840_v59  ;;  %v7994_v9 = vcombine.high %v844_v2, %v848_v4 }
 0x278   : > { %v7996_v10 = vcombine.high %v845_v5, %v849_v6  ;;  %v7995_v14 = vcombine.low %v845_v5, %v849_v6  ;;  %v908_v6 = vld [vmem:[#allocation2 + $0xb90] sm:$0xff] }
 0x27a   : > { %4108 = vmatpush1.bf16.msra.mxu0 %v7929_v12  ;;  %4280 = vmatpush1.bf16.msra.mxu1 %v7931_v43  ;;  %v856_v12 = vld [vmem:[#allocation2 + $0x9f0] sm:$0xff]  ;;  %v853_v43 = vld [vmem:[#allocation2 + $0x9d8] sm:$0xff] }
 0x27b   : > { %4109 = vmatprep.subr.bf16.mxu0 %v7938_v45  ;;  %4281 = vmatprep.subr.bf16.mxu1 %v7940_v13  ;;  %v857_v45 = vld [vmem:[#allocation2 + $0x9f8] sm:$0xff]  ;;  %v7993_v13 = vcombine.low %v844_v2, %v848_v4  ;;  %v8002_v16 = vcombine.high %v852_v11, %v856_v12 }
 0x27c   : > { %v8004_v19 = vcombine.high %v853_v43, %v857_v45  ;;  %v8003_v25 = vcombine.low %v853_v43, %v857_v45  ;;  %v916_v45 = vld [vmem:[#allocation2 + $0xbd0] sm:$0xff] }
 0x27e   : > { %4110 = vmatpush1.bf16.msra.mxu0 %v7937_v21  ;;  %4282 = vmatpush1.bf16.msra.mxu1 %v7939_v22  ;;  %v864_v21 = vld [vmem:[#allocation2 + $0xa30] sm:$0xff]  ;;  %v861_v22 = vld [vmem:[#allocation2 + $0xa18] sm:$0xff] }
 0x27f   : > { %4122 = vmatprep.subr.bf16.mxu0 %v7946_v23  ;;  %4294 = vmatprep.subr.bf16.mxu1 %v7948_v24  ;;  %v865_v23 = vld [vmem:[#allocation2 + $0xa38] sm:$0xff]  ;;  %v8001_v24 = vcombine.low %v852_v11, %v856_v12  ;;  %v8010_v54 = vcombine.high %v860_v20, %v864_v21 }
 0x280   : > { %v8012_v26 = vcombine.high %v861_v22, %v865_v23  ;;  %v8011_v34 = vcombine.low %v861_v22, %v865_v23  ;;  %v924_v23 = vld [vmem:[#allocation2 + $0xc10] sm:$0xff] }
 0x281   : > { %4112 = vmatmul.mubr.bf16.vlgmr.msra.gmra.mrb[4].mxu0 %v10132_v30  ;;  %4284 = vmatmul.mubr.bf16.vlgmr.msra.gmra.mrb[4].mxu1 %v10132_v30  ;;  %v7963_v30 = vcombine.low %v813_v36, %v817_v15  ;;  %v876_v15 = vld [vmem:[#allocation2 + $0xa90] sm:$0xff] }
 0x282   : > { %4123 = vmatpush1.bf16.msra.mxu0 %v7945_v31  ;;  %4295 = vmatpush1.bf16.msra.mxu1 %v7947_v32  ;;  %v872_v31 = vld [vmem:[#allocation2 + $0xa70] sm:$0xff]  ;;  %v869_v32 = vld [vmem:[#allocation2 + $0xa58] sm:$0xff] }
 0x283   : > { %4124 = vmatprep.subr.bf16.mxu0 %v7954_v33  ;;  %4296 = vmatprep.subr.bf16.mxu1 %v7956_v58  ;;  %v873_v33 = vld [vmem:[#allocation2 + $0xa78] sm:$0xff]  ;;  %v8009_v58 = vcombine.low %v860_v20, %v864_v21  ;;  %v8018_v35 = vcombine.high %v868_v28, %v872_v31 }
 0x284   : > { %4154 = vmatprep.mubr.bf16.mxu0 %v10136_v39  ;;  %4326 = vmatprep.mubr.bf16.mxu1 %v10136_v39  ;;  %v7980_v39 = vcombine.high %v829_v51, %v833_v52  ;;  %v8020_v36 = vcombine.high %v869_v32, %v873_v33  ;;  %v8019_v40 = vcombine.low %v869_v32, %v873_v33  ;;  %v892_v52 = vld [vmem:[#allocation2 + $0xb10] sm:$0xff] }
 0x285   : > { %v932_v33 = vld [vmem:[#allocation2 + $0xc50] sm:$0xff] }
 0x286   : > { %4125 = vmatpush1.bf16.msra.mxu0 %v7953_v37  ;;  %4297 = vmatpush1.bf16.msra.mxu1 %v7955_v38  ;;  %v880_v37 = vld [vmem:[#allocation2 + $0xab0] sm:$0xff]  ;;  %v877_v38 = vld [vmem:[#allocation2 + $0xa98] sm:$0xff] }
 0x287   : > { %4126 = vmatprep.subr.bf16.mxu0 %v7962_v17  ;;  %4298 = vmatprep.subr.bf16.mxu1 %v7964_v18  ;;  %v881_v17 = vld [vmem:[#allocation2 + $0xab8] sm:$0xff]  ;;  %v8017_v18 = vcombine.low %v868_v28, %v872_v31  ;;  %v8026_v41 = vcombine.high %v876_v15, %v880_v37 }
 0x288   : > { %v8028_v42 = vcombine.high %v877_v38, %v881_v17  ;;  %v8027_v49 = vcombine.low %v877_v38, %v881_v17  ;;  %v940_v17 = vld [vmem:[#allocation2 + $0xc90] sm:$0xff] }
 0x28a   : > { %4127 = vmatpush1.bf16.msra.mxu0 %v7961_v47  ;;  %4299 = vmatpush1.bf16.msra.mxu1 %v7963_v30  ;;  %v888_v47 = vld [vmem:[#allocation2 + $0xaf0] sm:$0xff]  ;;  %v885_v30 = vld [vmem:[#allocation2 + $0xad8] sm:$0xff] }
 0x28b   : > { %4128 = vmatprep.subr.bf16.mxu0 %v7970_v53  ;;  %4300 = vmatprep.subr.bf16.mxu1 %v7972_v48  ;;  %v889_v53 = vld [vmem:[#allocation2 + $0xaf8] sm:$0xff]  ;;  %v8025_v48 = vcombine.low %v876_v15, %v880_v37  ;;  %v8034_v50 = vcombine.high %v884_v44, %v888_v47 }
 0x28c   : > { %v8036_v51 = vcombine.high %v885_v30, %v889_v53  ;;  %v8035_v29 = vcombine.low %v885_v30, %v889_v53  ;;  %v948_v53 = vld [vmem:[#allocation2 + $0xcd0] sm:$0xff] }
 0x28e   : > { %4129 = vmatpush1.bf16.msra.mxu0 %v7969_v55  ;;  %4301 = vmatpush1.bf16.msra.mxu1 %v7971_v56  ;;  %v896_v55 = vld [vmem:[#allocation2 + $0xb30] sm:$0xff]  ;;  %v893_v56 = vld [vmem:[#allocation2 + $0xb18] sm:$0xff] }
 0x28f   : > { %4130 = vmatprep.subr.bf16.mxu0 %v7978_v27  ;;  %4302 = vmatprep.subr.bf16.mxu1 %v7980_v39  ;;  %v897_v27 = vld [vmem:[#allocation2 + $0xb38] sm:$0xff]  ;;  %v8033_v39 = vcombine.low %v884_v44, %v888_v47  ;;  %v8042_v59 = vcombine.high %v892_v52, %v896_v55 }
 0x290   : > { %v8044_v60 = vcombine.high %v893_v56, %v897_v27  ;;  %v8043_v2 = vcombine.low %v893_v56, %v897_v27  ;;  %v956_v27 = vld [vmem:[#allocation2 + $0xd10] sm:$0xff] }
 0x292   : > { %4131 = vmatpush1.bf16.msra.mxu0 %v7977_v62  ;;  %4303 = vmatpush1.bf16.msra.mxu1 %v7979_v63  ;;  %v904_v62 = vld [vmem:[#allocation2 + $0xb70] sm:$0xff]  ;;  %v901_v63 = vld [vmem:[#allocation2 + $0xb58] sm:$0xff] }
 0x293   : > { %4132 = vmatprep.subr.bf16.mxu0 %v7986_v0  ;;  %4304 = vmatprep.subr.bf16.mxu1 %v7988_v1  ;;  %v905_v0 = vld [vmem:[#allocation2 + $0xb78] sm:$0xff]  ;;  %v8041_v1 = vcombine.low %v892_v52, %v896_v55  ;;  %v8050_v4 = vcombine.high %v900_v61, %v904_v62 }
 0x294   : > { %v8052_v5 = vcombine.high %v901_v63, %v905_v0  ;;  %v8051_v11 = vcombine.low %v901_v63, %v905_v0  ;;  %v10182_v0 = vld [vmem:[#allocation2 + $0xd50] sm:$0xff] }
 0x296   : > { %4133 = vmatpush1.bf16.msra.mxu0 %v7985_v7  ;;  %4305 = vmatpush1.bf16.msra.mxu1 %v7987_v8  ;;  %v912_v7 = vld [vmem:[#allocation2 + $0xbb0] sm:$0xff]  ;;  %v909_v8 = vld [vmem:[#allocation2 + $0xb98] sm:$0xff] }
 0x297   : > { %4134 = vmatprep.subr.bf16.mxu0 %v7994_v9  ;;  %4306 = vmatprep.subr.bf16.mxu1 %v7996_v10  ;;  %v913_v9 = vld [vmem:[#allocation2 + $0xbb8] sm:$0xff]  ;;  %v8049_v10 = vcombine.low %v900_v61, %v904_v62  ;;  %v8058_v12 = vcombine.high %v908_v6, %v912_v7 }
 0x298   : > { %v8060_v43 = vcombine.high %v909_v8, %v913_v9  ;;  %v8059_v20 = vcombine.low %v909_v8, %v913_v9  ;;  %v10194_v8 = vld [vmem:[#allocation2 + $0xd78] sm:$0xff] }
 0x29a   : > { %4135 = vmatpush1.bf16.msra.mxu0 %v7993_v13  ;;  %4307 = vmatpush1.bf16.msra.mxu1 %v7995_v14  ;;  %v920_v13 = vld [vmem:[#allocation2 + $0xbf0] sm:$0xff]  ;;  %v917_v14 = vld [vmem:[#allocation2 + $0xbd8] sm:$0xff] }
 0x29b   : > { %4136 = vmatprep.subr.bf16.mxu0 %v8002_v16  ;;  %4308 = vmatprep.subr.bf16.mxu1 %v8004_v19  ;;  %v921_v16 = vld [vmem:[#allocation2 + $0xbf8] sm:$0xff]  ;;  %v8057_v19 = vcombine.low %v908_v6, %v912_v7  ;;  %v8066_v21 = vcombine.high %v916_v45, %v920_v13 }
 0x29c   : > { %v8068_v22 = vcombine.high %v917_v14, %v921_v16  ;;  %v8067_v28 = vcombine.low %v917_v14, %v921_v16  ;;  %v10192_v7 = vld [vmem:[#allocation2 + $0xd58] sm:$0xff] }
 0x29d   : > { %v10203_v14 = vld [vmem:[#allocation2 + $0xdb8] sm:$0xff]  ;;  %v8116_v16 = vcombine.high %v10192_v7, %v10194_v8 }
 0x29e   : > { %4137 = vmatpush1.bf16.msra.mxu0 %v8001_v24  ;;  %4309 = vmatpush1.bf16.msra.mxu1 %v8003_v25  ;;  %v928_v24 = vld [vmem:[#allocation2 + $0xc30] sm:$0xff]  ;;  %v925_v25 = vld [vmem:[#allocation2 + $0xc18] sm:$0xff] }
 0x29f   : > { %4138 = vmatprep.subr.bf16.mxu0 %v8010_v54  ;;  %4310 = vmatprep.subr.bf16.mxu1 %v8012_v26  ;;  %v929_v54 = vld [vmem:[#allocation2 + $0xc38] sm:$0xff]  ;;  %v8065_v26 = vcombine.low %v916_v45, %v920_v13  ;;  %v8074_v31 = vcombine.high %v924_v23, %v928_v24  ;;  %v10199_v45 = vld [vmem:[#allocation2 + $0xdb0] sm:$0xff] }
 0x2a0   : > { %v8076_v32 = vcombine.high %v925_v25, %v929_v54  ;;  %v8075_v15 = vcombine.low %v925_v25, %v929_v54  ;;  %v10201_v13 = vld [vmem:[#allocation2 + $0xd98] sm:$0xff] }
 0x2a1   : > { %v10219_v54 = vld [vmem:[#allocation2 + $0xdf8] sm:$0xff] }
 0x2a2   : > { %4139 = vmatpush1.bf16.msra.mxu0 %v8009_v58  ;;  %4311 = vmatpush1.bf16.msra.mxu1 %v8011_v34  ;;  %v936_v58 = vld [vmem:[#allocation2 + $0xc70] sm:$0xff]  ;;  %v933_v34 = vld [vmem:[#allocation2 + $0xc58] sm:$0xff] }
 0x2a3   : > { %4140 = vmatprep.subr.bf16.mxu0 %v8018_v35  ;;  %4312 = vmatprep.subr.bf16.mxu1 %v8020_v36  ;;  %v937_v35 = vld [vmem:[#allocation2 + $0xc78] sm:$0xff]  ;;  %v8073_v36 = vcombine.low %v924_v23, %v928_v24  ;;  %v8082_v37 = vcombine.high %v932_v33, %v936_v58 }
 0x2a4   : > { %v8084_v38 = vcombine.high %v933_v34, %v937_v35  ;;  %v8083_v44 = vcombine.low %v933_v34, %v937_v35  ;;  %v10232_v34 = vld [vmem:[#allocation2 + $0xe18] sm:$0xff] }
 0x2a5   : > { %v10234_v35 = vld [vmem:[#allocation2 + $0xe38] sm:$0xff] }
 0x2a6   : > { %4141 = vmatpush1.bf16.msra.mxu0 %v8017_v18  ;;  %4313 = vmatpush1.bf16.msra.mxu1 %v8019_v40  ;;  %v944_v18 = vld [vmem:[#allocation2 + $0xcb0] sm:$0xff]  ;;  %v941_v40 = vld [vmem:[#allocation2 + $0xc98] sm:$0xff] }
 0x2a7   : > { %4142 = vmatprep.subr.bf16.mxu0 %v8026_v41  ;;  %4314 = vmatprep.subr.bf16.mxu1 %v8028_v42  ;;  %v945_v41 = vld [vmem:[#allocation2 + $0xcb8] sm:$0xff]  ;;  %v8081_v42 = vcombine.low %v932_v33, %v936_v58  ;;  %v8090_v47 = vcombine.high %v940_v17, %v944_v18  ;;  %v8089_v52 = vcombine.low %v940_v17, %v944_v18  ;;  %v10244_v17 = vld [vmem:[#allocation2 + $0xe70] sm:$0xff] }
 0x2a8   : > { %v8092_v30 = vcombine.high %v941_v40, %v945_v41  ;;  %v10246_v18 = vld [vmem:[#allocation2 + $0xe58] sm:$0xff] }
 0x2aa   : > { %4143 = vmatpush1.bf16.msra.mxu0 %v8025_v48  ;;  %4315 = vmatpush1.bf16.msra.mxu1 %v8027_v49  ;;  %v952_v48 = vld [vmem:[#allocation2 + $0xcf0] sm:$0xff]  ;;  %v949_v49 = vld [vmem:[#allocation2 + $0xcd8] sm:$0xff] }
 0x2ab   : > { %4144 = vmatprep.subr.bf16.mxu0 %v8034_v50  ;;  %4316 = vmatprep.subr.bf16.mxu1 %v8036_v51  ;;  %v953_v50 = vld [vmem:[#allocation2 + $0xcf8] sm:$0xff]  ;;  %v1052_v51 = vlaneseq  ;;  %v8098_v55 = vcombine.high %v948_v53, %v952_v48  ;;  %v8097_v61 = vcombine.low %v948_v53, %v952_v48 }
 0x2ac   : > { %v8100_v56 = vcombine.high %v949_v49, %v953_v50  ;;  %v8099_v62 = vcombine.low %v949_v49, %v953_v50 }
 0x2ae   : > { %4145 = vmatpush1.bf16.msra.mxu0 %v8033_v39  ;;  %4317 = vmatpush1.bf16.msra.mxu1 %v8035_v29  ;;  %v960_v39 = vld [vmem:[#allocation2 + $0xd30] sm:$0xff]  ;;  %v957_v29 = vld [vmem:[#allocation2 + $0xd18] sm:$0xff] }
 0x2af   : > { %4146 = vmatprep.subr.bf16.mxu0 %v8042_v59  ;;  %4318 = vmatprep.subr.bf16.mxu1 %v8044_v60  ;;  %v961_v59 = vld [vmem:[#allocation2 + $0xd38] sm:$0xff]  ;;  %v10180_v60 = vshrl.u32 %v1052_v51, 7  ;;  %v8105_v9 = vcombine.low %v956_v27, %v960_v39  ;;  %v8139_v51 = vcombine.low %v10232_v34, %v10234_v35 }
 0x2b0   : > { %v8108_v63 = vcombine.high %v957_v29, %v961_v59 }
 0x2b1   : > { %v1066_v6 = vsub.s32 3, %v10180_v60 }
 0x2b2   : > { %4147 = vmatpush1.bf16.msra.mxu0 %v8041_v1  ;;  %4319 = vmatpush1.bf16.msra.mxu1 %v8043_v2  ;;  %v968_v1 = vld [vmem:[#allocation2 + $0xd70] sm:$0xff]  ;;  %v10185_v2 = vsub.s32 0, %v10180_v60 }
 0x2b3   : > { %4148 = vmatprep.subr.bf16.mxu0 %v8050_v4  ;;  %4320 = vmatprep.subr.bf16.mxu1 %v8052_v5  ;;  %v1062_v4 = vsub.s32 2, %v10180_v60  ;;  %v10189_v5 = vsub.s32 1, %v10180_v60 }
 0x2b6   : > { %4149 = vmatpush1.bf16.msra.mxu0 %v8049_v10  ;;  %4321 = vmatpush1.bf16.msra.mxu1 %v8051_v11  ;;  %v1050_v10 = vld [vmem:[#allocation4] sm:$0xff]  ;;  %v10196_v11 = vld [vmem:[#allocation2 + $0xd90] sm:$0xff] }
 0x2b7   : > { %4150 = vmatprep.subr.bf16.mxu0 %v8058_v12  ;;  %4322 = vmatprep.subr.bf16.mxu1 %v8060_v43  ;;  %v8107_v12 = vcombine.low %v957_v29, %v961_v59  ;;  %v8114_v43 = vcombine.high %v10182_v0, %v968_v1  ;;  %v1063_v23 = vrot.slane %v1050_v10, %v1062_v4 }
 0x2b8   : > { %v1059_v24 = vrot.slane %v1050_v10, %v10189_v5  ;;  %v1067_v25 = vrot.slane %v1050_v10, %v1066_v6  ;;  %v8121_v33 = vcombine.low %v10196_v11, %v10199_v45  ;;  %v8122_v58 = vcombine.high %v10196_v11, %v10199_v45 }
 0x2ba   : > { %4151 = vmatpush1.bf16.msra.mxu0 %v8057_v19  ;;  %4323 = vmatpush1.bf16.msra.mxu1 %v8059_v20  ;;  %v10207_v19 = vld [vmem:[#allocation2 + $0xdd0] sm:$0xff] }
 0x2bb   : > { %4152 = vmatprep.subr.bf16.mxu0 %v8066_v21  ;;  %4324 = vmatprep.subr.bf16.mxu1 %v8068_v22  ;;  %v10209_v20 = vld [vmem:[#allocation2 + $0xdf0] sm:$0xff]  ;;  %v10211_v21 = vld [vmem:[#allocation2 + $0xdd8] sm:$0xff]  ;;  %v1055_v22 = vrot.slane %v1050_v10, %v10185_v2 }
 0x2be   : > { %4153 = vmatpush1.bf16.msra.mxu0 %v8065_v26  ;;  %4325 = vmatpush1.bf16.msra.mxu1 %v8067_v28  ;;  %v10221_v26 = vld [vmem:[#allocation2 + $0xe10] sm:$0xff] }
 0x2bf   : > { %4165 = vmatprep.subr.bf16.mxu0 %v8074_v31  ;;  %4337 = vmatprep.subr.bf16.mxu1 %v8076_v32  ;;  %v10223_v28 = vld [vmem:[#allocation2 + $0xe30] sm:$0xff]  ;;  %v8113_v31 = vcombine.low %v10182_v0, %v968_v1  ;;  %v8115_v32 = vcombine.low %v10192_v7, %v10194_v8 }
 0x2c0   : > { %v8137_v50 = vcombine.low %v10221_v26, %v10223_v28 }
 0x2c1   : > { %4155 = vmatmul.mubr.bf16.vlgmr.msra.gmra.mrb[4].mxu0 %v10150_v46  ;;  %4327 = vmatmul.mubr.bf16.vlgmr.msra.gmra.mrb[4].mxu1 %v10150_v46  ;;  %v8091_v46 = vcombine.low %v941_v40, %v945_v41  ;;  %v10248_v40 = vld [vmem:[#allocation2 + $0xe78] sm:$0xff] }
 0x2c2   : > { %4166 = vmatpush1.bf16.msra.mxu0 %v8073_v36  ;;  %4338 = vmatpush1.bf16.msra.mxu1 %v8075_v15  ;;  %v10236_v36 = vld [vmem:[#allocation2 + $0xe50] sm:$0xff]  ;;  %v8123_v15 = vcombine.low %v10201_v13, %v10203_v14  ;;  %v8148_v29 = vcombine.high %v10246_v18, %v10248_v40 }
 0x2c3   : > { %4167 = vmatprep.subr.bf16.mxu0 %v8082_v37  ;;  %4339 = vmatprep.subr.bf16.mxu1 %v8084_v38  ;;  %v8124_v37 = vcombine.high %v10201_v13, %v10203_v14  ;;  %v8130_v38 = vcombine.high %v10207_v19, %v10209_v20 }
 0x2c4   : > { %4197 = vmatprep.mubr.bf16.mxu0 %v10154_v57  ;;  %4369 = vmatprep.mubr.bf16.mxu1 %v10154_v57  ;;  %v8106_v57 = vcombine.high %v956_v27, %v960_v39  ;;  %v8146_v39 = vcombine.high %v10236_v36, %v10244_v17 }
 0x2c6   : > { %4168 = vmatpush1.bf16.msra.mxu0 %v8081_v42  ;;  %4340 = vmatpush1.bf16.msra.mxu1 %v8083_v44  ;;  %v8129_v42 = vcombine.low %v10207_v19, %v10209_v20  ;;  %v8131_v44 = vcombine.low %v10211_v21, %v10219_v54 }
 0x2c7   : > { %4169 = vmatprep.subr.bf16.mxu0 %v8090_v47  ;;  %4341 = vmatprep.subr.bf16.mxu1 %v8092_v30  ;;  %v8132_v47 = vcombine.high %v10211_v21, %v10219_v54  ;;  %v8138_v30 = vcombine.high %v10221_v26, %v10223_v28 }
 0x2ca   : > { %4170 = vmatpush1.bf16.msra.mxu0 %v8089_v52  ;;  %4342 = vmatpush1.bf16.msra.mxu1 %v8091_v46  ;;  %v8140_v52 = vcombine.high %v10232_v34, %v10234_v35  ;;  %v1013_v34 = vld [vmem:[#allocation2 + $0xed8] sm:$0xff] }
 0x2cb   : > { %4171 = vmatprep.subr.bf16.mxu0 %v8098_v55  ;;  %4343 = vmatprep.subr.bf16.mxu1 %v8100_v56  ;;  %v1017_v35 = vld [vmem:[#allocation2 + $0xef8] sm:$0xff] }
 0x2ce   : > { %4172 = vmatpush1.bf16.msra.mxu0 %v8097_v61  ;;  %4344 = vmatpush1.bf16.msra.mxu1 %v8099_v62 }
 0x2cf   : > { %4173 = vmatprep.subr.bf16.mxu0 %v8106_v57  ;;  %4345 = vmatprep.subr.bf16.mxu1 %v8108_v63 }
 0x2d2   : > { %4174 = vmatpush1.bf16.msra.mxu0 %v8105_v9  ;;  %4346 = vmatpush1.bf16.msra.mxu1 %v8107_v12 }
 0x2d3   : > { %4175 = vmatprep.subr.bf16.mxu0 %v8114_v43  ;;  %4347 = vmatprep.subr.bf16.mxu1 %v8116_v16 }
 0x2d4   : > { %v3855_v41 = vpop.f32.mrb[0].mxu0  ;;  %v4027_v48 = vpop.f32.mrb[0].mxu1 }
 0x2d5   : > { %v10258_v53 = vadd.f32 %v3855_v41, %v1055_v22  ;;  %v3857_v49 = vpop.f32.mrb[1].mxu0  ;;  %v10266_v46 = vadd.f32 %v4027_v48, %v1063_v23  ;;  %v4029_v56 = vpop.f32.mrb[1].mxu1 }
 0x2d6   : > { %v10268_v55 = vadd.f32 %v3857_v49, %v1059_v24  ;;  %v3859_v27 = vpop.f32.mrb[2].mxu0  ;;  %4176 = vmatpush1.bf16.msra.mxu0 %v8113_v31  ;;  %v10276_v61 = vadd.f32 %v4029_v56, %v1067_v25  ;;  %v4031_v57 = vpop.f32.mrb[2].mxu1  ;;  %4348 = vmatpush1.bf16.msra.mxu1 %v8115_v32 }
 0x2d7   : > { %v4380_v59 = vmul.f32 %v10258_v53, %v10258_v53  ;;  %v10278_v62 = vadd.f32 %v3859_v27, %v1055_v22  ;;  %v3861_v63 = vpop.f32.mrb[3].mxu0  ;;  %4177 = vmatprep.subr.bf16.mxu0 %v8122_v58  ;;  %v4382_v0 = vmul.f32 %v10266_v46, %v10266_v46  ;;  %v10284_v7 = vadd.f32 %v4031_v57, %v1063_v23  ;;  %v4033_v9 = vpop.f32.mrb[3].mxu1 }
 0x2d8   : > { %v4381_v1 = vmul.f32 %v10268_v55, %v10268_v55  ;;  %v10286_v8 = vadd.f32 %v3861_v63, %v1059_v24  ;;  %4349 = vmatprep.subr.bf16.mxu1 %v8124_v37  ;;  %v4383_v11 = vmul.f32 %v10276_v61, %v10276_v61  ;;  %v10293_v43 = vadd.f32 %v4033_v9, %v1067_v25 }
 0x2d9   : > { %v4396_v10 = vmul.f32 %v10258_v53, %v4380_v59  ;;  %v4388_v12 = vmul.f32 %v10278_v62, %v10278_v62  ;;  %v4398_v45 = vmul.f32 %v10266_v46, %v4382_v0  ;;  %v4390_v14 = vmul.f32 %v10284_v7, %v10284_v7  ;;  %v1004_v0 = vld [vmem:[#allocation2 + $0xe90] sm:$0xff] }
 0x2da   : > { %v4397_v13 = vmul.f32 %v10268_v55, %v4381_v1  ;;  %v4389_v16 = vmul.f32 %v10286_v8, %v10286_v8  ;;  %4178 = vmatpush1.bf16.msra.mxu0 %v8121_v33  ;;  %v4399_v20 = vmul.f32 %v10276_v61, %v4383_v11  ;;  %v4391_v22 = vmul.f32 %v10293_v43, %v10293_v43  ;;  %v1008_v1 = vld [vmem:[#allocation2 + $0xeb0] sm:$0xff]  ;;  %v1005_v11 = vld [vmem:[#allocation2 + $0xe98] sm:$0xff] }
 0x2db   : > { %v4412_v19 = vmul.f32 0.044715, %v4396_v10  ;;  %v4404_v21 = vmul.f32 %v10278_v62, %v4388_v12  ;;  %4350 = vmatpush1.bf16.msra.mxu1 %v8123_v15  ;;  %4179 = vmatprep.subr.bf16.mxu0 %v8130_v38  ;;  %v4414_v23 = vmul.f32 0.044715, %v4398_v45  ;;  %v4406_v25 = vmul.f32 %v10284_v7, %v4390_v14  ;;  %v1009_v12 = vld [vmem:[#allocation2 + $0xeb8] sm:$0xff]  ;;  %v1016_v14 = vld [vmem:[#allocation2 + $0xef0] sm:$0xff] }
 0x2dc   : > { %v4413_v24 = vmul.f32 0.044715, %v4397_v13  ;;  %v4405_v54 = vmul.f32 %v10286_v8, %v4389_v16  ;;  %4351 = vmatprep.subr.bf16.mxu1 %v8132_v47  ;;  %v4415_v32 = vmul.f32 0.044715, %v4399_v20  ;;  %v4407_v58 = vmul.f32 %v10293_v43, %v4391_v22  ;;  %v1020_v16 = vld [vmem:[#allocation2 + $0xf10] sm:$0xff] }
 0x2dd   : > { %v4428_v31 = vadd.f32 %v10258_v53, %v4412_v19  ;;  %v4420_v33 = vmul.f32 0.044715, %v4404_v21  ;;  %v4430_v37 = vadd.f32 %v10266_v46, %v4414_v23  ;;  %v4422_v48 = vmul.f32 0.044715, %v4406_v25 }
 0x2de   : > { %v4429_v41 = vadd.f32 %v10268_v55, %v4413_v24  ;;  %v4421_v15 = vmul.f32 0.044715, %v4405_v54  ;;  %4180 = vmatpush1.bf16.msra.mxu0 %v8129_v42  ;;  %v4431_v49 = vadd.f32 %v10276_v61, %v4415_v32  ;;  %v4423_v27 = vmul.f32 0.044715, %v4407_v58  ;;  %v1028_v54 = vld [vmem:[#allocation2 + $0xf50] sm:$0xff]  ;;  %v1029_v58 = vld [vmem:[#allocation2 + $0xf58] sm:$0xff] }
 0x2df   : > { %v4444_v38 = vmul.f32 0.7978846, %v4428_v31  ;;  %v4436_v56 = vadd.f32 %v10278_v62, %v4420_v33  ;;  %4352 = vmatpush1.bf16.msra.mxu1 %v8131_v44  ;;  %4181 = vmatprep.subr.bf16.mxu0 %v8138_v30  ;;  %v4446_v47 = vmul.f32 0.7978846, %v4430_v37  ;;  %v4438_v57 = vadd.f32 %v10284_v7, %v4422_v48  ;;  %v1032_v31 = vld [vmem:[#allocation2 + $0xf70] sm:$0xff]  ;;  %v1033_v37 = vld [vmem:[#allocation2 + $0xf78] sm:$0xff] }
 0x2e0   : > { %v4445_v59 = vmul.f32 0.7978846, %v4429_v41  ;;  %v4437_v63 = vadd.f32 %v10286_v8, %v4421_v15  ;;  %4353 = vmatprep.subr.bf16.mxu1 %v8140_v52  ;;  %v4447_v9 = vmul.f32 0.7978846, %v4431_v49  ;;  %v4439_v10 = vadd.f32 %v10293_v43, %v4423_v27  ;;  %v1036_v27 = vld [vmem:[#allocation2 + $0xf90] sm:$0xff] }
 0x2e1   : > { %9356 = vtanh.f32 %v4444_v38  ;;  %v4452_v42 = vmul.f32 0.7978846, %v4436_v56  ;;  %v4454_v45 = vmul.f32 0.7978846, %v4438_v57  ;;  %v8145_v44 = vcombine.low %v10236_v36, %v10244_v17 }
 0x2e2   : > { %9358 = vtanh.f32 %v4446_v47  ;;  %4182 = vmatpush1.bf16.msra.mxu0 %v8137_v50  ;;  %v4453_v30 = vmul.f32 0.7978846, %v4437_v63  ;;  %v8147_v52 = vcombine.low %v10246_v18, %v10248_v40  ;;  %v8154_v13 = vcombine.high %v1004_v0, %v1008_v1  ;;  %v1012_v50 = vld [vmem:[#allocation2 + $0xed0] sm:$0xff]  ;;  %v1021_v40 = vld [vmem:[#allocation2 + $0xf18] sm:$0xff] }
 0x2e3   : > { %9360 = vtanh.f32 %v4445_v59  ;;  %4354 = vmatpush1.bf16.msra.mxu1 %v8139_v51  ;;  %4183 = vmatprep.subr.bf16.mxu0 %v8146_v39  ;;  %v4455_v26 = vmul.f32 0.7978846, %v4439_v10  ;;  %v8156_v28 = vcombine.high %v1005_v11, %v1009_v12  ;;  %v8153_v36 = vcombine.low %v1004_v0, %v1008_v1  ;;  %v1024_v18 = vld [vmem:[#allocation2 + $0xf30] sm:$0xff] }
 0x2e4   : > { %9362 = vtanh.f32 %v4447_v9  ;;  %4355 = vmatprep.subr.bf16.mxu1 %v8148_v29  ;;  %v8155_v17 = vcombine.low %v1005_v11, %v1009_v12  ;;  %v8162_v51 = vcombine.high %v1012_v50, %v1016_v14  ;;  %v8164_v39 = vcombine.high %v1013_v34, %v1017_v35  ;;  %v1025_v29 = vld [vmem:[#allocation2 + $0xf38] sm:$0xff]  ;;  %v1040_v47 = vld [vmem:[#allocation2 + $0xfb0] sm:$0xff] }
 0x2e5   : > { %9364 = vtanh.f32 %v4452_v42  ;;  %v8161_v19 = vcombine.low %v1012_v50, %v1016_v14  ;;  %v8163_v21 = vcombine.low %v1013_v34, %v1017_v35  ;;  %v8170_v22 = vcombine.high %v1020_v16, %v1024_v18  ;;  %v1044_v34 = vld [vmem:[#allocation2 + $0xfd0] sm:$0xff] }
 0x2e6   : > { %9366 = vtanh.f32 %v4454_v45  ;;  %4184 = vmatpush1.bf16.msra.mxu0 %v8145_v44  ;;  %v8172_v25 = vcombine.high %v1021_v40, %v1025_v29  ;;  %v8169_v48 = vcombine.low %v1020_v16, %v1024_v18  ;;  %v8171_v49 = vcombine.low %v1021_v40, %v1025_v29  ;;  %v1037_v45 = vld [vmem:[#allocation2 + $0xf98] sm:$0xff]  ;;  %v1048_v35 = vld [vmem:[#allocation2 + $0xff0] sm:$0xff] }
 0x2e7   : > { %9368 = vtanh.f32 %v4453_v30  ;;  %4356 = vmatpush1.bf16.msra.mxu1 %v8147_v52  ;;  %4185 = vmatprep.subr.bf16.mxu0 %v8154_v13  ;;  %v8178_v56 = vcombine.high %v1028_v54, %v1032_v31  ;;  %v8180_v1 = vcombine.high %v1029_v58, %v1033_v37  ;;  %v8177_v11 = vcombine.low %v1028_v54, %v1032_v31  ;;  %v1041_v44 = vld [vmem:[#allocation2 + $0xfb8] sm:$0xff] }
 0x2e8   : > { %9370 = vtanh.f32 %v4455_v26  ;;  %4357 = vmatprep.subr.bf16.mxu1 %v8156_v28  ;;  %v8179_v12 = vcombine.low %v1029_v58, %v1033_v37  ;;  %v8185_v13 = vcombine.low %v1036_v27, %v1040_v47  ;;  %v8186_v14 = vcombine.high %v1036_v27, %v1040_v47  ;;  %v8817_v58 = vld [vmem:[#allocation6 + $0xc] ss:$16 sps:$4 sm:$0xff]   ;;  %v8812_v37 = vld [vmem:[#allocation6] ss:$16 sps:$4 sm:$0xff]   ;;  %v8827_v27 = vld [vmem:[#allocation6 + $0x48] ss:$16 sps:$4 sm:$0xff]  }
 0x2e9   : > { %v8188_v16 = vcombine.high %v1037_v45, %v1041_v44  ;;  %v8832_v47 = vld [vmem:[#allocation6 + $0x64] ss:$16 sps:$4 sm:$0xff]  }
 0x2ea   : > { %4186 = vmatpush1.bf16.msra.mxu0 %v8153_v36 }
 0x2eb   : > { %v9357_v20 = vpop.eup %9356  ;;  %4358 = vmatpush1.bf16.msra.mxu1 %v8155_v17  ;;  %4187 = vmatprep.subr.bf16.mxu0 %v8162_v51 }
 0x2ec   : > { %v9359_v23 = vpop.eup %9358  ;;  %v4476_v24 = vadd.f32 1.0, %v9357_v20  ;;  %4359 = vmatprep.subr.bf16.mxu1 %v8164_v39  ;;  %v1045_v20 = vld [vmem:[#allocation2 + $0xfd8] sm:$0xff] }
 0x2ed   : > { %v9361_v32 = vpop.eup %9360  ;;  %v4478_v33 = vadd.f32 1.0, %v9359_v23  ;;  %v8194_v23 = vcombine.high %v1044_v34, %v1048_v35 }
 0x2ee   : > { %v9363_v41 = vpop.eup %9362  ;;  %4188 = vmatpush1.bf16.msra.mxu0 %v8161_v19  ;;  %v4477_v15 = vadd.f32 1.0, %v9361_v32  ;;  %v4492_v63 = vmul.f32 0.5, %v4476_v24  ;;  %v8187_v19 = vcombine.low %v1037_v45, %v1041_v44  ;;  %v8850_v45 = vld [vmem:[#allocation6 + $0xc4] ss:$16 sps:$4 sm:$0xff]   ;;  %v8853_v44 = vld [vmem:[#allocation6 + $0xcc] ss:$16 sps:$4 sm:$0xff]  }
 0x2ef   : > { %v9365_v38 = vpop.eup %9364  ;;  %4360 = vmatpush1.bf16.msra.mxu1 %v8163_v21  ;;  %4189 = vmatprep.subr.bf16.mxu0 %v8170_v22  ;;  %v4479_v59 = vadd.f32 1.0, %v9363_v41  ;;  %v4494_v42 = vmul.f32 0.5, %v4478_v33  ;;  %v1049_v21 = vld [vmem:[#allocation2 + $0xff8] sm:$0xff]  ;;  %v8193_v33 = vcombine.low %v1044_v34, %v1048_v35  ;;  %v8823_v41 = vld [vmem:[#allocation6 + $0x2c] ss:$16 sps:$4 sm:$0xff]  }
 0x2f0   : > { %v9367_v57 = vpop.eup %9366  ;;  %v4484_v0 = vadd.f32 1.0, %v9365_v38  ;;  %4361 = vmatprep.subr.bf16.mxu1 %v8172_v25  ;;  %v4493_v28 = vmul.f32 0.5, %v4477_v15  ;;  %v4508_v51 = vmul.f32 %v10258_v53, %v4492_v63  ;;  %v8821_v15 = vld [vmem:[#allocation6 + $0x28] ss:$16 sps:$4 sm:$0xff]   ;;  %v8826_v38 = vld [vmem:[#allocation6 + $0x44] ss:$16 sps:$4 sm:$0xff]  }
 0x2f1   : > { %v9369_v9 = vpop.eup %9368  ;;  %v4486_v10 = vadd.f32 1.0, %v9367_v57  ;;  %v4495_v17 = vmul.f32 0.5, %v4479_v59  ;;  %v4510_v40 = vmul.f32 %v10266_v46, %v4494_v42  ;;  %v8835_v59 = vld [vmem:[#allocation6 + $0x6c] ss:$16 sps:$4 sm:$0xff]   ;;  %v8833_v57 = vld [vmem:[#allocation6 + $0x68] ss:$16 sps:$4 sm:$0xff]  }
 0x2f2   : > { %v9371_v30 = vpop.eup %9370  ;;  %v4500_v52 = vmul.f32 0.5, %v4484_v0  ;;  %4190 = vmatpush1.bf16.msra.mxu0 %v8169_v48  ;;  %v4485_v26 = vadd.f32 1.0, %v9369_v9  ;;  %v4509_v24 = vmul.f32 %v10268_v55, %v4493_v28  ;;  %v8195_v55 = vcombine.low %v1045_v20, %v1049_v21  ;;  %v8818_v48 = vld [vmem:[#allocation6 + $0x20] ss:$16 sps:$4 sm:$0xff]   ;;  %v8838_v63 = vld [vmem:[#allocation6 + $0x84] ss:$16 sps:$4 sm:$0xff]  }
 0x2f3   : > { %v4502_v50 = vmul.f32 0.5, %v4486_v10  ;;  %4362 = vmatpush1.bf16.msra.mxu1 %v8171_v49  ;;  %4191 = vmatprep.subr.bf16.mxu0 %v8178_v56  ;;  %v4487_v36 = vadd.f32 1.0, %v9371_v30  ;;  %v8829_v49 = vld [vmem:[#allocation6 + $0x4c] ss:$16 sps:$4 sm:$0xff]   ;;  %v8824_v56 = vld [vmem:[#allocation6 + $0x40] ss:$16 sps:$4 sm:$0xff]  }
 0x2f4   : > { %v4516_v39 = vmul.f32 %v10278_v62, %v4500_v52  ;;  %4363 = vmatprep.subr.bf16.mxu1 %v8180_v1  ;;  %v4501_v18 = vmul.f32 0.5, %v4485_v26  ;;  %v4511_v62 = vmul.f32 %v10276_v61, %v4495_v17  ;;  %v8815_v61 = vld [vmem:[#allocation6 + $0x8] ss:$16 sps:$4 sm:$0xff]   ;;  %v8841_v0 = vld [vmem:[#allocation6 + $0x8c] ss:$16 sps:$4 sm:$0xff]  }
 0x2f5   : > { %v4518_v29 = vmul.f32 %v10284_v7, %v4502_v50  ;;  %v4503_v22 = vmul.f32 0.5, %v4487_v36  ;;  %v8196_v7 = vcombine.high %v1045_v20, %v1049_v21  ;;  %v8836_v1 = vld [vmem:[#allocation6 + $0x80] ss:$16 sps:$4 sm:$0xff]   ;;  %v8839_v9 = vld [vmem:[#allocation6 + $0x88] ss:$16 sps:$4 sm:$0xff]  }
 0x2f6   : > { %4192 = vmatpush1.bf16.msra.mxu0 %v8177_v11  ;;  %v4517_v25 = vmul.f32 %v10286_v8, %v4501_v18  ;;  %v10338_v53 = vpack.c.bf16 %v4516_v39, %v4508_v51  ;;  %v8814_v8 = vld [vmem:[#allocation6 + $0x4] ss:$16 sps:$4 sm:$0xff]   ;;  %v8847_v10 = vld [vmem:[#allocation6 + $0xac] ss:$16 sps:$4 sm:$0xff]   ;;  %v8842_v11 = vld [vmem:[#allocation6 + $0xa0] ss:$16 sps:$4 sm:$0xff]  }
 0x2f7   : > { %4364 = vmatpush1.bf16.msra.mxu1 %v8179_v12  ;;  %4193 = vmatprep.subr.bf16.mxu0 %v8186_v14  ;;  %v4519_v46 = vmul.f32 %v10293_v43, %v4503_v22  ;;  %v10342_v54 = vpack.c.bf16 %v4518_v29, %v4510_v40  ;;  %v8820_v43 = vld [vmem:[#allocation6 + $0x24] ss:$16 sps:$4 sm:$0xff]   ;;  %v8845_v12 = vld [vmem:[#allocation6 + $0xa8] ss:$16 sps:$4 sm:$0xff]   ;;  %v8848_v30 = vld [vmem:[#allocation6 + $0xc0] ss:$16 sps:$4 sm:$0xff]  }
 0x2f8   : > { %4365 = vmatprep.subr.bf16.mxu1 %v8188_v16  ;;  %v4525_v31 = vpack.c.bf16 %v4517_v25, %v4509_v24  ;;  %v8844_v42 = vld [vmem:[#allocation6 + $0xa4] ss:$16 sps:$4 sm:$0xff]   ;;  %v8851_v52 = vld [vmem:[#allocation6 + $0xc8] ss:$16 sps:$4 sm:$0xff]   ;;  %v8859_v26 = vld [vmem:[#allocation6 + $0xec] ss:$16 sps:$4 sm:$0xff]  }
 0x2f9   : > { %v10344_v32 = vpack.c.bf16 %v4519_v46, %v4511_v62  ;;  %v8854_v28 = vld [vmem:[#allocation6 + $0xe0] ss:$16 sps:$4 sm:$0xff]   ;;  %v8857_v50 = vld [vmem:[#allocation6 + $0xe8] ss:$16 sps:$4 sm:$0xff]   ;;  %v8862_v14 = vld [vmem:[#allocation6 + $0x104] ss:$16 sps:$4 sm:$0xff]  }
 0x2fa   : > { %4194 = vmatpush1.bf16.msra.mxu0 %v8185_v13  ;;  %v8856_v13 = vld [vmem:[#allocation6 + $0xe4] ss:$16 sps:$4 sm:$0xff]   ;;  %v8865_v34 = vld [vmem:[#allocation6 + $0x10c] ss:$16 sps:$4 sm:$0xff]   ;;  %v8860_v35 = vld [vmem:[#allocation6 + $0x100] ss:$16 sps:$4 sm:$0xff]  }
 0x2fb   : > { %4366 = vmatpush1.bf16.msra.mxu1 %v8187_v19  ;;  %4195 = vmatprep.subr.bf16.mxu0 %v8194_v23  ;;  %v8863_v36 = vld [vmem:[#allocation6 + $0x108] ss:$16 sps:$4 sm:$0xff]   ;;  %v8868_v17 = vld [vmem:[#allocation6 + $0x124] ss:$16 sps:$4 sm:$0xff]   ;;  %v8871_v51 = vld [vmem:[#allocation6 + $0x12c] ss:$16 sps:$4 sm:$0xff]  }
 0x2fc   : > { %4367 = vmatprep.subr.bf16.mxu1 %v8196_v7  ;;  %v8866_v39 = vld [vmem:[#allocation6 + $0x120] ss:$16 sps:$4 sm:$0xff]   ;;  %v8869_v16 = vld [vmem:[#allocation6 + $0x128] ss:$16 sps:$4 sm:$0xff]   ;;  %v8874_v18 = vld [vmem:[#allocation6 + $0x144] ss:$16 sps:$4 sm:$0xff]  }
 0x2fd   : > { %v8877_v40 = vld [vmem:[#allocation6 + $0x14c] ss:$16 sps:$4 sm:$0xff]   ;;  %v8872_v29 = vld [vmem:[#allocation6 + $0x140] ss:$16 sps:$4 sm:$0xff]   ;;  %v8875_v19 = vld [vmem:[#allocation6 + $0x148] ss:$16 sps:$4 sm:$0xff]  }
 0x2fe   : > { %4196 = vmatpush1.bf16.msra.mxu0 %v8193_v33  ;;  %v8880_v20 = vld [vmem:[#allocation6 + $0x164] ss:$16 sps:$4 sm:$0xff]   ;;  %v8883_v21 = vld [vmem:[#allocation6 + $0x16c] ss:$16 sps:$4 sm:$0xff]   ;;  %v8878_v22 = vld [vmem:[#allocation6 + $0x160] ss:$16 sps:$4 sm:$0xff]  }
 0x2ff   : > { %4368 = vmatpush1.bf16.msra.mxu1 %v8195_v55  ;;  %6090 = vmatprep.subr.bf16.mxu0 %v8814_v8  ;;  %v8881_v23 = vld [vmem:[#allocation6 + $0x168] ss:$16 sps:$4 sm:$0xff]   ;;  %v8886_v24 = vld [vmem:[#allocation6 + $0x184] ss:$16 sps:$4 sm:$0xff]   ;;  %v8889_v25 = vld [vmem:[#allocation6 + $0x18c] ss:$16 sps:$4 sm:$0xff]  }
 0x300   : > { %6262 = vmatprep.subr.bf16.mxu1 %v8817_v58  ;;  %v8884_v62 = vld [vmem:[#allocation6 + $0x180] ss:$16 sps:$4 sm:$0xff]   ;;  %v8887_v46 = vld [vmem:[#allocation6 + $0x188] ss:$16 sps:$4 sm:$0xff]   ;;  %v8892_v7 = vld [vmem:[#allocation6 + $0x1a4] ss:$16 sps:$4 sm:$0xff]  }
 0x301   : > { %4198 = vmatmul.mubr.bf16.vlgmr.msra.gmra.mrb[4].mxu0 %v10162_v3  ;;  %v8890_v33 = vld [vmem:[#allocation6 + $0x1a0] ss:$16 sps:$4 sm:$0xff]   ;;  %v8893_v55 = vld [vmem:[#allocation6 + $0x1a8] ss:$16 sps:$4 sm:$0xff]   ;;  %v8898_v8 = vld [vmem:[#allocation6 + $0x1c4] ss:$16 sps:$4 sm:$0xff]  }
 0x302   : > { %4370 = vmatmul.mubr.bf16.vlgmr.msra.gmra.mrb[4].mxu1 %v10162_v3  ;;  %6091 = vmatpush1.bf16.msra.mxu0 %v8812_v37  ;;  %v8830_v3 = vld [vmem:[#allocation6 + $0x60] ss:$16 sps:$4 sm:$0xff]   ;;  %v8901_v58 = vld [vmem:[#allocation6 + $0x1cc] ss:$16 sps:$4 sm:$0xff]  }
 0x303   : > { %6122 = vmatprep.mubr.bf16.mxu0 %v4525_v31  ;;  %6263 = vmatpush1.bf16.msra.mxu1 %v8815_v61  ;;  %v8896_v37 = vld [vmem:[#allocation6 + $0x1c0] ss:$16 sps:$4 sm:$0xff]   ;;  %v8899_v61 = vld [vmem:[#allocation6 + $0x1c8] ss:$16 sps:$4 sm:$0xff]  }
 0x304   : > { %6294 = vmatprep.mubr.bf16.mxu1 %v4525_v31  ;;  %6092 = vmatprep.subr.bf16.mxu0 %v8820_v43  ;;  %v8895_v31 = vld [vmem:[#allocation6 + $0x1ac] ss:$16 sps:$4 sm:$0xff]   ;;  %v8904_v43 = vld [vmem:[#allocation6 + $0x1e4] ss:$16 sps:$4 sm:$0xff]  }
 0x305   : > { %6264 = vmatprep.subr.bf16.mxu1 %v8823_v41  ;;  %v8907_v41 = vld [vmem:[#allocation6 + $0x1ec] ss:$16 sps:$4 sm:$0xff]  }
 0x306   : > { %6093 = vmatpush1.bf16.msra.mxu0 %v8818_v48  ;;  %v8902_v48 = vld [vmem:[#allocation6 + $0x1e0] ss:$16 sps:$4 sm:$0xff]  }
 0x307   : > { %6265 = vmatpush1.bf16.msra.mxu1 %v8821_v15  ;;  %6094 = vmatprep.subr.bf16.mxu0 %v8826_v38  ;;  %v8905_v15 = vld [vmem:[#allocation6 + $0x1e8] ss:$16 sps:$4 sm:$0xff]   ;;  %v8910_v38 = vld [vmem:[#allocation6 + $0x204] ss:$16 sps:$4 sm:$0xff]  }
 0x308   : > { %6266 = vmatprep.subr.bf16.mxu1 %v8829_v49  ;;  %v8913_v49 = vld [vmem:[#allocation6 + $0x20c] ss:$16 sps:$4 sm:$0xff]  }
 0x30a   : > { %6095 = vmatpush1.bf16.msra.mxu0 %v8824_v56  ;;  %v8908_v56 = vld [vmem:[#allocation6 + $0x200] ss:$16 sps:$4 sm:$0xff]  }
 0x30b   : > { %6267 = vmatpush1.bf16.msra.mxu1 %v8827_v27  ;;  %6096 = vmatprep.subr.bf16.mxu0 %v8832_v47  ;;  %v8911_v27 = vld [vmem:[#allocation6 + $0x208] ss:$16 sps:$4 sm:$0xff]   ;;  %v8916_v47 = vld [vmem:[#allocation6 + $0x224] ss:$16 sps:$4 sm:$0xff]  }
 0x30c   : > { %6268 = vmatprep.subr.bf16.mxu1 %v8835_v59  ;;  %v8919_v59 = vld [vmem:[#allocation6 + $0x22c] ss:$16 sps:$4 sm:$0xff]  }
 0x30e   : > { %6097 = vmatpush1.bf16.msra.mxu0 %v8830_v3  ;;  %v8914_v3 = vld [vmem:[#allocation6 + $0x220] ss:$16 sps:$4 sm:$0xff]  }
 0x30f   : > { %6269 = vmatpush1.bf16.msra.mxu1 %v8833_v57  ;;  %6098 = vmatprep.subr.bf16.mxu0 %v8838_v63  ;;  %v8917_v57 = vld [vmem:[#allocation6 + $0x228] ss:$16 sps:$4 sm:$0xff]   ;;  %v8922_v63 = vld [vmem:[#allocation6 + $0x244] ss:$16 sps:$4 sm:$0xff]  }
 0x310   : > { %6270 = vmatprep.subr.bf16.mxu1 %v8841_v0  ;;  %v8925_v0 = vld [vmem:[#allocation6 + $0x24c] ss:$16 sps:$4 sm:$0xff]  }
 0x312   : > { %6099 = vmatpush1.bf16.msra.mxu0 %v8836_v1  ;;  %v8920_v1 = vld [vmem:[#allocation6 + $0x240] ss:$16 sps:$4 sm:$0xff]  }
 0x313   : > { %6271 = vmatpush1.bf16.msra.mxu1 %v8839_v9  ;;  %6100 = vmatprep.subr.bf16.mxu0 %v8844_v42  ;;  %v8923_v9 = vld [vmem:[#allocation6 + $0x248] ss:$16 sps:$4 sm:$0xff]   ;;  %v8928_v42 = vld [vmem:[#allocation6 + $0x264] ss:$16 sps:$4 sm:$0xff]  }
 0x314   : > { %6272 = vmatprep.subr.bf16.mxu1 %v8847_v10  ;;  %v8926_v10 = vld [vmem:[#allocation6 + $0x260] ss:$16 sps:$4 sm:$0xff]  }
 0x316   : > { %6101 = vmatpush1.bf16.msra.mxu0 %v8842_v11  ;;  %v8929_v11 = vld [vmem:[#allocation6 + $0x268] ss:$16 sps:$4 sm:$0xff]  }
 0x317   : > { %6273 = vmatpush1.bf16.msra.mxu1 %v8845_v12  ;;  %6102 = vmatprep.subr.bf16.mxu0 %v8850_v45  ;;  %v8934_v12 = vld [vmem:[#allocation6 + $0x284] ss:$16 sps:$4 sm:$0xff]   ;;  %v8937_v45 = vld [vmem:[#allocation6 + $0x28c] ss:$16 sps:$4 sm:$0xff]  }
 0x318   : > { %6274 = vmatprep.subr.bf16.mxu1 %v8853_v44  ;;  %v8935_v44 = vld [vmem:[#allocation6 + $0x288] ss:$16 sps:$4 sm:$0xff]  }
 0x31a   : > { %6103 = vmatpush1.bf16.msra.mxu0 %v8848_v30  ;;  %v8940_v30 = vld [vmem:[#allocation6 + $0x2a4] ss:$16 sps:$4 sm:$0xff]  }
 0x31b   : > { %6275 = vmatpush1.bf16.msra.mxu1 %v8851_v52  ;;  %6104 = vmatprep.subr.bf16.mxu0 %v8856_v13  ;;  %v8943_v52 = vld [vmem:[#allocation6 + $0x2ac] ss:$16 sps:$4 sm:$0xff]   ;;  %v8938_v13 = vld [vmem:[#allocation6 + $0x2a0] ss:$16 sps:$4 sm:$0xff]  }
 0x31c   : > { %6276 = vmatprep.subr.bf16.mxu1 %v8859_v26  ;;  %v8941_v26 = vld [vmem:[#allocation6 + $0x2a8] ss:$16 sps:$4 sm:$0xff]  }
 0x31e   : > { %6105 = vmatpush1.bf16.msra.mxu0 %v8854_v28  ;;  %v8946_v28 = vld [vmem:[#allocation6 + $0x2c4] ss:$16 sps:$4 sm:$0xff]  }
 0x31f   : > { %6277 = vmatpush1.bf16.msra.mxu1 %v8857_v50  ;;  %6106 = vmatprep.subr.bf16.mxu0 %v8862_v14  ;;  %v8949_v50 = vld [vmem:[#allocation6 + $0x2cc] ss:$16 sps:$4 sm:$0xff]   ;;  %v8944_v14 = vld [vmem:[#allocation6 + $0x2c0] ss:$16 sps:$4 sm:$0xff]  }
 0x320   : > { %6278 = vmatprep.subr.bf16.mxu1 %v8865_v34  ;;  %v8947_v34 = vld [vmem:[#allocation6 + $0x2c8] ss:$16 sps:$4 sm:$0xff]  }
 0x322   : > { %6107 = vmatpush1.bf16.msra.mxu0 %v8860_v35  ;;  %v8952_v35 = vld [vmem:[#allocation6 + $0x2e4] ss:$16 sps:$4 sm:$0xff]  }
 0x323   : > { %6279 = vmatpush1.bf16.msra.mxu1 %v8863_v36  ;;  %6108 = vmatprep.subr.bf16.mxu0 %v8868_v17  ;;  %v8955_v36 = vld [vmem:[#allocation6 + $0x2ec] ss:$16 sps:$4 sm:$0xff]   ;;  %v8950_v17 = vld [vmem:[#allocation6 + $0x2e0] ss:$16 sps:$4 sm:$0xff]  }
 0x324   : > { %6280 = vmatprep.subr.bf16.mxu1 %v8871_v51  ;;  %v8953_v51 = vld [vmem:[#allocation6 + $0x2e8] ss:$16 sps:$4 sm:$0xff]  }
 0x326   : > { %6109 = vmatpush1.bf16.msra.mxu0 %v8866_v39  ;;  %v8958_v39 = vld [vmem:[#allocation6 + $0x304] ss:$16 sps:$4 sm:$0xff]  }
 0x327   : > { %6281 = vmatpush1.bf16.msra.mxu1 %v8869_v16  ;;  %6110 = vmatprep.subr.bf16.mxu0 %v8874_v18  ;;  %v8961_v16 = vld [vmem:[#allocation6 + $0x30c] ss:$16 sps:$4 sm:$0xff]   ;;  %v8956_v18 = vld [vmem:[#allocation6 + $0x300] ss:$16 sps:$4 sm:$0xff]  }
 0x328   : > { %6282 = vmatprep.subr.bf16.mxu1 %v8877_v40  ;;  %v8959_v40 = vld [vmem:[#allocation6 + $0x308] ss:$16 sps:$4 sm:$0xff]  }
 0x32a   : > { %6111 = vmatpush1.bf16.msra.mxu0 %v8872_v29  ;;  %v8964_v29 = vld [vmem:[#allocation6 + $0x324] ss:$16 sps:$4 sm:$0xff]  }
 0x32b   : > { %6283 = vmatpush1.bf16.msra.mxu1 %v8875_v19  ;;  %6112 = vmatprep.subr.bf16.mxu0 %v8880_v20  ;;  %v8967_v19 = vld [vmem:[#allocation6 + $0x32c] ss:$16 sps:$4 sm:$0xff]   ;;  %v8962_v20 = vld [vmem:[#allocation6 + $0x320] ss:$16 sps:$4 sm:$0xff]  }
 0x32c   : > { %6284 = vmatprep.subr.bf16.mxu1 %v8883_v21  ;;  %v8965_v21 = vld [vmem:[#allocation6 + $0x328] ss:$16 sps:$4 sm:$0xff]  }
 0x32e   : > { %6113 = vmatpush1.bf16.msra.mxu0 %v8878_v22  ;;  %v8970_v22 = vld [vmem:[#allocation6 + $0x344] ss:$16 sps:$4 sm:$0xff]  }
 0x32f   : > { %6285 = vmatpush1.bf16.msra.mxu1 %v8881_v23  ;;  %6114 = vmatprep.subr.bf16.mxu0 %v8886_v24  ;;  %v8973_v23 = vld [vmem:[#allocation6 + $0x34c] ss:$16 sps:$4 sm:$0xff]   ;;  %v8968_v24 = vld [vmem:[#allocation6 + $0x340] ss:$16 sps:$4 sm:$0xff]  }
 0x330   : > { %6286 = vmatprep.subr.bf16.mxu1 %v8889_v25  ;;  %v8971_v25 = vld [vmem:[#allocation6 + $0x348] ss:$16 sps:$4 sm:$0xff]  }
 0x332   : > { %6115 = vmatpush1.bf16.msra.mxu0 %v8884_v62  ;;  %v8976_v62 = vld [vmem:[#allocation6 + $0x364] ss:$16 sps:$4 sm:$0xff]  }
 0x333   : > { %6287 = vmatpush1.bf16.msra.mxu1 %v8887_v46  ;;  %6116 = vmatprep.subr.bf16.mxu0 %v8892_v7  ;;  %v8979_v46 = vld [vmem:[#allocation6 + $0x36c] ss:$16 sps:$4 sm:$0xff]   ;;  %v8974_v7 = vld [vmem:[#allocation6 + $0x360] ss:$16 sps:$4 sm:$0xff]  }
 0x334   : > { %6288 = vmatprep.subr.bf16.mxu1 %v8895_v31  ;;  %v8977_v31 = vld [vmem:[#allocation6 + $0x368] ss:$16 sps:$4 sm:$0xff]  }
 0x336   : > { %6117 = vmatpush1.bf16.msra.mxu0 %v8890_v33  ;;  %v8982_v33 = vld [vmem:[#allocation6 + $0x384] ss:$16 sps:$4 sm:$0xff]  }
 0x337   : > { %6289 = vmatpush1.bf16.msra.mxu1 %v8893_v55  ;;  %6118 = vmatprep.subr.bf16.mxu0 %v8898_v8  ;;  %v8985_v55 = vld [vmem:[#allocation6 + $0x38c] ss:$16 sps:$4 sm:$0xff]   ;;  %v8980_v8 = vld [vmem:[#allocation6 + $0x380] ss:$16 sps:$4 sm:$0xff]  }
 0x338   : > { %6290 = vmatprep.subr.bf16.mxu1 %v8901_v58  ;;  %v8983_v58 = vld [vmem:[#allocation6 + $0x388] ss:$16 sps:$4 sm:$0xff]  }
 0x33a   : > { %6119 = vmatpush1.bf16.msra.mxu0 %v8896_v37  ;;  %v8988_v37 = vld [vmem:[#allocation6 + $0x3a4] ss:$16 sps:$4 sm:$0xff]  }
 0x33b   : > { %6291 = vmatpush1.bf16.msra.mxu1 %v8899_v61  ;;  %6120 = vmatprep.subr.bf16.mxu0 %v8904_v43  ;;  %v8991_v61 = vld [vmem:[#allocation6 + $0x3ac] ss:$16 sps:$4 sm:$0xff]   ;;  %v8986_v43 = vld [vmem:[#allocation6 + $0x3a0] ss:$16 sps:$4 sm:$0xff]  }
 0x33c   : > { %6292 = vmatprep.subr.bf16.mxu1 %v8907_v41  ;;  %v8989_v41 = vld [vmem:[#allocation6 + $0x3a8] ss:$16 sps:$4 sm:$0xff]  }
 0x33e   : > { %6121 = vmatpush1.bf16.msra.mxu0 %v8902_v48  ;;  %v8994_v48 = vld [vmem:[#allocation6 + $0x3c4] ss:$16 sps:$4 sm:$0xff]  }
 0x33f   : > { %6293 = vmatpush1.bf16.msra.mxu1 %v8905_v15  ;;  %6133 = vmatprep.subr.bf16.mxu0 %v8910_v38  ;;  %v8997_v15 = vld [vmem:[#allocation6 + $0x3cc] ss:$16 sps:$4 sm:$0xff]   ;;  %v8992_v38 = vld [vmem:[#allocation6 + $0x3c0] ss:$16 sps:$4 sm:$0xff]  }
 0x340   : > { %6305 = vmatprep.subr.bf16.mxu1 %v8913_v49  ;;  %v8995_v49 = vld [vmem:[#allocation6 + $0x3c8] ss:$16 sps:$4 sm:$0xff]  }
 0x341   : > { %6123 = vmatmul.mubr.bf16.vlgmr.msra.gmra.mrb[8].mxu0 %v10338_v53 }
 0x342   : > { %6295 = vmatmul.mubr.bf16.vlgmr.msra.gmra.mrb[8].mxu1 %v10338_v53  ;;  %6134 = vmatpush1.bf16.msra.mxu0 %v8908_v56  ;;  %v8931_v53 = vld [vmem:[#allocation6 + $0x26c] ss:$16 sps:$4 sm:$0xff]   ;;  %v9000_v56 = vld [vmem:[#allocation6 + $0x3e4] ss:$16 sps:$4 sm:$0xff]  }
 0x343   : > { %6165 = vmatprep.mubr.bf16.mxu0 %v10344_v32  ;;  %6306 = vmatpush1.bf16.msra.mxu1 %v8911_v27  ;;  %v9003_v27 = vld [vmem:[#allocation6 + $0x3ec] ss:$16 sps:$4 sm:$0xff]  }
 0x344   : > { %6337 = vmatprep.mubr.bf16.mxu1 %v10344_v32  ;;  %6135 = vmatprep.subr.bf16.mxu0 %v8916_v47  ;;  %v8932_v32 = vld [vmem:[#allocation6 + $0x280] ss:$16 sps:$4 sm:$0xff]  }
 0x345   : > { %6307 = vmatprep.subr.bf16.mxu1 %v8919_v59  ;;  %v8998_v47 = vld [vmem:[#allocation6 + $0x3e0] ss:$16 sps:$4 sm:$0xff]   ;;  %v9001_v59 = vld [vmem:[#allocation6 + $0x3e8] ss:$16 sps:$4 sm:$0xff]  }
 0x346   : > { %6136 = vmatpush1.bf16.msra.mxu0 %v8914_v3  ;;  %v9006_v3 = vld [vmem:[#allocation6 + $0x404] ss:$16 sps:$4 sm:$0xff]  }
 0x347   : > { %6308 = vmatpush1.bf16.msra.mxu1 %v8917_v57  ;;  %6137 = vmatprep.subr.bf16.mxu0 %v8922_v63  ;;  %v9009_v57 = vld [vmem:[#allocation6 + $0x40c] ss:$16 sps:$4 sm:$0xff]   ;;  %v9004_v63 = vld [vmem:[#allocation6 + $0x400] ss:$16 sps:$4 sm:$0xff]  }
 0x348   : > { %6309 = vmatprep.subr.bf16.mxu1 %v8925_v0  ;;  %v9007_v0 = vld [vmem:[#allocation6 + $0x408] ss:$16 sps:$4 sm:$0xff]  }
 0x34a   : > { %6138 = vmatpush1.bf16.msra.mxu0 %v8920_v1  ;;  %v9012_v1 = vld [vmem:[#allocation6 + $0x424] ss:$16 sps:$4 sm:$0xff]  }
 0x34b   : > { %6310 = vmatpush1.bf16.msra.mxu1 %v8923_v9  ;;  %6139 = vmatprep.subr.bf16.mxu0 %v8928_v42  ;;  %v9015_v9 = vld [vmem:[#allocation6 + $0x42c] ss:$16 sps:$4 sm:$0xff]   ;;  %v9010_v42 = vld [vmem:[#allocation6 + $0x420] ss:$16 sps:$4 sm:$0xff]  }
 0x34c   : > { %6311 = vmatprep.subr.bf16.mxu1 %v8931_v53  ;;  %v9013_v53 = vld [vmem:[#allocation6 + $0x428] ss:$16 sps:$4 sm:$0xff]  }
 0x34e   : > { %6140 = vmatpush1.bf16.msra.mxu0 %v8926_v10  ;;  %v9018_v10 = vld [vmem:[#allocation6 + $0x444] ss:$16 sps:$4 sm:$0xff]  }
 0x34f   : > { %6312 = vmatpush1.bf16.msra.mxu1 %v8929_v11  ;;  %6141 = vmatprep.subr.bf16.mxu0 %v8934_v12  ;;  %v9021_v11 = vld [vmem:[#allocation6 + $0x44c] ss:$16 sps:$4 sm:$0xff]   ;;  %v9016_v12 = vld [vmem:[#allocation6 + $0x440] ss:$16 sps:$4 sm:$0xff]  }
 0x350   : > { %6313 = vmatprep.subr.bf16.mxu1 %v8937_v45  ;;  %v9019_v45 = vld [vmem:[#allocation6 + $0x448] ss:$16 sps:$4 sm:$0xff]  }
 0x352   : > { %6142 = vmatpush1.bf16.msra.mxu0 %v8932_v32  ;;  %v9024_v32 = vld [vmem:[#allocation6 + $0x464] ss:$16 sps:$4 sm:$0xff]  }
 0x353   : > { %6314 = vmatpush1.bf16.msra.mxu1 %v8935_v44  ;;  %6143 = vmatprep.subr.bf16.mxu0 %v8940_v30  ;;  %v9027_v44 = vld [vmem:[#allocation6 + $0x46c] ss:$16 sps:$4 sm:$0xff]   ;;  %v9022_v30 = vld [vmem:[#allocation6 + $0x460] ss:$16 sps:$4 sm:$0xff]  }
 0x354   : > { %6315 = vmatprep.subr.bf16.mxu1 %v8943_v52  ;;  %v9030_v52 = vld [vmem:[#allocation6 + $0x484] ss:$16 sps:$4 sm:$0xff]  }
 0x356   : > { %6144 = vmatpush1.bf16.msra.mxu0 %v8938_v13  ;;  %v9033_v13 = vld [vmem:[#allocation6 + $0x48c] ss:$16 sps:$4 sm:$0xff]  }
 0x357   : > { %6316 = vmatpush1.bf16.msra.mxu1 %v8941_v26  ;;  %6145 = vmatprep.subr.bf16.mxu0 %v8946_v28  ;;  %v9028_v26 = vld [vmem:[#allocation6 + $0x480] ss:$16 sps:$4 sm:$0xff]   ;;  %v9031_v28 = vld [vmem:[#allocation6 + $0x488] ss:$16 sps:$4 sm:$0xff]  }
 0x358   : > { %6317 = vmatprep.subr.bf16.mxu1 %v8949_v50  ;;  %v9036_v50 = vld [vmem:[#allocation6 + $0x4a4] ss:$16 sps:$4 sm:$0xff]  }
 0x35a   : > { %6146 = vmatpush1.bf16.msra.mxu0 %v8944_v14  ;;  %v9039_v14 = vld [vmem:[#allocation6 + $0x4ac] ss:$16 sps:$4 sm:$0xff]  }
 0x35b   : > { %6318 = vmatpush1.bf16.msra.mxu1 %v8947_v34  ;;  %6147 = vmatprep.subr.bf16.mxu0 %v8952_v35  ;;  %v9034_v34 = vld [vmem:[#allocation6 + $0x4a0] ss:$16 sps:$4 sm:$0xff]   ;;  %v9037_v35 = vld [vmem:[#allocation6 + $0x4a8] ss:$16 sps:$4 sm:$0xff]  }
 0x35c   : > { %6319 = vmatprep.subr.bf16.mxu1 %v8955_v36  ;;  %v9042_v36 = vld [vmem:[#allocation6 + $0x4c4] ss:$16 sps:$4 sm:$0xff]  }
 0x35e   : > { %6148 = vmatpush1.bf16.msra.mxu0 %v8950_v17  ;;  %v9045_v17 = vld [vmem:[#allocation6 + $0x4cc] ss:$16 sps:$4 sm:$0xff]  }
 0x35f   : > { %6320 = vmatpush1.bf16.msra.mxu1 %v8953_v51  ;;  %6149 = vmatprep.subr.bf16.mxu0 %v8958_v39  ;;  %v9040_v51 = vld [vmem:[#allocation6 + $0x4c0] ss:$16 sps:$4 sm:$0xff]   ;;  %v9043_v39 = vld [vmem:[#allocation6 + $0x4c8] ss:$16 sps:$4 sm:$0xff]  }
 0x360   : > { %6321 = vmatprep.subr.bf16.mxu1 %v8961_v16  ;;  %v9048_v16 = vld [vmem:[#allocation6 + $0x4e4] ss:$16 sps:$4 sm:$0xff]  }
 0x362   : > { %6150 = vmatpush1.bf16.msra.mxu0 %v8956_v18  ;;  %v9051_v18 = vld [vmem:[#allocation6 + $0x4ec] ss:$16 sps:$4 sm:$0xff]  }
 0x363   : > { %6322 = vmatpush1.bf16.msra.mxu1 %v8959_v40  ;;  %6151 = vmatprep.subr.bf16.mxu0 %v8964_v29  ;;  %v9046_v40 = vld [vmem:[#allocation6 + $0x4e0] ss:$16 sps:$4 sm:$0xff]   ;;  %v9049_v29 = vld [vmem:[#allocation6 + $0x4e8] ss:$16 sps:$4 sm:$0xff]  }
 0x364   : > { %6323 = vmatprep.subr.bf16.mxu1 %v8967_v19  ;;  %v9054_v19 = vld [vmem:[#allocation6 + $0x504] ss:$16 sps:$4 sm:$0xff]  }
 0x366   : > { %6152 = vmatpush1.bf16.msra.mxu0 %v8962_v20  ;;  %v9057_v20 = vld [vmem:[#allocation6 + $0x50c] ss:$16 sps:$4 sm:$0xff]  }
 0x367   : > { %6324 = vmatpush1.bf16.msra.mxu1 %v8965_v21  ;;  %6153 = vmatprep.subr.bf16.mxu0 %v8970_v22  ;;  %v9052_v21 = vld [vmem:[#allocation6 + $0x500] ss:$16 sps:$4 sm:$0xff]   ;;  %v9055_v22 = vld [vmem:[#allocation6 + $0x508] ss:$16 sps:$4 sm:$0xff]  }
 0x368   : > { %6325 = vmatprep.subr.bf16.mxu1 %v8973_v23  ;;  %v9060_v23 = vld [vmem:[#allocation6 + $0x524] ss:$16 sps:$4 sm:$0xff]  }
 0x36a   : > { %6154 = vmatpush1.bf16.msra.mxu0 %v8968_v24  ;;  %v9063_v24 = vld [vmem:[#allocation6 + $0x52c] ss:$16 sps:$4 sm:$0xff]  }
 0x36b   : > { %6326 = vmatpush1.bf16.msra.mxu1 %v8971_v25  ;;  %6155 = vmatprep.subr.bf16.mxu0 %v8976_v62  ;;  %v9058_v25 = vld [vmem:[#allocation6 + $0x520] ss:$16 sps:$4 sm:$0xff]   ;;  %v9061_v62 = vld [vmem:[#allocation6 + $0x528] ss:$16 sps:$4 sm:$0xff]  }
 0x36c   : > { %6327 = vmatprep.subr.bf16.mxu1 %v8979_v46  ;;  %v9066_v46 = vld [vmem:[#allocation6 + $0x544] ss:$16 sps:$4 sm:$0xff]  }
 0x36e   : > { %6156 = vmatpush1.bf16.msra.mxu0 %v8974_v7  ;;  %v9069_v7 = vld [vmem:[#allocation6 + $0x54c] ss:$16 sps:$4 sm:$0xff]  }
 0x36f   : > { %6328 = vmatpush1.bf16.msra.mxu1 %v8977_v31  ;;  %6157 = vmatprep.subr.bf16.mxu0 %v8982_v33  ;;  %v9064_v31 = vld [vmem:[#allocation6 + $0x540] ss:$16 sps:$4 sm:$0xff]   ;;  %v9067_v33 = vld [vmem:[#allocation6 + $0x548] ss:$16 sps:$4 sm:$0xff]  }
 0x370   : > { %6329 = vmatprep.subr.bf16.mxu1 %v8985_v55  ;;  %v9072_v55 = vld [vmem:[#allocation6 + $0x564] ss:$16 sps:$4 sm:$0xff]  }
 0x372   : > { %6158 = vmatpush1.bf16.msra.mxu0 %v8980_v8  ;;  %v9075_v8 = vld [vmem:[#allocation6 + $0x56c] ss:$16 sps:$4 sm:$0xff]  }
 0x373   : > { %6330 = vmatpush1.bf16.msra.mxu1 %v8983_v58  ;;  %6159 = vmatprep.subr.bf16.mxu0 %v8988_v37  ;;  %v9070_v58 = vld [vmem:[#allocation6 + $0x560] ss:$16 sps:$4 sm:$0xff]   ;;  %v9073_v37 = vld [vmem:[#allocation6 + $0x568] ss:$16 sps:$4 sm:$0xff]  }
 0x374   : > { %6331 = vmatprep.subr.bf16.mxu1 %v8991_v61  ;;  %v9078_v61 = vld [vmem:[#allocation6 + $0x584] ss:$16 sps:$4 sm:$0xff]  }
 0x376   : > { %6160 = vmatpush1.bf16.msra.mxu0 %v8986_v43  ;;  %v9081_v43 = vld [vmem:[#allocation6 + $0x58c] ss:$16 sps:$4 sm:$0xff]  }
 0x377   : > { %6332 = vmatpush1.bf16.msra.mxu1 %v8989_v41  ;;  %6161 = vmatprep.subr.bf16.mxu0 %v8994_v48  ;;  %v9076_v41 = vld [vmem:[#allocation6 + $0x580] ss:$16 sps:$4 sm:$0xff]   ;;  %v9079_v48 = vld [vmem:[#allocation6 + $0x588] ss:$16 sps:$4 sm:$0xff]  }
 0x378   : > { %6333 = vmatprep.subr.bf16.mxu1 %v8997_v15  ;;  %v9084_v15 = vld [vmem:[#allocation6 + $0x5a4] ss:$16 sps:$4 sm:$0xff]  }
 0x37a   : > { %6162 = vmatpush1.bf16.msra.mxu0 %v8992_v38  ;;  %v9087_v38 = vld [vmem:[#allocation6 + $0x5ac] ss:$16 sps:$4 sm:$0xff]  }
 0x37b   : > { %6334 = vmatpush1.bf16.msra.mxu1 %v8995_v49  ;;  %6163 = vmatprep.subr.bf16.mxu0 %v9000_v56  ;;  %v9082_v49 = vld [vmem:[#allocation6 + $0x5a0] ss:$16 sps:$4 sm:$0xff]   ;;  %v9085_v56 = vld [vmem:[#allocation6 + $0x5a8] ss:$16 sps:$4 sm:$0xff]  }
 0x37c   : > { %6335 = vmatprep.subr.bf16.mxu1 %v9003_v27  ;;  %v9090_v27 = vld [vmem:[#allocation6 + $0x5c4] ss:$16 sps:$4 sm:$0xff]  }
 0x37e   : > { %6164 = vmatpush1.bf16.msra.mxu0 %v8998_v47  ;;  %v9093_v47 = vld [vmem:[#allocation6 + $0x5cc] ss:$16 sps:$4 sm:$0xff]  }
 0x37f   : > { %6336 = vmatpush1.bf16.msra.mxu1 %v9001_v59  ;;  %6176 = vmatprep.subr.bf16.mxu0 %v9006_v3  ;;  %v9088_v59 = vld [vmem:[#allocation6 + $0x5c0] ss:$16 sps:$4 sm:$0xff]   ;;  %v9091_v3 = vld [vmem:[#allocation6 + $0x5c8] ss:$16 sps:$4 sm:$0xff]  }
 0x380   : > { %6348 = vmatprep.subr.bf16.mxu1 %v9009_v57  ;;  %v9096_v57 = vld [vmem:[#allocation6 + $0x5e4] ss:$16 sps:$4 sm:$0xff]  }
 0x381   : > { %6166 = vmatmul.mubr.bf16.vlgmr.msra.gmra.mrb[8].mxu0 %v10342_v54 }
 0x382   : > { %6338 = vmatmul.mubr.bf16.vlgmr.msra.gmra.mrb[8].mxu1 %v10342_v54  ;;  %6177 = vmatpush1.bf16.msra.mxu0 %v9004_v63  ;;  %v9025_v54 = vld [vmem:[#allocation6 + $0x468] ss:$16 sps:$4 sm:$0xff]   ;;  %v9099_v63 = vld [vmem:[#allocation6 + $0x5ec] ss:$16 sps:$4 sm:$0xff]  }
 0x383   : > { %6349 = vmatpush1.bf16.msra.mxu1 %v9007_v0  ;;  %6178 = vmatprep.subr.bf16.mxu0 %v9012_v1  ;;  %v9094_v0 = vld [vmem:[#allocation6 + $0x5e0] ss:$16 sps:$4 sm:$0xff]   ;;  %v9097_v1 = vld [vmem:[#allocation6 + $0x5e8] ss:$16 sps:$4 sm:$0xff]  }
 0x384   : > { %6350 = vmatprep.subr.bf16.mxu1 %v9015_v9  ;;  %v9102_v9 = vld [vmem:[#allocation6 + $0x604] ss:$16 sps:$4 sm:$0xff]  }
 0x386   : > { %6179 = vmatpush1.bf16.msra.mxu0 %v9010_v42  ;;  %v9105_v42 = vld [vmem:[#allocation6 + $0x60c] ss:$16 sps:$4 sm:$0xff]  }
 0x387   : > { %6351 = vmatpush1.bf16.msra.mxu1 %v9013_v53  ;;  %6180 = vmatprep.subr.bf16.mxu0 %v9018_v10  ;;  %v1070_v53 = vsub.s32 4, %v10180_v60  ;;  %v1078_v10 = vsub.s32 6, %v10180_v60 }
 0x388   : > { %6352 = vmatprep.subr.bf16.mxu1 %v9021_v11  ;;  %v1074_v11 = vsub.s32 5, %v10180_v60 }
 0x38a   : > { %6181 = vmatpush1.bf16.msra.mxu0 %v9016_v12  ;;  %v1082_v12 = vsub.s32 7, %v10180_v60 }
 0x38b   : > { %6353 = vmatpush1.bf16.msra.mxu1 %v9019_v45  ;;  %6182 = vmatprep.subr.bf16.mxu0 %v9024_v32  ;;  %v9420_v45 = vld [vmem:[#allocation4] sm:$0xff] }
 0x38c   : > { %6354 = vmatprep.subr.bf16.mxu1 %v9027_v44  ;;  %v1071_v32 = vrot.slane %v9420_v45, %v1070_v53  ;;  %v1079_v44 = vrot.slane %v9420_v45, %v1078_v10 }
 0x38e   : > { %6183 = vmatpush1.bf16.msra.mxu0 %v9022_v30  ;;  %v1075_v30 = vrot.slane %v9420_v45, %v1074_v11 }
 0x38f   : > { %6355 = vmatpush1.bf16.msra.mxu1 %v9025_v54  ;;  %6184 = vmatprep.subr.bf16.mxu0 %v9030_v52  ;;  %v1083_v54 = vrot.slane %v9420_v45, %v1082_v12 }
 0x390   : > { %6356 = vmatprep.subr.bf16.mxu1 %v9033_v13 }
 0x392   : > { %6185 = vmatpush1.bf16.msra.mxu0 %v9028_v26 }
 0x393   : > { %6357 = vmatpush1.bf16.msra.mxu1 %v9031_v28  ;;  %6186 = vmatprep.subr.bf16.mxu0 %v9036_v50 }
 0x394   : > { %6358 = vmatprep.subr.bf16.mxu1 %v9039_v14 }
 0x396   : > { %6187 = vmatpush1.bf16.msra.mxu0 %v9034_v34 }
 0x397   : > { %6359 = vmatpush1.bf16.msra.mxu1 %v9037_v35  ;;  %6188 = vmatprep.subr.bf16.mxu0 %v9042_v36 }
 0x398   : > { %6360 = vmatprep.subr.bf16.mxu1 %v9045_v17 }
 0x39a   : > { %6189 = vmatpush1.bf16.msra.mxu0 %v9040_v51 }
 0x39b   : > { %6361 = vmatpush1.bf16.msra.mxu1 %v9043_v39  ;;  %6190 = vmatprep.subr.bf16.mxu0 %v9048_v16 }
 0x39c   : > { %6362 = vmatprep.subr.bf16.mxu1 %v9051_v18 }
 0x39e   : > { %6191 = vmatpush1.bf16.msra.mxu0 %v9046_v40 }
 0x39f   : > { %6363 = vmatpush1.bf16.msra.mxu1 %v9049_v29  ;;  %6192 = vmatprep.subr.bf16.mxu0 %v9054_v19 }
 0x3a0   : > { %6364 = vmatprep.subr.bf16.mxu1 %v9057_v20 }
 0x3a2   : > { %6193 = vmatpush1.bf16.msra.mxu0 %v9052_v21 }
 0x3a3   : > { %6365 = vmatpush1.bf16.msra.mxu1 %v9055_v22  ;;  %6194 = vmatprep.subr.bf16.mxu0 %v9060_v23 }
 0x3a4   : > { %6366 = vmatprep.subr.bf16.mxu1 %v9063_v24 }
 0x3a6   : > { %6195 = vmatpush1.bf16.msra.mxu0 %v9058_v25 }
 0x3a7   : > { %6367 = vmatpush1.bf16.msra.mxu1 %v9061_v62  ;;  %6196 = vmatprep.subr.bf16.mxu0 %v9066_v46 }
 0x3a8   : > { %6368 = vmatprep.subr.bf16.mxu1 %v9069_v7 }
 0x3aa   : > { %6197 = vmatpush1.bf16.msra.mxu0 %v9064_v31 }
 0x3ab   : > { %6369 = vmatpush1.bf16.msra.mxu1 %v9067_v33  ;;  %6198 = vmatprep.subr.bf16.mxu0 %v9072_v55 }
 0x3ac   : > { %6370 = vmatprep.subr.bf16.mxu1 %v9075_v8 }
 0x3ae   : > { %6199 = vmatpush1.bf16.msra.mxu0 %v9070_v58 }
 0x3af   : > { %6371 = vmatpush1.bf16.msra.mxu1 %v9073_v37  ;;  %6200 = vmatprep.subr.bf16.mxu0 %v9078_v61 }
 0x3b0   : > { %6372 = vmatprep.subr.bf16.mxu1 %v9081_v43 }
 0x3b2   : > { %6201 = vmatpush1.bf16.msra.mxu0 %v9076_v41 }
 0x3b3   : > { %6373 = vmatpush1.bf16.msra.mxu1 %v9079_v48  ;;  %6202 = vmatprep.subr.bf16.mxu0 %v9084_v15 }
 0x3b4   : > { %6374 = vmatprep.subr.bf16.mxu1 %v9087_v38 }
 0x3b6   : > { %6203 = vmatpush1.bf16.msra.mxu0 %v9082_v49 }
 0x3b7   : > { %6375 = vmatpush1.bf16.msra.mxu1 %v9085_v56  ;;  %6204 = vmatprep.subr.bf16.mxu0 %v9090_v27 }
 0x3b8   : > { %6376 = vmatprep.subr.bf16.mxu1 %v9093_v47 }
 0x3ba   : > { %6205 = vmatpush1.bf16.msra.mxu0 %v9088_v59 }
 0x3bb   : > { %6377 = vmatpush1.bf16.msra.mxu1 %v9091_v3  ;;  %6206 = vmatprep.subr.bf16.mxu0 %v9096_v57 }
 0x3bc   : > { %6378 = vmatprep.subr.bf16.mxu1 %v9099_v63 }
 0x3be   : > { %6207 = vmatpush1.bf16.msra.mxu0 %v9094_v0 }
 0x3bf   : > { %6379 = vmatpush1.bf16.msra.mxu1 %v9097_v1  ;;  %6219 = vmatprep.subr.bf16.mxu0 %v9102_v9 }
 0x3c0   : > { %6391 = vmatprep.subr.bf16.mxu1 %v9105_v42 }
 0x3d4   : > { %v4199_v52 = vpop.f32.mrb[4].mxu0 }
 0x3d5   : > { %v10358_v13 = vadd.f32 %v4199_v52, %v1071_v32  ;;  %v4371_v26 = vpop.f32.mrb[4].mxu1  ;;  %v4201_v28 = vpop.f32.mrb[5].mxu0 }
 0x3d6   : > { %v10360_v50 = vadd.f32 %v4371_v26, %v1079_v44  ;;  %v10362_v14 = vadd.f32 %v4201_v28, %v1075_v30  ;;  %v4373_v34 = vpop.f32.mrb[5].mxu1  ;;  %v4203_v35 = vpop.f32.mrb[6].mxu0 }
 0x3d7   : > { %v4384_v36 = vmul.f32 %v10358_v13, %v10358_v13  ;;  %v10366_v17 = vadd.f32 %v4373_v34, %v1083_v54  ;;  %v10368_v51 = vadd.f32 %v4203_v35, %v1071_v32  ;;  %v4375_v39 = vpop.f32.mrb[6].mxu1  ;;  %v4205_v16 = vpop.f32.mrb[7].mxu0 }
 0x3d8   : > { %v4386_v18 = vmul.f32 %v10360_v50, %v10360_v50  ;;  %v4385_v40 = vmul.f32 %v10362_v14, %v10362_v14  ;;  %v10374_v29 = vadd.f32 %v4375_v39, %v1079_v44  ;;  %v10376_v19 = vadd.f32 %v4205_v16, %v1075_v30  ;;  %v4377_v20 = vpop.f32.mrb[7].mxu1 }
 0x3d9   : > { %v4400_v21 = vmul.f32 %v10358_v13, %v4384_v36  ;;  %v4387_v22 = vmul.f32 %v10366_v17, %v10366_v17  ;;  %v4392_v23 = vmul.f32 %v10368_v51, %v10368_v51  ;;  %v10383_v24 = vadd.f32 %v4377_v20, %v1083_v54 }
 0x3da   : > { %v4402_v25 = vmul.f32 %v10360_v50, %v4386_v18  ;;  %v4401_v62 = vmul.f32 %v10362_v14, %v4385_v40  ;;  %v4394_v46 = vmul.f32 %v10374_v29, %v10374_v29  ;;  %v4393_v7 = vmul.f32 %v10376_v19, %v10376_v19 }
 0x3db   : > { %v4416_v31 = vmul.f32 0.044715, %v4400_v21  ;;  %v4403_v33 = vmul.f32 %v10366_v17, %v4387_v22  ;;  %v4408_v55 = vmul.f32 %v10368_v51, %v4392_v23  ;;  %v4395_v8 = vmul.f32 %v10383_v24, %v10383_v24 }
 0x3dc   : > { %v4418_v58 = vmul.f32 0.044715, %v4402_v25  ;;  %v4417_v37 = vmul.f32 0.044715, %v4401_v62  ;;  %v4410_v61 = vmul.f32 %v10374_v29, %v4394_v46  ;;  %v4409_v43 = vmul.f32 %v10376_v19, %v4393_v7 }
 0x3dd   : > { %v4432_v41 = vadd.f32 %v10358_v13, %v4416_v31  ;;  %v4419_v48 = vmul.f32 0.044715, %v4403_v33  ;;  %v4424_v15 = vmul.f32 0.044715, %v4408_v55  ;;  %v4411_v38 = vmul.f32 %v10383_v24, %v4395_v8 }
 0x3de   : > { %v4434_v49 = vadd.f32 %v10360_v50, %v4418_v58  ;;  %v4433_v56 = vadd.f32 %v10362_v14, %v4417_v37  ;;  %v4426_v27 = vmul.f32 0.044715, %v4410_v61  ;;  %v4425_v47 = vmul.f32 0.044715, %v4409_v43 }
 0x3df   : > { %v4448_v59 = vmul.f32 0.7978846, %v4432_v41  ;;  %v4435_v3 = vadd.f32 %v10366_v17, %v4419_v48  ;;  %v4440_v57 = vadd.f32 %v10368_v51, %v4424_v15  ;;  %v4427_v63 = vmul.f32 0.044715, %v4411_v38 }
 0x3e0   : > { %v4450_v0 = vmul.f32 0.7978846, %v4434_v49  ;;  %v4449_v1 = vmul.f32 0.7978846, %v4433_v56  ;;  %v4442_v9 = vadd.f32 %v10374_v29, %v4426_v27  ;;  %v4441_v42 = vadd.f32 %v10376_v19, %v4425_v47  ;;  %v9100_v56 = vld [vmem:[#allocation6 + $0x600] ss:$16 sps:$4 sm:$0xff]  }
 0x3e1   : > { %9372 = vtanh.f32 %v4448_v59  ;;  %v4451_v53 = vmul.f32 0.7978846, %v4435_v3  ;;  %v4456_v10 = vmul.f32 0.7978846, %v4440_v57  ;;  %v4443_v11 = vadd.f32 %v10383_v24, %v4427_v63  ;;  %v9112_v47 = vld [vmem:[#allocation6 + $0x640] ss:$16 sps:$4 sm:$0xff]  }
 0x3e2   : > { %9374 = vtanh.f32 %v4450_v0  ;;  %v4458_v12 = vmul.f32 0.7978846, %v4442_v9  ;;  %v4457_v45 = vmul.f32 0.7978846, %v4441_v42  ;;  %v9115_v59 = vld [vmem:[#allocation6 + $0x648] ss:$16 sps:$4 sm:$0xff]  }
 0x3e3   : > { %9376 = vtanh.f32 %v4449_v1  ;;  %v4459_v32 = vmul.f32 0.7978846, %v4443_v11  ;;  %v9120_v3 = vld [vmem:[#allocation6 + $0x664] ss:$16 sps:$4 sm:$0xff]   ;;  %v9123_v57 = vld [vmem:[#allocation6 + $0x66c] ss:$16 sps:$4 sm:$0xff]  }
 0x3e4   : > { %9378 = vtanh.f32 %v4451_v53  ;;  %v9118_v63 = vld [vmem:[#allocation6 + $0x660] ss:$16 sps:$4 sm:$0xff]   ;;  %v9121_v0 = vld [vmem:[#allocation6 + $0x668] ss:$16 sps:$4 sm:$0xff]   ;;  %v9126_v1 = vld [vmem:[#allocation6 + $0x684] ss:$16 sps:$4 sm:$0xff]  }
 0x3e5   : > { %9380 = vtanh.f32 %v4456_v10  ;;  %v9129_v9 = vld [vmem:[#allocation6 + $0x68c] ss:$16 sps:$4 sm:$0xff]   ;;  %v9124_v42 = vld [vmem:[#allocation6 + $0x680] ss:$16 sps:$4 sm:$0xff]   ;;  %v9127_v53 = vld [vmem:[#allocation6 + $0x688] ss:$16 sps:$4 sm:$0xff]  }
 0x3e6   : > { %9382 = vtanh.f32 %v4458_v12  ;;  %v9132_v10 = vld [vmem:[#allocation6 + $0x6a4] ss:$16 sps:$4 sm:$0xff]   ;;  %v9135_v11 = vld [vmem:[#allocation6 + $0x6ac] ss:$16 sps:$4 sm:$0xff]   ;;  %v9130_v12 = vld [vmem:[#allocation6 + $0x6a0] ss:$16 sps:$4 sm:$0xff]  }
 0x3e7   : > { %9384 = vtanh.f32 %v4457_v45  ;;  %v9133_v45 = vld [vmem:[#allocation6 + $0x6a8] ss:$16 sps:$4 sm:$0xff]  }
 0x3e8   : > { %9386 = vtanh.f32 %v4459_v32  ;;  %v9138_v32 = vld [vmem:[#allocation6 + $0x6c4] ss:$16 sps:$4 sm:$0xff]  }
 0x3eb   : > { %v9373_v44 = vpop.eup %9372 }
 0x3ec   : > { %v9375_v30 = vpop.eup %9374  ;;  %v4480_v54 = vadd.f32 1.0, %v9373_v44  ;;  %v9141_v44 = vld [vmem:[#allocation6 + $0x6cc] ss:$16 sps:$4 sm:$0xff]  }
 0x3ed   : > { %v9377_v52 = vpop.eup %9376  ;;  %v4482_v26 = vadd.f32 1.0, %v9375_v30  ;;  %v9136_v30 = vld [vmem:[#allocation6 + $0x6c0] ss:$16 sps:$4 sm:$0xff]  }
 0x3ee   : > { %v9379_v28 = vpop.eup %9378  ;;  %v4481_v34 = vadd.f32 1.0, %v9377_v52  ;;  %v4496_v16 = vmul.f32 0.5, %v4480_v54  ;;  %v9139_v54 = vld [vmem:[#allocation6 + $0x6c8] ss:$16 sps:$4 sm:$0xff]   ;;  %v9144_v52 = vld [vmem:[#allocation6 + $0x6e4] ss:$16 sps:$4 sm:$0xff]  }
 0x3ef   : > { %v9381_v35 = vpop.eup %9380  ;;  %v4483_v36 = vadd.f32 1.0, %v9379_v28  ;;  %v4498_v20 = vmul.f32 0.5, %v4482_v26  ;;  %v9147_v26 = vld [vmem:[#allocation6 + $0x6ec] ss:$16 sps:$4 sm:$0xff]   ;;  %v9142_v28 = vld [vmem:[#allocation6 + $0x6e0] ss:$16 sps:$4 sm:$0xff]  }
 0x3f0   : > { %v9383_v39 = vpop.eup %9382  ;;  %v4488_v18 = vadd.f32 1.0, %v9381_v35  ;;  %v4497_v62 = vmul.f32 0.5, %v4481_v34  ;;  %v4512_v33 = vmul.f32 %v10358_v13, %v4496_v16  ;;  %v9145_v34 = vld [vmem:[#allocation6 + $0x6e8] ss:$16 sps:$4 sm:$0xff]   ;;  %v9150_v35 = vld [vmem:[#allocation6 + $0x704] ss:$16 sps:$4 sm:$0xff]  }
 0x3f1   : > { %v9385_v40 = vpop.eup %9384  ;;  %v4490_v21 = vadd.f32 1.0, %v9383_v39  ;;  %v4499_v31 = vmul.f32 0.5, %v4483_v36  ;;  %v4514_v58 = vmul.f32 %v10360_v50, %v4498_v20  ;;  %v9108_v50 = vld [vmem:[#allocation6 + $0x624] ss:$16 sps:$4 sm:$0xff]   ;;  %v9153_v36 = vld [vmem:[#allocation6 + $0x70c] ss:$16 sps:$4 sm:$0xff]  }
 0x3f2   : > { %v9387_v22 = vpop.eup %9386  ;;  %v4504_v23 = vmul.f32 0.5, %v4488_v18  ;;  %v4489_v25 = vadd.f32 1.0, %v9385_v40  ;;  %v4513_v43 = vmul.f32 %v10362_v14, %v4497_v62  ;;  %v9106_v14 = vld [vmem:[#allocation6 + $0x620] ss:$16 sps:$4 sm:$0xff]   ;;  %v9151_v16 = vld [vmem:[#allocation6 + $0x708] ss:$16 sps:$4 sm:$0xff]  }
 0x3f3   : > { %v4506_v46 = vmul.f32 0.5, %v4490_v21  ;;  %v4491_v7 = vadd.f32 1.0, %v9387_v22  ;;  %v4515_v15 = vmul.f32 %v10366_v17, %v4499_v31  ;;  %v9114_v17 = vld [vmem:[#allocation6 + $0x644] ss:$16 sps:$4 sm:$0xff]   ;;  %v9148_v39 = vld [vmem:[#allocation6 + $0x700] ss:$16 sps:$4 sm:$0xff]  }
 0x3f4   : > { %v4520_v55 = vmul.f32 %v10368_v51, %v4504_v23  ;;  %v4505_v8 = vmul.f32 0.5, %v4489_v25  ;;  %v9103_v51 = vld [vmem:[#allocation6 + $0x608] ss:$16 sps:$4 sm:$0xff]   ;;  %v9156_v18 = vld [vmem:[#allocation6 + $0x724] ss:$16 sps:$4 sm:$0xff]  }
 0x3f5   : > { %v4522_v37 = vmul.f32 %v10374_v29, %v4506_v46  ;;  %v4507_v61 = vmul.f32 0.5, %v4491_v7  ;;  %v9111_v29 = vld [vmem:[#allocation6 + $0x62c] ss:$16 sps:$4 sm:$0xff]   ;;  %v9154_v20 = vld [vmem:[#allocation6 + $0x720] ss:$16 sps:$4 sm:$0xff]  }
 0x3f6   : > { %v4521_v41 = vmul.f32 %v10376_v19, %v4505_v8  ;;  %v4528_v48 = vpack.c.bf16 %v4520_v55, %v4512_v33  ;;  %v9109_v19 = vld [vmem:[#allocation6 + $0x628] ss:$16 sps:$4 sm:$0xff]   ;;  %v9159_v40 = vld [vmem:[#allocation6 + $0x72c] ss:$16 sps:$4 sm:$0xff]   ;;  %v9162_v22 = vld [vmem:[#allocation6 + $0x744] ss:$16 sps:$4 sm:$0xff]  }
 0x3f7   : > { %v4523_v38 = vmul.f32 %v10383_v24, %v4507_v61  ;;  %v10414_v49 = vpack.c.bf16 %v4522_v37, %v4514_v58  ;;  %v9117_v24 = vld [vmem:[#allocation6 + $0x64c] ss:$16 sps:$4 sm:$0xff]   ;;  %v9157_v21 = vld [vmem:[#allocation6 + $0x728] ss:$16 sps:$4 sm:$0xff]   ;;  %v9160_v25 = vld [vmem:[#allocation6 + $0x740] ss:$16 sps:$4 sm:$0xff]  }
 0x3f8   : > { %v4529_v13 = vpack.c.bf16 %v4521_v41, %v4513_v43  ;;  %v9165_v23 = vld [vmem:[#allocation6 + $0x74c] ss:$16 sps:$4 sm:$0xff]   ;;  %v9163_v62 = vld [vmem:[#allocation6 + $0x748] ss:$16 sps:$4 sm:$0xff]   ;;  %v9168_v46 = vld [vmem:[#allocation6 + $0x764] ss:$16 sps:$4 sm:$0xff]  }
 0x3f9   : > { %v4531_v27 = vpack.c.bf16 %v4523_v38, %v4515_v15  ;;  %v9171_v7 = vld [vmem:[#allocation6 + $0x76c] ss:$16 sps:$4 sm:$0xff]   ;;  %v9166_v31 = vld [vmem:[#allocation6 + $0x760] ss:$16 sps:$4 sm:$0xff]   ;;  %v9169_v33 = vld [vmem:[#allocation6 + $0x768] ss:$16 sps:$4 sm:$0xff]  }
 0x3fa   : > { %6208 = vmatprep.mubr.bf16.mxu0 %v4529_v13  ;;  %6380 = vmatprep.mubr.bf16.mxu1 %v4529_v13  ;;  %v9174_v55 = vld [vmem:[#allocation6 + $0x784] ss:$16 sps:$4 sm:$0xff]   ;;  %v9177_v8 = vld [vmem:[#allocation6 + $0x78c] ss:$16 sps:$4 sm:$0xff]   ;;  %v9172_v58 = vld [vmem:[#allocation6 + $0x780] ss:$16 sps:$4 sm:$0xff]  }
 0x3fb   : > { %6209 = vmatmul.mubr.bf16.vlgmr.msra.gmra.mrb[8].mxu0 %v4528_v48  ;;  %6381 = vmatmul.mubr.bf16.vlgmr.msra.gmra.mrb[8].mxu1 %v4528_v48  ;;  %v9175_v37 = vld [vmem:[#allocation6 + $0x788] ss:$16 sps:$4 sm:$0xff]   ;;  %v9180_v61 = vld [vmem:[#allocation6 + $0x7a4] ss:$16 sps:$4 sm:$0xff]   ;;  %v9183_v43 = vld [vmem:[#allocation6 + $0x7ac] ss:$16 sps:$4 sm:$0xff]  }
 0x3fc   : > { %6220 = vmatpush1.bf16.msra.mxu0 %v9100_v56  ;;  %6392 = vmatpush1.bf16.msra.mxu1 %v9103_v51  ;;  %v9178_v41 = vld [vmem:[#allocation6 + $0x7a0] ss:$16 sps:$4 sm:$0xff]   ;;  %v9181_v48 = vld [vmem:[#allocation6 + $0x7a8] ss:$16 sps:$4 sm:$0xff]   ;;  %v9186_v15 = vld [vmem:[#allocation6 + $0x7c4] ss:$16 sps:$4 sm:$0xff]  }
 0x3fd   : > { %6251 = vmatprep.mubr.bf16.mxu0 %v4531_v27  ;;  %6423 = vmatprep.mubr.bf16.mxu1 %v4531_v27  ;;  %v9189_v38 = vld [vmem:[#allocation6 + $0x7cc] ss:$16 sps:$4 sm:$0xff]   ;;  %v9184_v13 = vld [vmem:[#allocation6 + $0x7c0] ss:$16 sps:$4 sm:$0xff]   ;;  %v9187_v56 = vld [vmem:[#allocation6 + $0x7c8] ss:$16 sps:$4 sm:$0xff]  }
 0x3fe   : > { %6221 = vmatprep.subr.bf16.mxu0 %v9108_v50  ;;  %6393 = vmatprep.subr.bf16.mxu1 %v9111_v29  ;;  %v9192_v51 = vld [vmem:[#allocation6 + $0x7e4] ss:$16 sps:$4 sm:$0xff]   ;;  %v9195_v27 = vld [vmem:[#allocation6 + $0x7ec] ss:$16 sps:$4 sm:$0xff]   ;;  %v9190_v50 = vld [vmem:[#allocation6 + $0x7e0] ss:$16 sps:$4 sm:$0xff]  }
 0x3ff   : > { %v9193_v29 = vld [vmem:[#allocation6 + $0x7e8] ss:$16 sps:$4 sm:$0xff]  }
 0x400   : > { %6222 = vmatpush1.bf16.msra.mxu0 %v9106_v14  ;;  %6394 = vmatpush1.bf16.msra.mxu1 %v9109_v19  ;;  %v9198_v14 = vld [vmem:[#allocation9 + $0x4] ss:$8 sps:$4 sm:$0xff]   ;;  %v9196_v19 = vld [vmem:[#allocation9] ss:$8 sps:$4 sm:$0xff]  }
 0x401   : > { %6223 = vmatprep.subr.bf16.mxu0 %v9114_v17  ;;  %6395 = vmatprep.subr.bf16.mxu1 %v9117_v24  ;;  %v9201_v17 = vld [vmem:[#allocation9 + $0x14] ss:$8 sps:$4 sm:$0xff]   ;;  %v9199_v24 = vld [vmem:[#allocation9 + $0x10] ss:$8 sps:$4 sm:$0xff]  }
 0x404   : > { %6224 = vmatpush1.bf16.msra.mxu0 %v9112_v47  ;;  %6396 = vmatpush1.bf16.msra.mxu1 %v9115_v59  ;;  %v9204_v47 = vld [vmem:[#allocation9 + $0x24] ss:$8 sps:$4 sm:$0xff]   ;;  %v9202_v59 = vld [vmem:[#allocation9 + $0x20] ss:$8 sps:$4 sm:$0xff]  }
 0x405   : > { %6225 = vmatprep.subr.bf16.mxu0 %v9120_v3  ;;  %6397 = vmatprep.subr.bf16.mxu1 %v9123_v57  ;;  %v9207_v3 = vld [vmem:[#allocation9 + $0x34] ss:$8 sps:$4 sm:$0xff]   ;;  %v9205_v57 = vld [vmem:[#allocation9 + $0x30] ss:$8 sps:$4 sm:$0xff]  }
 0x408   : > { %6226 = vmatpush1.bf16.msra.mxu0 %v9118_v63  ;;  %6398 = vmatpush1.bf16.msra.mxu1 %v9121_v0  ;;  %v9210_v63 = vld [vmem:[#allocation9 + $0x44] ss:$8 sps:$4 sm:$0xff]   ;;  %v9208_v0 = vld [vmem:[#allocation9 + $0x40] ss:$8 sps:$4 sm:$0xff]  }
 0x409   : > { %6227 = vmatprep.subr.bf16.mxu0 %v9126_v1  ;;  %6399 = vmatprep.subr.bf16.mxu1 %v9129_v9  ;;  %v9213_v1 = vld [vmem:[#allocation9 + $0x54] ss:$8 sps:$4 sm:$0xff]   ;;  %v9211_v9 = vld [vmem:[#allocation9 + $0x50] ss:$8 sps:$4 sm:$0xff]  }
 0x40c   : > { %6228 = vmatpush1.bf16.msra.mxu0 %v9124_v42  ;;  %6400 = vmatpush1.bf16.msra.mxu1 %v9127_v53  ;;  %v9214_v42 = vld [vmem:[#allocation9 + $0x60] ss:$8 sps:$4 sm:$0xff]   ;;  %v9219_v53 = vld [vmem:[#allocation9 + $0x74] ss:$8 sps:$4 sm:$0xff]  }
 0x40d   : > { %6229 = vmatprep.subr.bf16.mxu0 %v9132_v10  ;;  %6401 = vmatprep.subr.bf16.mxu1 %v9135_v11  ;;  %v9217_v10 = vld [vmem:[#allocation9 + $0x70] ss:$8 sps:$4 sm:$0xff]   ;;  %v9222_v11 = vld [vmem:[#allocation9 + $0x84] ss:$8 sps:$4 sm:$0xff]  }
 0x410   : > { %6230 = vmatpush1.bf16.msra.mxu0 %v9130_v12  ;;  %6402 = vmatpush1.bf16.msra.mxu1 %v9133_v45  ;;  %v9220_v12 = vld [vmem:[#allocation9 + $0x80] ss:$8 sps:$4 sm:$0xff]   ;;  %v9225_v45 = vld [vmem:[#allocation9 + $0x94] ss:$8 sps:$4 sm:$0xff]  }
 0x411   : > { %6231 = vmatprep.subr.bf16.mxu0 %v9138_v32  ;;  %6403 = vmatprep.subr.bf16.mxu1 %v9141_v44  ;;  %v9223_v32 = vld [vmem:[#allocation9 + $0x90] ss:$8 sps:$4 sm:$0xff]   ;;  %v9228_v44 = vld [vmem:[#allocation9 + $0xa4] ss:$8 sps:$4 sm:$0xff]  }
 0x414   : > { %6232 = vmatpush1.bf16.msra.mxu0 %v9136_v30  ;;  %6404 = vmatpush1.bf16.msra.mxu1 %v9139_v54  ;;  %v9226_v30 = vld [vmem:[#allocation9 + $0xa0] ss:$8 sps:$4 sm:$0xff]   ;;  %v9231_v54 = vld [vmem:[#allocation9 + $0xb4] ss:$8 sps:$4 sm:$0xff]  }
 0x415   : > { %6233 = vmatprep.subr.bf16.mxu0 %v9144_v52  ;;  %6405 = vmatprep.subr.bf16.mxu1 %v9147_v26  ;;  %v9229_v52 = vld [vmem:[#allocation9 + $0xb0] ss:$8 sps:$4 sm:$0xff]   ;;  %v9234_v26 = vld [vmem:[#allocation9 + $0xc4] ss:$8 sps:$4 sm:$0xff]  }
 0x418   : > { %6234 = vmatpush1.bf16.msra.mxu0 %v9142_v28  ;;  %6406 = vmatpush1.bf16.msra.mxu1 %v9145_v34  ;;  %v9232_v28 = vld [vmem:[#allocation9 + $0xc0] ss:$8 sps:$4 sm:$0xff]   ;;  %v9237_v34 = vld [vmem:[#allocation9 + $0xd4] ss:$8 sps:$4 sm:$0xff]  }
 0x419   : > { %6235 = vmatprep.subr.bf16.mxu0 %v9150_v35  ;;  %6407 = vmatprep.subr.bf16.mxu1 %v9153_v36  ;;  %v9235_v35 = vld [vmem:[#allocation9 + $0xd0] ss:$8 sps:$4 sm:$0xff]   ;;  %v9240_v36 = vld [vmem:[#allocation9 + $0xe4] ss:$8 sps:$4 sm:$0xff]  }
 0x41c   : > { %6236 = vmatpush1.bf16.msra.mxu0 %v9148_v39  ;;  %6408 = vmatpush1.bf16.msra.mxu1 %v9151_v16  ;;  %v9238_v39 = vld [vmem:[#allocation9 + $0xe0] ss:$8 sps:$4 sm:$0xff]   ;;  %v9241_v16 = vld [vmem:[#allocation9 + $0xf0] ss:$8 sps:$4 sm:$0xff]  }
 0x41d   : > { %6237 = vmatprep.subr.bf16.mxu0 %v9156_v18  ;;  %6409 = vmatprep.subr.bf16.mxu1 %v9159_v40  ;;  %v9243_v18 = vld [vmem:[#allocation9 + $0xf4] ss:$8 sps:$4 sm:$0xff]   ;;  %v9246_v40 = vld [vmem:[#allocation9 + $0x104] ss:$8 sps:$4 sm:$0xff]  }
 0x420   : > { %6238 = vmatpush1.bf16.msra.mxu0 %v9154_v20  ;;  %6410 = vmatpush1.bf16.msra.mxu1 %v9157_v21  ;;  %v9292_v20 = vld [vmem:[#allocation12] ss:$8 sps:$4 sm:$0xff]   ;;  %v9294_v21 = vld [vmem:[#allocation12 + $0x4] ss:$8 sps:$4 sm:$0xff]  }
 0x421   : > { %6239 = vmatprep.subr.bf16.mxu0 %v9162_v22  ;;  %6411 = vmatprep.subr.bf16.mxu1 %v9165_v23  ;;  %v9297_v22 = vld [vmem:[#allocation12 + $0x14] ss:$8 sps:$4 sm:$0xff]   ;;  %v9295_v23 = vld [vmem:[#allocation12 + $0x10] ss:$8 sps:$4 sm:$0xff]  }
 0x424   : > { %6240 = vmatpush1.bf16.msra.mxu0 %v9160_v25  ;;  %6412 = vmatpush1.bf16.msra.mxu1 %v9163_v62  ;;  %v9300_v25 = vld [vmem:[#allocation12 + $0x24] ss:$8 sps:$4 sm:$0xff]   ;;  %v9298_v62 = vld [vmem:[#allocation12 + $0x20] ss:$8 sps:$4 sm:$0xff]  }
 0x425   : > { %6241 = vmatprep.subr.bf16.mxu0 %v9168_v46  ;;  %6413 = vmatprep.subr.bf16.mxu1 %v9171_v7  ;;  %v9303_v46 = vld [vmem:[#allocation12 + $0x34] ss:$8 sps:$4 sm:$0xff]   ;;  %v9301_v7 = vld [vmem:[#allocation12 + $0x30] ss:$8 sps:$4 sm:$0xff]  }
 0x428   : > { %6242 = vmatpush1.bf16.msra.mxu0 %v9166_v31  ;;  %6414 = vmatpush1.bf16.msra.mxu1 %v9169_v33  ;;  %v9306_v31 = vld [vmem:[#allocation12 + $0x44] ss:$8 sps:$4 sm:$0xff]   ;;  %v9304_v33 = vld [vmem:[#allocation12 + $0x40] ss:$8 sps:$4 sm:$0xff]  }
 0x429   : > { %6243 = vmatprep.subr.bf16.mxu0 %v9174_v55  ;;  %6415 = vmatprep.subr.bf16.mxu1 %v9177_v8  ;;  %v9309_v55 = vld [vmem:[#allocation12 + $0x54] ss:$8 sps:$4 sm:$0xff]  }
 0x42a   : > { %v4788_v8 = vld [vmem:[#allocation7] sm:$0xf] }
 0x42c   : > { %6244 = vmatpush1.bf16.msra.mxu0 %v9172_v58  ;;  %6416 = vmatpush1.bf16.msra.mxu1 %v9175_v37  ;;  %v9307_v58 = vld [vmem:[#allocation12 + $0x50] ss:$8 sps:$4 sm:$0xff]   ;;  %v9312_v37 = vld [vmem:[#allocation12 + $0x64] ss:$8 sps:$4 sm:$0xff]  }
 0x42d   : > { %6245 = vmatprep.subr.bf16.mxu0 %v9180_v61  ;;  %6417 = vmatprep.subr.bf16.mxu1 %v9183_v43  ;;  %v4793_v61 = vrot.slane %v4788_v8, %v10185_v2  ;;  %v4801_v43 = vrot.slane %v4788_v8, %v1062_v4 }
 0x430   : > { %6246 = vmatpush1.bf16.msra.mxu0 %v9178_v41  ;;  %6418 = vmatpush1.bf16.msra.mxu1 %v9181_v48  ;;  %v4797_v41 = vrot.slane %v4788_v8, %v10189_v5  ;;  %v4805_v48 = vrot.slane %v4788_v8, %v1066_v6 }
 0x431   : > { %6247 = vmatprep.subr.bf16.mxu0 %v9186_v15  ;;  %6419 = vmatprep.subr.bf16.mxu1 %v9189_v38  ;;  %v9310_v15 = vld [vmem:[#allocation12 + $0x60] ss:$8 sps:$4 sm:$0xff]  }
 0x434   : > { %6248 = vmatpush1.bf16.msra.mxu0 %v9184_v13  ;;  %6420 = vmatpush1.bf16.msra.mxu1 %v9187_v56 }
 0x435   : > { %6249 = vmatprep.subr.bf16.mxu0 %v9192_v51  ;;  %6421 = vmatprep.subr.bf16.mxu1 %v9195_v27 }
 0x438   : > { %6250 = vmatpush1.bf16.msra.mxu0 %v9190_v50  ;;  %6422 = vmatpush1.bf16.msra.mxu1 %v9193_v29 }
 0x439   : > { %6906 = vmatprep.subr.bf16.mxu0 %v9198_v14  ;;  %7234 = vmatprep.subr.bf16.mxu1 %v9294_v21 }
 0x43b   : > { %6252 = vmatmul.mubr.bf16.vlgmr.msra.gmra.mrb[8].mxu0 %v10414_v49  ;;  %6424 = vmatmul.mubr.bf16.vlgmr.msra.gmra.mrb[8].mxu1 %v10414_v49  ;;  %v9216_v49 = vld [vmem:[#allocation9 + $0x64] ss:$8 sps:$4 sm:$0xff]  }
 0x43c   : > { %6907 = vmatpush1.bf16.msra.mxu0 %v9196_v19  ;;  %7235 = vmatpush1.bf16.msra.mxu1 %v9292_v20 }
 0x43d   : > { %6908 = vmatprep.subr.bf16.mxu0 %v9201_v17  ;;  %7236 = vmatprep.subr.bf16.mxu1 %v9297_v22 }
 0x440   : > { %6909 = vmatpush1.bf16.msra.mxu0 %v9199_v24  ;;  %7237 = vmatpush1.bf16.msra.mxu1 %v9295_v23 }
 0x441   : > { %6910 = vmatprep.subr.bf16.mxu0 %v9204_v47  ;;  %7238 = vmatprep.subr.bf16.mxu1 %v9300_v25 }
 0x444   : > { %6911 = vmatpush1.bf16.msra.mxu0 %v9202_v59  ;;  %7239 = vmatpush1.bf16.msra.mxu1 %v9298_v62 }
 0x445   : > { %6912 = vmatprep.subr.bf16.mxu0 %v9207_v3  ;;  %7240 = vmatprep.subr.bf16.mxu1 %v9303_v46 }
 0x448   : > { %6913 = vmatpush1.bf16.msra.mxu0 %v9205_v57  ;;  %7241 = vmatpush1.bf16.msra.mxu1 %v9301_v7 }
 0x449   : > { %6914 = vmatprep.subr.bf16.mxu0 %v9210_v63  ;;  %7242 = vmatprep.subr.bf16.mxu1 %v9306_v31 }
 0x44c   : > { %6915 = vmatpush1.bf16.msra.mxu0 %v9208_v0  ;;  %7243 = vmatpush1.bf16.msra.mxu1 %v9304_v33 }
 0x44d   : > { %6916 = vmatprep.subr.bf16.mxu0 %v9213_v1  ;;  %7244 = vmatprep.subr.bf16.mxu1 %v9309_v55 }
 0x450   : > { %6917 = vmatpush1.bf16.msra.mxu0 %v9211_v9  ;;  %7245 = vmatpush1.bf16.msra.mxu1 %v9307_v58 }
 0x451   : > { %6918 = vmatprep.subr.bf16.mxu0 %v9216_v49  ;;  %7246 = vmatprep.subr.bf16.mxu1 %v9312_v37 }
 0x454   : > { %6919 = vmatpush1.bf16.msra.mxu0 %v9214_v42  ;;  %7247 = vmatpush1.bf16.msra.mxu1 %v9310_v15 }
 0x455   : > { %6920 = vmatprep.subr.bf16.mxu0 %v9219_v53 }
 0x458   : > { %6921 = vmatpush1.bf16.msra.mxu0 %v9217_v10 }
 0x459   : > { %6922 = vmatprep.subr.bf16.mxu0 %v9222_v11 }
 0x45c   : > { %6923 = vmatpush1.bf16.msra.mxu0 %v9220_v12 }
 0x45d   : > { %6924 = vmatprep.subr.bf16.mxu0 %v9225_v45 }
 0x460   : > { %6925 = vmatpush1.bf16.msra.mxu0 %v9223_v32 }
 0x461   : > { %6926 = vmatprep.subr.bf16.mxu0 %v9228_v44 }
 0x464   : > { %6927 = vmatpush1.bf16.msra.mxu0 %v9226_v30 }
 0x465   : > { %6928 = vmatprep.subr.bf16.mxu0 %v9231_v54 }
 0x468   : > { %6929 = vmatpush1.bf16.msra.mxu0 %v9229_v52 }
 0x469   : > { %6930 = vmatprep.subr.bf16.mxu0 %v9234_v26 }
 0x46c   : > { %6931 = vmatpush1.bf16.msra.mxu0 %v9232_v28 }
 0x46d   : > { %6932 = vmatprep.subr.bf16.mxu0 %v9237_v34 }
 0x470   : > { %6933 = vmatpush1.bf16.msra.mxu0 %v9235_v35 }
 0x471   : > { %6934 = vmatprep.subr.bf16.mxu0 %v9240_v36 }
 0x474   : > { %6935 = vmatpush1.bf16.msra.mxu0 %v9238_v39 }
 0x475   : > { %6936 = vmatprep.subr.bf16.mxu0 %v9243_v18 }
 0x478   : > { %6937 = vmatpush1.bf16.msra.mxu0 %v9241_v16 }
 0x479   : > { %6949 = vmatprep.subr.bf16.mxu0 %v9246_v40 }
 0x50e   : > { %v6253_v38 = vpop.f32.mrb[8].mxu0  ;;  %v6425_v13 = vpop.f32.mrb[8].mxu1 }
 0x50f   : > { %v10424_v56 = vadd.f32 %v6253_v38, %v4793_v61  ;;  %v10426_v51 = vadd.f32 %v6425_v13, %v4801_v43  ;;  %v6255_v27 = vpop.f32.mrb[9].mxu0  ;;  %v6427_v50 = vpop.f32.mrb[9].mxu1 }
 0x510   : > { %v10428_v29 = vadd.f32 %v6255_v27, %v4797_v41  ;;  %v10430_v14 = vadd.f32 %v6427_v50, %v4805_v48  ;;  %v6257_v4 = vpop.f32.mrb[10].mxu0  ;;  %v6429_v19 = vpop.f32.mrb[10].mxu1 }
 0x511   : > { %v6434_v60 = vmul.f32 %v10424_v56, %v10424_v56  ;;  %v6436_v6 = vmul.f32 %v10426_v51, %v10426_v51  ;;  %v10436_v17 = vadd.f32 %v6257_v4, %v4793_v61  ;;  %v10438_v24 = vadd.f32 %v6429_v19, %v4801_v43  ;;  %v6259_v47 = vpop.f32.mrb[11].mxu0  ;;  %v6431_v59 = vpop.f32.mrb[11].mxu1 }
 0x512   : > { %v6435_v3 = vmul.f32 %v10428_v29, %v10428_v29  ;;  %v6437_v57 = vmul.f32 %v10430_v14, %v10430_v14  ;;  %v10444_v63 = vadd.f32 %v6259_v47, %v4797_v41  ;;  %v10446_v0 = vadd.f32 %v6431_v59, %v4805_v48 }
 0x513   : > { %v6442_v1 = vmul.f32 %v10424_v56, %v6434_v60  ;;  %v6444_v9 = vmul.f32 %v10426_v51, %v6436_v6  ;;  %v6438_v49 = vmul.f32 %v10436_v17, %v10436_v17  ;;  %v6440_v42 = vmul.f32 %v10438_v24, %v10438_v24 }
 0x514   : > { %v6443_v53 = vmul.f32 %v10428_v29, %v6435_v3  ;;  %v6445_v10 = vmul.f32 %v10430_v14, %v6437_v57  ;;  %v6439_v11 = vmul.f32 %v10444_v63, %v10444_v63  ;;  %v6441_v12 = vmul.f32 %v10446_v0, %v10446_v0 }
 0x515   : > { %v6450_v45 = vmul.f32 0.044715, %v6442_v1  ;;  %v6452_v32 = vmul.f32 0.044715, %v6444_v9  ;;  %v6446_v44 = vmul.f32 %v10436_v17, %v6438_v49  ;;  %v6448_v30 = vmul.f32 %v10438_v24, %v6440_v42 }
 0x516   : > { %v6451_v54 = vmul.f32 0.044715, %v6443_v53  ;;  %v6453_v52 = vmul.f32 0.044715, %v6445_v10  ;;  %v6447_v26 = vmul.f32 %v10444_v63, %v6439_v11  ;;  %v6449_v28 = vmul.f32 %v10446_v0, %v6441_v12 }
 0x517   : > { %v6458_v34 = vadd.f32 %v10424_v56, %v6450_v45  ;;  %v6460_v35 = vadd.f32 %v10426_v51, %v6452_v32  ;;  %v6454_v36 = vmul.f32 0.044715, %v6446_v44  ;;  %v6456_v39 = vmul.f32 0.044715, %v6448_v30 }
 0x518   : > { %v6459_v16 = vadd.f32 %v10428_v29, %v6451_v54  ;;  %v6461_v18 = vadd.f32 %v10430_v14, %v6453_v52  ;;  %v6455_v40 = vmul.f32 0.044715, %v6447_v26  ;;  %v6457_v20 = vmul.f32 0.044715, %v6449_v28  ;;  %v9244_v28 = vld [vmem:[#allocation9 + $0x100] ss:$8 sps:$4 sm:$0xff]  }
 0x519   : > { %v6466_v21 = vmul.f32 0.7978846, %v6458_v34  ;;  %v6468_v22 = vmul.f32 0.7978846, %v6460_v35  ;;  %v6462_v23 = vadd.f32 %v10436_v17, %v6454_v36  ;;  %v6464_v25 = vadd.f32 %v10438_v24, %v6456_v39  ;;  %v9249_v34 = vld [vmem:[#allocation9 + $0x114] ss:$8 sps:$4 sm:$0xff]  }
 0x51a   : > { %v6467_v62 = vmul.f32 0.7978846, %v6459_v16  ;;  %v6469_v46 = vmul.f32 0.7978846, %v6461_v18  ;;  %v6463_v7 = vadd.f32 %v10444_v63, %v6455_v40  ;;  %v6465_v31 = vadd.f32 %v10446_v0, %v6457_v20  ;;  %v9258_v35 = vld [vmem:[#allocation9 + $0x144] ss:$8 sps:$4 sm:$0xff]  }
 0x51b   : > { %9388 = vtanh.f32 %v6466_v21  ;;  %v6470_v33 = vmul.f32 0.7978846, %v6462_v23  ;;  %v6472_v55 = vmul.f32 0.7978846, %v6464_v25  ;;  %v9256_v36 = vld [vmem:[#allocation9 + $0x140] ss:$8 sps:$4 sm:$0xff]  }
 0x51c   : > { %9390 = vtanh.f32 %v6468_v22  ;;  %v6471_v8 = vmul.f32 0.7978846, %v6463_v7  ;;  %v6473_v58 = vmul.f32 0.7978846, %v6465_v31  ;;  %v9261_v39 = vld [vmem:[#allocation9 + $0x154] ss:$8 sps:$4 sm:$0xff]  }
 0x51d   : > { %9392 = vtanh.f32 %v6467_v62  ;;  %v9259_v16 = vld [vmem:[#allocation9 + $0x150] ss:$8 sps:$4 sm:$0xff]   ;;  %v9264_v18 = vld [vmem:[#allocation9 + $0x164] ss:$8 sps:$4 sm:$0xff]   ;;  %v9262_v40 = vld [vmem:[#allocation9 + $0x160] ss:$8 sps:$4 sm:$0xff]  }
 0x51e   : > { %9394 = vtanh.f32 %v6469_v46  ;;  %v9267_v20 = vld [vmem:[#allocation9 + $0x174] ss:$8 sps:$4 sm:$0xff]   ;;  %v9265_v21 = vld [vmem:[#allocation9 + $0x170] ss:$8 sps:$4 sm:$0xff]   ;;  %v9270_v22 = vld [vmem:[#allocation9 + $0x184] ss:$8 sps:$4 sm:$0xff]  }
 0x51f   : > { %9396 = vtanh.f32 %v6470_v33  ;;  %v9268_v23 = vld [vmem:[#allocation9 + $0x180] ss:$8 sps:$4 sm:$0xff]   ;;  %v9273_v25 = vld [vmem:[#allocation9 + $0x194] ss:$8 sps:$4 sm:$0xff]   ;;  %v9271_v62 = vld [vmem:[#allocation9 + $0x190] ss:$8 sps:$4 sm:$0xff]  }
 0x520   : > { %9398 = vtanh.f32 %v6472_v55  ;;  %v9276_v46 = vld [vmem:[#allocation9 + $0x1a4] ss:$8 sps:$4 sm:$0xff]   ;;  %v9274_v7 = vld [vmem:[#allocation9 + $0x1a0] ss:$8 sps:$4 sm:$0xff]   ;;  %v9279_v31 = vld [vmem:[#allocation9 + $0x1b4] ss:$8 sps:$4 sm:$0xff]  }
 0x521   : > { %9400 = vtanh.f32 %v6471_v8  ;;  %v9277_v33 = vld [vmem:[#allocation9 + $0x1b0] ss:$8 sps:$4 sm:$0xff]   ;;  %v9282_v55 = vld [vmem:[#allocation9 + $0x1c4] ss:$8 sps:$4 sm:$0xff]   ;;  %v9280_v8 = vld [vmem:[#allocation9 + $0x1c0] ss:$8 sps:$4 sm:$0xff]  }
 0x522   : > { %9402 = vtanh.f32 %v6473_v58  ;;  %v9285_v58 = vld [vmem:[#allocation9 + $0x1d4] ss:$8 sps:$4 sm:$0xff]  }
 0x525   : > { %v9389_v37 = vpop.eup %9388 }
 0x526   : > { %v9391_v61 = vpop.eup %9390  ;;  %v6482_v43 = vadd.f32 1.0, %v9389_v37  ;;  %v9283_v37 = vld [vmem:[#allocation9 + $0x1d0] ss:$8 sps:$4 sm:$0xff]  }
 0x527   : > { %v9393_v41 = vpop.eup %9392  ;;  %v6484_v48 = vadd.f32 1.0, %v9391_v61  ;;  %v9288_v61 = vld [vmem:[#allocation9 + $0x1e4] ss:$8 sps:$4 sm:$0xff]  }
 0x528   : > { %v9395_v15 = vpop.eup %9394  ;;  %v6483_v38 = vadd.f32 1.0, %v9393_v41  ;;  %v6490_v4 = vmul.f32 0.5, %v6482_v43  ;;  %v9286_v43 = vld [vmem:[#allocation9 + $0x1e0] ss:$8 sps:$4 sm:$0xff]   ;;  %v9291_v41 = vld [vmem:[#allocation9 + $0x1f4] ss:$8 sps:$4 sm:$0xff]  }
 0x529   : > { %v9397_v13 = vpop.eup %9396  ;;  %v6485_v27 = vadd.f32 1.0, %v9395_v15  ;;  %v6492_v6 = vmul.f32 0.5, %v6484_v48  ;;  %v9289_v48 = vld [vmem:[#allocation9 + $0x1f0] ss:$8 sps:$4 sm:$0xff]  }
 0x52a   : > { %v9399_v50 = vpop.eup %9398  ;;  %v6486_v19 = vadd.f32 1.0, %v9397_v13  ;;  %v6491_v1 = vmul.f32 0.5, %v6483_v38  ;;  %v6498_v53 = vmul.f32 %v10424_v56, %v6490_v4  ;;  %v9315_v15 = vld [vmem:[#allocation12 + $0x74] ss:$8 sps:$4 sm:$0xff]   ;;  %v9313_v38 = vld [vmem:[#allocation12 + $0x70] ss:$8 sps:$4 sm:$0xff]  }
 0x52b   : > { %v9401_v60 = vpop.eup %9400  ;;  %v6488_v47 = vadd.f32 1.0, %v9399_v50  ;;  %v6493_v42 = vmul.f32 0.5, %v6485_v27  ;;  %v10475_v12 = vmul.f32 %v10426_v51, %v6492_v6  ;;  %7248 = vmatprep.subr.bf16.mxu1 %v9315_v15  ;;  %v9318_v13 = vld [vmem:[#allocation12 + $0x84] ss:$8 sps:$4 sm:$0xff]   ;;  %v9316_v27 = vld [vmem:[#allocation12 + $0x80] ss:$8 sps:$4 sm:$0xff]  }
 0x52c   : > { %v9403_v59 = vpop.eup %9402  ;;  %v6494_v3 = vmul.f32 0.5, %v6486_v19  ;;  %v6487_v57 = vadd.f32 1.0, %v9401_v60  ;;  %v6499_v44 = vmul.f32 %v10428_v29, %v6491_v1  ;;  %v9252_v29 = vld [vmem:[#allocation9 + $0x124] ss:$8 sps:$4 sm:$0xff]   ;;  %7249 = vmatpush1.bf16.msra.mxu1 %v9313_v38  ;;  %v9321_v50 = vld [vmem:[#allocation12 + $0x94] ss:$8 sps:$4 sm:$0xff]  }
 0x52d   : > { %v6496_v9 = vmul.f32 0.5, %v6488_v47  ;;  %v6489_v49 = vadd.f32 1.0, %v9403_v59  ;;  %v6501_v52 = vmul.f32 %v10430_v14, %v6493_v42  ;;  %v9255_v14 = vld [vmem:[#allocation9 + $0x134] ss:$8 sps:$4 sm:$0xff]   ;;  %7250 = vmatprep.subr.bf16.mxu1 %v9318_v13  ;;  %v9324_v19 = vld [vmem:[#allocation12 + $0xa4] ss:$8 sps:$4 sm:$0xff]  }
 0x52e   : > { %v6502_v10 = vmul.f32 %v10436_v17, %v6494_v3  ;;  %v6495_v11 = vmul.f32 0.5, %v6487_v57  ;;  %v9319_v4 = vld [vmem:[#allocation12 + $0x90] ss:$8 sps:$4 sm:$0xff]   ;;  %v9322_v60 = vld [vmem:[#allocation12 + $0xa0] ss:$8 sps:$4 sm:$0xff]  }
 0x52f   : > { %v10478_v45 = vmul.f32 %v10438_v24, %v6496_v9  ;;  %v6497_v32 = vmul.f32 0.5, %v6489_v49  ;;  %v9247_v24 = vld [vmem:[#allocation9 + $0x110] ss:$8 sps:$4 sm:$0xff]   ;;  %v9328_v3 = vld [vmem:[#allocation12 + $0xc0] ss:$8 sps:$4 sm:$0xff]  }
 0x530   : > { %v6503_v30 = vmul.f32 %v10444_v63, %v6495_v11  ;;  %v6506_v54 = vpack.c.bf16 %v6502_v10, %v6498_v53  ;;  %v9250_v63 = vld [vmem:[#allocation9 + $0x120] ss:$8 sps:$4 sm:$0xff]   ;;  %7251 = vmatpush1.bf16.msra.mxu1 %v9316_v27  ;;  %v9325_v47 = vld [vmem:[#allocation12 + $0xb0] ss:$8 sps:$4 sm:$0xff]  }
 0x531   : > { %v6505_v26 = vmul.f32 %v10446_v0, %v6497_v32  ;;  %v6508_v56 = vpack.c.bf16 %v10478_v45, %v10475_v12  ;;  %v9253_v0 = vld [vmem:[#allocation9 + $0x130] ss:$8 sps:$4 sm:$0xff]   ;;  %7252 = vmatprep.subr.bf16.mxu1 %v9321_v50  ;;  %v9334_v49 = vld [vmem:[#allocation12 + $0xe0] ss:$8 sps:$4 sm:$0xff]   ;;  %v6574_v10 = vld [vmem:[#allocation10] sm:$0x3] }
 0x532   : > { %v6507_v17 = vpack.c.bf16 %v6503_v30, %v6499_v44  ;;  %v9327_v6 = vld [vmem:[#allocation12 + $0xb4] ss:$8 sps:$4 sm:$0xff]   ;;  %v9330_v59 = vld [vmem:[#allocation12 + $0xc4] ss:$8 sps:$4 sm:$0xff]   ;;  %v9331_v1 = vld [vmem:[#allocation12 + $0xd0] ss:$8 sps:$4 sm:$0xff]   ;;  %v6579_v11 = vrot.slane %v6574_v10, %v10185_v2  ;;  %v6583_v12 = vrot.slane %v6574_v10, %v10189_v5 }
 0x533   : > { %v6509_v51 = vpack.c.bf16 %v6505_v26, %v6501_v52  ;;  %v9333_v57 = vld [vmem:[#allocation12 + $0xd4] ss:$8 sps:$4 sm:$0xff]   ;;  %v9336_v9 = vld [vmem:[#allocation12 + $0xe4] ss:$8 sps:$4 sm:$0xff]   ;;  %v9337_v42 = vld [vmem:[#allocation12 + $0xf0] ss:$8 sps:$4 sm:$0xff]  }
 0x534   : > { %6938 = vmatprep.mubr.bf16.mxu0 %v6507_v17  ;;  %7253 = vmatpush1.bf16.msra.mxu1 %v9319_v4  ;;  %v9339_v53 = vld [vmem:[#allocation12 + $0xf4] ss:$8 sps:$4 sm:$0xff]   ;;  %v9340_v4 = vld [vmem:[#allocation15 + $0x40] sm:$0xff]  }
 0x535   : > { %6939 = vmatmul.mubr.bf16.vlgmr.msra.gmra.mrb[12].mxu0 %v6506_v54  ;;  %7254 = vmatprep.subr.bf16.mxu1 %v9324_v19  ;;  %v9341_v19 = vld [vmem:[#allocation15] sm:$0xff]   ;;  %v9353_v10 = vld [vmem:[#allocation15 + $0x30] sm:$0xff]  }
 0x536   : > { %6950 = vmatpush1.bf16.msra.mxu0 %v9244_v28  ;;  %6981 = vmatprep.mubr.bf16.mxu0 %v6509_v51 }
 0x537   : > { %6951 = vmatprep.subr.bf16.mxu0 %v9249_v34 }
 0x538   : > { %7255 = vmatpush1.bf16.msra.mxu1 %v9322_v60  ;;  %v9342_v60 = vld [vmem:[#allocation15 + $0x48] sm:$0xff]  }
 0x539   : > { %7256 = vmatprep.subr.bf16.mxu1 %v9327_v6  ;;  %v9343_v6 = vld [vmem:[#allocation15 + $0x8] sm:$0xff]  }
 0x53a   : > { %6952 = vmatpush1.bf16.msra.mxu0 %v9247_v24 }
 0x53b   : > { %6953 = vmatprep.subr.bf16.mxu0 %v9252_v29 }
 0x53c   : > { %7257 = vmatpush1.bf16.msra.mxu1 %v9325_v47  ;;  %v9344_v47 = vld [vmem:[#allocation15 + $0x50] sm:$0xff]  }
 0x53d   : > { %7258 = vmatprep.subr.bf16.mxu1 %v9330_v59  ;;  %v9345_v59 = vld [vmem:[#allocation15 + $0x10] sm:$0xff]  }
 0x53e   : > { %6954 = vmatpush1.bf16.msra.mxu0 %v9250_v63 }
 0x53f   : > { %6955 = vmatprep.subr.bf16.mxu0 %v9255_v14 }
 0x540   : > { %7259 = vmatpush1.bf16.msra.mxu1 %v9328_v3  ;;  %v9346_v3 = vld [vmem:[#allocation15 + $0x58] sm:$0xff]  }
 0x541   : > { %7260 = vmatprep.subr.bf16.mxu1 %v9333_v57  ;;  %v9347_v57 = vld [vmem:[#allocation15 + $0x18] sm:$0xff]  }
 0x542   : > { %6956 = vmatpush1.bf16.msra.mxu0 %v9253_v0 }
 0x543   : > { %6957 = vmatprep.subr.bf16.mxu0 %v9258_v35 }
 0x544   : > { %7261 = vmatpush1.bf16.msra.mxu1 %v9331_v1  ;;  %v9348_v1 = vld [vmem:[#allocation15 + $0x60] sm:$0xff]  }
 0x545   : > { %7262 = vmatprep.subr.bf16.mxu1 %v9336_v9  ;;  %v9349_v9 = vld [vmem:[#allocation15 + $0x20] sm:$0xff]  }
 0x546   : > { %6958 = vmatpush1.bf16.msra.mxu0 %v9256_v36 }
 0x547   : > { %6959 = vmatprep.subr.bf16.mxu0 %v9261_v39 }
 0x548   : > { %7263 = vmatpush1.bf16.msra.mxu1 %v9334_v49  ;;  %v9350_v49 = vld [vmem:[#allocation15 + $0x68] sm:$0xff]  }
 0x549   : > { %7264 = vmatprep.subr.bf16.mxu1 %v9339_v53  ;;  %v9352_v53 = vld [vmem:[#allocation15 + $0x70] sm:$0xff]  }
 0x54a   : > { %6960 = vmatpush1.bf16.msra.mxu0 %v9259_v16 }
 0x54b   : > { %6961 = vmatprep.subr.bf16.mxu0 %v9264_v18 }
 0x54c   : > { %7265 = vmatpush1.bf16.msra.mxu1 %v9337_v42  ;;  %v9351_v42 = vld [vmem:[#allocation15 + $0x28] sm:$0xff]  }
 0x54d   : > { %8569 = vmatprep.subr.bf16.mxu1 %v9340_v4 }
 0x54e   : > { %6962 = vmatpush1.bf16.msra.mxu0 %v9262_v40 }
 0x54f   : > { %6963 = vmatprep.subr.bf16.mxu0 %v9267_v20 }
 0x552   : > { %6964 = vmatpush1.bf16.msra.mxu0 %v9265_v21 }
 0x553   : > { %6965 = vmatprep.subr.bf16.mxu0 %v9270_v22 }
 0x556   : > { %6966 = vmatpush1.bf16.msra.mxu0 %v9268_v23 }
 0x557   : > { %6967 = vmatprep.subr.bf16.mxu0 %v9273_v25 }
 0x55a   : > { %6968 = vmatpush1.bf16.msra.mxu0 %v9271_v62 }
 0x55b   : > { %6969 = vmatprep.subr.bf16.mxu0 %v9276_v46 }
 0x55e   : > { %6970 = vmatpush1.bf16.msra.mxu0 %v9274_v7 }
 0x55f   : > { %6971 = vmatprep.subr.bf16.mxu0 %v9279_v31 }
 0x562   : > { %6972 = vmatpush1.bf16.msra.mxu0 %v9277_v33 }
 0x563   : > { %6973 = vmatprep.subr.bf16.mxu0 %v9282_v55 }
 0x566   : > { %6974 = vmatpush1.bf16.msra.mxu0 %v9280_v8 }
 0x567   : > { %6975 = vmatprep.subr.bf16.mxu0 %v9285_v58 }
 0x56a   : > { %6976 = vmatpush1.bf16.msra.mxu0 %v9283_v37 }
 0x56b   : > { %6977 = vmatprep.subr.bf16.mxu0 %v9288_v61 }
 0x56e   : > { %6978 = vmatpush1.bf16.msra.mxu0 %v9286_v43 }
 0x56f   : > { %6979 = vmatprep.subr.bf16.mxu0 %v9291_v41 }
 0x572   : > { %6980 = vmatpush1.bf16.msra.mxu0 %v9289_v48 }
 0x575   : > { %6982 = vmatmul.mubr.bf16.vlgmr.msra.gmra.mrb[12].mxu0 %v6508_v56 }
 0x648   : > { %v6983_v45 = vpop.f32.mrb[12].mxu0 }
 0x649   : > { %v8615_v32 = vadd.f32 %v6983_v45, %v6579_v11  ;;  %v6985_v44 = vpop.f32.mrb[13].mxu0  ;;  %v7062_v45 = vld [vmem:[#allocation13] sm:$0x3] }
 0x64a   : > { %v8616_v30 = vadd.f32 %v6985_v44, %v6583_v12  ;;  %v6987_v54 = vpop.f32.mrb[14].mxu0  ;;  %v7071_v44 = vrot.slane %v7062_v45, %v10189_v5 }
 0x64b   : > { %v6992_v52 = vmul.f32 %v8615_v32, %v8615_v32  ;;  %v8617_v26 = vadd.f32 %v6987_v54, %v6579_v11  ;;  %v6989_v56 = vpop.f32.mrb[15].mxu0  ;;  %v9354_v11 = vld [vmem:[#allocation15 + $0x78] sm:$0xff]  }
 0x64c   : > { %v6993_v17 = vmul.f32 %v8616_v30, %v8616_v30  ;;  %v8618_v28 = vadd.f32 %v6989_v56, %v6583_v12  ;;  %v9355_v12 = vld [vmem:[#allocation15 + $0x38] sm:$0xff]  }
 0x64d   : > { %v6996_v51 = vmul.f32 %v8615_v32, %v6992_v52  ;;  %v6994_v34 = vmul.f32 %v8617_v26, %v8617_v26 }
 0x64e   : > { %v6997_v24 = vmul.f32 %v8616_v30, %v6993_v17  ;;  %v6995_v29 = vmul.f32 %v8618_v28, %v8618_v28 }
 0x64f   : > { %v7000_v63 = vmul.f32 0.044715, %v6996_v51  ;;  %v6998_v14 = vmul.f32 %v8617_v26, %v6994_v34 }
 0x650   : > { %v7001_v0 = vmul.f32 0.044715, %v6997_v24  ;;  %v6999_v35 = vmul.f32 %v8618_v28, %v6995_v29 }
 0x651   : > { %v7004_v36 = vadd.f32 %v8615_v32, %v7000_v63  ;;  %v7002_v39 = vmul.f32 0.044715, %v6998_v14 }
 0x652   : > { %v7005_v16 = vadd.f32 %v8616_v30, %v7001_v0  ;;  %v7003_v18 = vmul.f32 0.044715, %v6999_v35 }
 0x653   : > { %v7008_v40 = vmul.f32 0.7978846, %v7004_v36  ;;  %v7006_v20 = vadd.f32 %v8617_v26, %v7002_v39 }
 0x654   : > { %v7009_v21 = vmul.f32 0.7978846, %v7005_v16  ;;  %v7007_v22 = vadd.f32 %v8618_v28, %v7003_v18 }
 0x655   : > { %9404 = vtanh.f32 %v7008_v40  ;;  %v7010_v23 = vmul.f32 0.7978846, %v7006_v20 }
 0x656   : > { %9406 = vtanh.f32 %v7009_v21  ;;  %v7011_v25 = vmul.f32 0.7978846, %v7007_v22 }
 0x657   : > { %9408 = vtanh.f32 %v7010_v23 }
 0x658   : > { %9410 = vtanh.f32 %v7011_v25 }
 0x65f   : > { %v9405_v62 = vpop.eup %9404 }
 0x660   : > { %v9407_v46 = vpop.eup %9406  ;;  %v7016_v7 = vadd.f32 1.0, %v9405_v62 }
 0x661   : > { %v9409_v31 = vpop.eup %9408  ;;  %v7017_v33 = vadd.f32 1.0, %v9407_v46 }
 0x662   : > { %v9411_v55 = vpop.eup %9410  ;;  %v7020_v8 = vmul.f32 0.5, %v7016_v7  ;;  %v7018_v58 = vadd.f32 1.0, %v9409_v31 }
 0x663   : > { %v7019_v37 = vadd.f32 1.0, %v9411_v55  ;;  %v7021_v61 = vmul.f32 0.5, %v7017_v33 }
 0x664   : > { %v7022_v43 = vmul.f32 0.5, %v7018_v58  ;;  %v7024_v48 = vmul.f32 %v8615_v32, %v7020_v8  ;;  %v7067_v32 = vrot.slane %v7062_v45, %v10185_v2 }
 0x665   : > { %v7023_v41 = vmul.f32 0.5, %v7019_v37  ;;  %v7025_v38 = vmul.f32 %v8616_v30, %v7021_v61 }
 0x666   : > { %v7026_v15 = vmul.f32 %v8617_v26, %v7022_v43 }
 0x667   : > { %v7027_v13 = vmul.f32 %v8618_v28, %v7023_v41 }
 0x668   : > { %v7028_v27 = vpack.c.bf16 %v7026_v15, %v7024_v48 }
 0x669   : > { %v7029_v50 = vpack.c.bf16 %v7027_v13, %v7025_v38 }
 0x66b   : > { %7266 = vmatprep.mubr.bf16.mxu1 %v7029_v50 }
 0x66c   : > { %7267 = vmatmul.mubr.bf16.vlgmr.msra.gmra.mrb[12].mxu1 %v7028_v27 }
 0x66d   : > { %8570 = vmatpush3.bf16.msra.mxu1 %v9341_v19 }
 0x66e   : > { %8571 = vmatprep.subr.bf16.mxu1 %v9342_v60  ;;  %v8549_v60 = vld [vmem:[#allocation16] ss:$0 sm:$0xff] }
 0x671   : > { %8572 = vmatpush3.bf16.msra.mxu1 %v9343_v6 }
 0x672   : > { %8573 = vmatprep.subr.bf16.mxu1 %v9344_v47 }
 0x675   : > { %8574 = vmatpush3.bf16.msra.mxu1 %v9345_v59 }
 0x676   : > { %8575 = vmatprep.subr.bf16.mxu1 %v9346_v3 }
 0x679   : > { %8576 = vmatpush3.bf16.msra.mxu1 %v9347_v57 }
 0x67a   : > { %8577 = vmatprep.subr.bf16.mxu1 %v9348_v1 }
 0x67d   : > { %8578 = vmatpush3.bf16.msra.mxu1 %v9349_v9 }
 0x67e   : > { %8579 = vmatprep.subr.bf16.mxu1 %v9350_v49 }
 0x681   : > { %8580 = vmatpush3.bf16.msra.mxu1 %v9351_v42 }
 0x682   : > { %8581 = vmatprep.subr.bf16.mxu1 %v9352_v53 }
 0x685   : > { %8582 = vmatpush3.bf16.msra.mxu1 %v9353_v10 }
 0x686   : > { %8583 = vmatprep.subr.bf16.mxu1 %v9354_v11 }
 0x689   : > { %8584 = vmatpush3.bf16.msra.mxu1 %v9355_v12 }
 0x73f   : > { %v7268_v30 = vpop.f32.mrb[12].mxu1 }
 0x740   : > { %v7269_v54 = vadd.f32 %v7268_v30, %v7067_v32  ;;  %v7270_v52 = vpop.f32.mrb[13].mxu1 }
 0x741   : > { %v7271_v26 = vadd.f32 %v7270_v52, %v7071_v44  ;;  %v7272_v56 = vpop.f32.mrb[14].mxu1 }
 0x742   : > { %v7277_v17 = vmul.f32 %v7269_v54, %v7269_v54  ;;  %v7273_v28 = vadd.f32 %v7272_v56, %v7067_v32  ;;  %v7274_v51 = vpop.f32.mrb[15].mxu1 }
 0x743   : > { %v7278_v34 = vmul.f32 %v7271_v26, %v7271_v26  ;;  %v7275_v24 = vadd.f32 %v7274_v51, %v7071_v44 }
 0x744   : > { %v7281_v29 = vmul.f32 %v7277_v17, %v7269_v54  ;;  %v7279_v63 = vmul.f32 %v7273_v28, %v7273_v28 }
 0x745   : > { %v7282_v14 = vmul.f32 %v7278_v34, %v7271_v26  ;;  %v7280_v0 = vmul.f32 %v7275_v24, %v7275_v24 }
 0x746   : > { %v7285_v35 = vmul.f32 0.044715, %v7281_v29  ;;  %v7283_v36 = vmul.f32 %v7279_v63, %v7273_v28 }
 0x747   : > { %v7286_v39 = vmul.f32 0.044715, %v7282_v14  ;;  %v7284_v2 = vmul.f32 %v7280_v0, %v7275_v24 }
 0x748   : > { %v7289_v16 = vadd.f32 %v7285_v35, %v7269_v54  ;;  %v7287_v5 = vmul.f32 0.044715, %v7283_v36 }
 0x749   : > { %v7290_v18 = vadd.f32 %v7286_v39, %v7271_v26  ;;  %v7288_v40 = vmul.f32 0.044715, %v7284_v2 }
 0x74a   : > { %v7293_v20 = vmul.f32 0.7978846, %v7289_v16  ;;  %v7291_v21 = vadd.f32 %v7287_v5, %v7273_v28 }
 0x74b   : > { %v7294_v22 = vmul.f32 0.7978846, %v7290_v18  ;;  %v7292_v23 = vadd.f32 %v7288_v40, %v7275_v24 }
 0x74c   : > { %9412 = vtanh.f32 %v7293_v20  ;;  %v7295_v25 = vmul.f32 0.7978846, %v7291_v21 }
 0x74d   : > { %9414 = vtanh.f32 %v7294_v22  ;;  %v7296_v62 = vmul.f32 0.7978846, %v7292_v23 }
 0x74e   : > { %9416 = vtanh.f32 %v7295_v25 }
 0x74f   : > { %9418 = vtanh.f32 %v7296_v62 }
 0x756   : > { %v9413_v46 = vpop.eup %9412 }
 0x757   : > { %v9415_v7 = vpop.eup %9414  ;;  %v7301_v31 = vadd.f32 1.0, %v9413_v46 }
 0x758   : > { %v9417_v33 = vpop.eup %9416  ;;  %v7302_v55 = vadd.f32 1.0, %v9415_v7 }
 0x759   : > { %v9419_v8 = vpop.eup %9418  ;;  %v7305_v58 = vmul.f32 0.5, %v7301_v31  ;;  %v7303_v37 = vadd.f32 1.0, %v9417_v33 }
 0x75a   : > { %v7304_v61 = vadd.f32 1.0, %v9419_v8  ;;  %v7306_v43 = vmul.f32 0.5, %v7302_v55 }
 0x75b   : > { %v7307_v41 = vmul.f32 0.5, %v7303_v37  ;;  %v7309_v15 = vmul.f32 %v7305_v58, %v7269_v54 }
 0x75c   : > { %v7308_v48 = vmul.f32 0.5, %v7304_v61  ;;  %v7310_v13 = vmul.f32 %v7306_v43, %v7271_v26 }
 0x75d   : > { %v7311_v38 = vmul.f32 %v7307_v41, %v7273_v28 }
 0x75e   : > { %v7312_v27 = vmul.f32 %v7308_v48, %v7275_v24 }
 0x75f   : > { %v7313_v50 = vpack.c.bf16 %v7311_v38, %v7309_v15 }
 0x760   : > { %v7314_v4 = vpack.c.bf16 %v7312_v27, %v7310_v13 }
 0x762   : > { %7482 = vmatprep.mubr.bf16.mxu1 %v7314_v4 }
 0x763   : > { %7483 = vmatmul.mubr.bf16.vlgmr.msra.gmra.mrb[16].mxu1 %v7313_v50 }
 0x836   : > { %v8585_v19 = vpop.f32.mrb[16].mxu1 }
 0x837   : > { %v8586_v6 = vpop.f32.mrb[17].mxu1 }
 0x838   : > { %v8587_v47 = vadd.f32 %v8586_v6, %v8585_v19  ;;  %v8588_v59 = vpop.f32.mrb[18].mxu1 }
 0x839   : > { %v8589_v3 = vpop.f32.mrb[19].mxu1 }
 0x83a   : > { %v7485_v57 = vadd.f32 %v8587_v47, %v8549_v60  ;;  %v8590_v1 = vadd.f32 %v8589_v3, %v8588_v59 }
 0x83c   : > { %7491 = vst [vmem:[%s527_s28] sm:$0xff] %v7485_v57  ;;  %v7488_v9 = vadd.f32 %v8590_v1, %v8549_v60 }
 0x83e   : > { %7492 = vst [vmem:[%s527_s28 + $0x8] sm:$0xff] %v7488_v9 }
 0x83f PF: > { %s27_s17 = sadd.s32 1, %s9731_s17  }
 0x840   : > { %p24_p7 = scmp.ge.s32.totalorder %s27_s17, 4  }
 0x842   :  { %26 = sbr.rel (!%p24_p7) target bundleno = 6 (0x6), region = 135 }
 0x849   :  { %7515 = vsyncpa [#allocation3], 1 }
 0x84a   :  { %7517 = vsyncpa [#allocation3 + $0x1], 1 }
 0x84b   :  { %7518 = vsyncpa [#allocation5], 1 }
 0x84c   :  { %7519 = vsyncpa [#allocation8], 1 }
 0x84d   :  { %7520 = vsyncpa [#allocation11], 1 }
 0x84e   :  { %7521 = vsyncpa [#allocation14], 1 }
 0x84f   :  { %7522 = vsyncpa [#allocation17], 1 }

</bundles_post_ra>
